<compile_context>
chip_gen: v7x
topology: tpu7x:2x2x1
jax: 0.10.0
libtpu: 0.0.40
codegen_flags: <defaults>
</compile_context>

<pallas_src>
import jax
import jax.numpy as jnp
from jax import lax
from jax.experimental import pallas as pl
from jax.experimental.pallas import tpu as pltpu

BN_EPS = 1e-5
LRELU_SLOPE = 0.2


def _round_up(x, m):
    return (x + m - 1) // m * m


def _vmem_limit(est_bytes):
    return int(min(48 * 1024 * 1024, max(16 * 1024 * 1024, 2 * est_bytes)))


def _pick_th(Ho, Wop, target=512):
    """Largest divisor of Ho with TH * Wop <= target (>= 1)."""
    best = 1
    for th in range(1, Ho + 1):
        if Ho % th == 0 and th * Wop <= target:
            best = th
    return best


def _probe_weight_single_buffer():
    """Check whether pipeline_mode=pl.Buffered(1) lowers on this Pallas version."""
    try:
        def k(x_ref, o_ref):
            o_ref[...] = x_ref[...] + 1.0

        out = pl.pallas_call(
            k,
            grid=(2,),
            in_specs=[pl.BlockSpec((8, 128), lambda i: (0, 0),
                                   pipeline_mode=pl.Buffered(1))],
            out_specs=pl.BlockSpec((8, 128), lambda i: (i, 0)),
            out_shape=jax.ShapeDtypeStruct((16, 128), jnp.float32),
        )(jnp.zeros((8, 128), jnp.float32))
        jax.block_until_ready(out)
        return True
    except Exception:
        return False


_WEIGHT_SINGLE_BUFFER = _probe_weight_single_buffer()


# ----------------------------- Pallas kernels ------------------------------

def _make_conv_kernel(TH, Wo, Wop, apply_prologue, emit_stats):
    """Conv(k=4,s=2,p=1) on a 2x2 space-to-depth input strip.

    apply_prologue: fold the *previous* layer's BN scale/shift + LeakyReLU into the
                    loaded strip (padding value was chosen so borders map to 0).
    emit_stats    : store the raw pre-BN conv output plus per-tile (sum, centred-M2)
                    BN statistics; otherwise apply LeakyReLU in the epilogue.
    """
    def kernel(*refs):
        if apply_prologue:
            x_ref, w_ref, sc_ref, sh_ref, *outs = refs
        else:
            x_ref, w_ref, *outs = refs
        if emit_stats:
            o_ref, st_ref = outs
        else:
            (o_ref,) = outs

        r0 = pl.multiple_of(pl.program_id(1) * TH, TH)
        rows = x_ref[0, pl.ds(r0, TH + 1), :, :]          # (TH+1, Wop+1, 4*Cin) bf16

        if apply_prologue:
            c4 = rows.shape[-1]
            z = (rows.astype(jnp.float32) * sc_ref[...].reshape(1, 1, c4)
                 + sh_ref[...].reshape(1, 1, c4))
            z = jnp.where(z > 0, z, LRELU_SLOPE * z)
            rows = z.astype(jnp.bfloat16)

        # 4 shifted contiguous slices -> 4 MXU dots accumulated in f32.
        acc = None
        for s, (a, b) in enumerate(((0, 0), (0, 1), (1, 0), (1, 1))):
            patch = rows[a:a + TH, b:b + Wop, :]
            patch = patch.reshape(TH * Wop, patch.shape[-1])
            part = jnp.dot(patch, w_ref[s], preferred_element_type=jnp.float32)
            acc = part if acc is None else acc + part

        acc = acc.reshape(TH, Wop, acc.shape[-1])[:, :Wo, :]   # drop alignment cols

        if emit_stats:
            cnt = float(TH * Wo)
            s1 = jnp.sum(acc, axis=(0, 1)).reshape(1, -1)
            mu = s1 / cnt
            d = acc - mu.reshape(1, 1, -1)
            m2 = jnp.sum(d * d, axis=(0, 1)).reshape(1, -1)
            st_ref[0, 0:1, :] = s1
            st_ref[0, 1:2, :] = m2
            st_ref[0, 2:8, :] = jnp.zeros((6, acc.shape[-1]), jnp.float32)
            o_ref[0, :, :, :] = acc.astype(jnp.bfloat16)        # raw pre-BN output
        else:
            y = jnp.where(acc > 0, acc, LRELU_SLOPE * acc)
            o_ref[0, :, :, :] = y.astype(jnp.bfloat16)
    return kernel


def _bn_lrelu_kernel(y_ref, sc_ref, sh_ref, o_ref):
    """Standalone folded-BN + LeakyReLU (used only for the last layer)."""
    y = y_ref[...].astype(jnp.float32) * sc_ref[...] + sh_ref[...]
    o_ref[...] = jnp.where(y > 0, y, LRELU_SLOPE * y)


# ------------------------------ JAX glue -----------------------------------

def _pad_s2d(x, Hs, Ws, pad_val):
    """Spatial pad-by-1 + 2x2 space-to-depth: (B,Hi,Wi,C) -> (B,Hs,Ws,4C) bf16.

    s2d channel index = (p*2+q)*C + c for parity (p, q).  pad_val (per channel) is
    used instead of zero when the downstream kernel applies a fused BN prologue."""
    B, Hi, Wi, C = x.shape
    Hp, Wp = 2 * Hs, 2 * Ws
    x = x.astype(jnp.bfloat16)
    if pad_val is None:
        xp = jnp.pad(x, ((0, 0), (1, Hp - Hi - 1), (1, Wp - Wi - 1), (0, 0)))
    else:
        base = jnp.broadcast_to(pad_val.astype(jnp.bfloat16).reshape(1, 1, 1, C),
                                (B, Hp, Wp, C))
        xp = base.at[:, 1:Hi + 1, 1:Wi + 1, :].set(x)
    xs = xp.reshape(B, Hs, 2, Ws, 2, C)
    xs = xs.transpose(0, 1, 3, 2, 4, 5).reshape(B, Hs, Ws, 4 * C)
    return xs


def _prep_weight(w):
    """(Cout, Cin, 4, 4) PyTorch weight -> (4, 4*Cin, Cout) bf16 matching the s2d
    packing: leading index = 2*a+b (row/col shift), K index = (p*2+q)*Cin + c."""
    Cout, Cin = w.shape[0], w.shape[1]
    wt = jnp.transpose(w, (2, 3, 1, 0))            # (i, j, Cin, Cout)
    wt = wt.reshape(2, 2, 2, 2, Cin, Cout)         # (a, p, b, q, Cin, Cout)
    wt = wt.transpose(0, 2, 1, 3, 4, 5)            # (a, b, p, q, Cin, Cout)
    return wt.reshape(4, 4 * Cin, Cout).astype(jnp.bfloat16)


def conv4s2_layer(x, w, *, prev_bn=None, want_stats, m_target=512):
    """Conv2d(4, stride 2, pad 1, bias=False) with optional fused input BN+LReLU.

    x: (B, Hi, Wi, Cin) channels-last (post-activation, or raw pre-BN output of the
       previous layer when prev_bn=(scale, shift) is given).
    Returns post-LReLU output (no stats) or (raw conv output, stats aux)."""
    B, Hi, Wi, Cin = x.shape
    Cout = w.shape[0]
    Ho, Wo = Hi // 2, Wi // 2
    Wop = _round_up(Wo, 16)                 # keeps the in-kernel patch reshape aligned
    Hs, Ws = Ho + 1, Wop + 1
    C4 = 4 * Cin
    TH = _pick_th(Ho, Wop, m_target)
    RT = Ho // TH

    pad_val = None
    if prev_bn is not None:
        scale_p, shift_p = prev_bn
        pad_val = -shift_p / jnp.where(scale_p == 0, 1.0, scale_p)

    xs = _pad_s2d(x, Hs, Ws, pad_val)       # (B, Hs, Ws, C4) bf16
    w4 = _prep_weight(w)                    # (4, C4, Cout) bf16

    kernel = _make_conv_kernel(TH, Wo, Wop, prev_bn is not None, want_stats)

    w_kwargs = {"pipeline_mode": pl.Buffered(1)} if _WEIGHT_SINGLE_BUFFER else {}
    in_specs = [pl.BlockSpec((1, Hs, Ws, C4), lambda b, r: (b, 0, 0, 0)),
                pl.BlockSpec((4, C4, Cout), lambda b, r: (0, 0, 0), **w_kwargs)]
    args = [xs, w4]
    if prev_bn is not None:
        in_specs += [pl.BlockSpec((1, C4), lambda b, r: (0, 0)),
                     pl.BlockSpec((1, C4), lambda b, r: (0, 0))]
        args += [jnp.tile(prev_bn[0], 4).reshape(1, C4).astype(jnp.float32),
                 jnp.tile(prev_bn[1], 4).reshape(1, C4).astype(jnp.float32)]

    out_specs = pl.BlockSpec((1, TH, Wo, Cout), lambda b, r: (b, r, 0, 0))
    out_shape = jax.ShapeDtypeStruct((B, Ho, Wo, Cout), jnp.bfloat16)
    if want_stats:
        out_specs = (out_specs, pl.BlockSpec((1, 8, Cout), lambda b, r: (b, r, 0)))
        out_shape = (out_shape, jax.ShapeDtypeStruct((B, RT * 8, Cout), jnp.float32))

    flops = 2 * B * Ho * Wop * (4 * C4) * Cout
    bytes_accessed = (xs.size * 2 + w4.size * 2 + B * Ho * Wo * Cout * 2
                      + (B * RT * 8 * Cout * 4 if want_stats else 0))
    vmem_est = (2 * Hs * Ws * C4 * 2                              # s2d image (x2 buf)
                + (1 if _WEIGHT_SINGLE_BUFFER else 2) * 4 * C4 * Cout * 2
                + 2 * TH * Wo * Cout * 2 + 2 * 8 * Cout * 4       # out / stats blocks
                + (TH + 1) * Ws * C4 * 6                          # strip (bf16 + f32)
                + 4 * TH * Wop * C4 * 2                           # shifted patches
                + 3 * TH * Wop * Cout * 4)                        # f32 accumulator

    out = pl.pallas_call(
        kernel,
        grid=(B, RT),
        in_specs=in_specs,
        out_specs=out_specs,
        out_shape=out_shape,
        compiler_params=pltpu.CompilerParams(
            dimension_semantics=("parallel", "arbitrary"),
            vmem_limit_bytes=_vmem_limit(vmem_est)),
        cost_estimate=pl.CostEstimate(flops=flops, transcendentals=0,
                                      bytes_accessed=bytes_accessed),
    )(*args)

    if want_stats:
        y, stats = out
        return y, (stats, RT, TH * Wo, B * Ho * Wo)
    return out


def _bn_from_stats(stats, rt, tile_count, total_count, gamma, beta):
    """Merge per-tile (sum, centred M2) into folded BN scale/shift (training mode)."""
    B, _, C = stats.shape
    st = stats.reshape(B, rt, 8, C)
    sums = st[:, :, 0, :]
    m2s = st[:, :, 1, :]
    mean = jnp.sum(sums, axis=(0, 1)) / total_count
    mean_t = sums / tile_count
    var = (jnp.sum(m2s, axis=(0, 1))
           + tile_count * jnp.sum(jnp.square(mean_t - mean), axis=(0, 1))) / total_count
    var = jnp.maximum(var, 0.0)
    scale = gamma * lax.rsqrt(var + BN_EPS)
    shift = beta - mean * scale
    return scale, shift


def _bn_lrelu_apply(y, scale, shift):
    """Standalone BN + LeakyReLU for the last layer; y: (B, Ho, Wo, C) bf16 -> f32."""
    B, Ho, Wo, C = y.shape
    M = B * Ho * Wo
    y2d = y.reshape(M, C)
    TM = min(1024, _round_up(M, 16))
    Mp = _round_up(M, TM)
    y2d = jnp.pad(y2d, ((0, Mp - M), (0, 0)))
    out = pl.pallas_call(
        _bn_lrelu_kernel,
        grid=(Mp // TM,),
        in_specs=[pl.BlockSpec((TM, C), lambda i: (i, 0)),
                  pl.BlockSpec((1, C), lambda i: (0, 0)),
                  pl.BlockSpec((1, C), lambda i: (0, 0))],
        out_specs=pl.BlockSpec((TM, C), lambda i: (i, 0)),
        out_shape=jax.ShapeDtypeStruct((Mp, C), jnp.float32),
        compiler_params=pltpu.CompilerParams(
            dimension_semantics=("parallel",),
            vmem_limit_bytes=_vmem_limit(6 * TM * C * 4)),
        cost_estimate=pl.CostEstimate(flops=4 * Mp * C, transcendentals=0,
                                      bytes_accessed=Mp * C * 6 + 2 * C * 4),
    )(y2d, scale.reshape(1, C).astype(jnp.float32),
      shift.reshape(1, C).astype(jnp.float32))
    return out[:M].reshape(B, Ho, Wo, C)


def init_params(key, ndf):
    """encode_img parameters: conv ~ N(0, 0.02), BN gamma=1 beta=0 (PyTorch defaults)."""
    keys = jax.random.split(key, 4)
    chans = [(3, ndf), (ndf, ndf * 2), (ndf * 2, ndf * 4), (ndf * 4, ndf * 8)]
    params = []
    for k, (cin, cout) in zip(keys, chans):
        w = 0.02 * jax.random.normal(k, (cout, cin, 4, 4), jnp.float32)
        params.append((w, jnp.ones((cout,), jnp.float32), jnp.zeros((cout,), jnp.float32)))
    return params
    # NOTE: D_GET_LOGITS params exist in the PyTorch module but are unused by D_STY.forward.


def d_sty_forward(story, params):
    """story: (N, C, video_len, D3, D4) -> (N, video_len*8*ndf, D3/16, D4/16)."""
    N, C, video_len, D3, D4 = story.shape
    x = story.transpose(0, 2, 1, 3, 4).reshape(N * video_len, C, D3, D4)
    x = x.transpose(0, 2, 3, 1)                     # channels-last, once

    (w1, _, _), (w2, g2, b2), (w3, g3, b3), (w4, g4, b4) = params

    # layer 1: conv + LeakyReLU (fused epilogue)
    z1 = conv4s2_layer(x, w1, prev_bn=None, want_stats=False)

    # layer 2: conv + batch stats; BN+LReLU folded into layer 3's prologue
    y2, aux2 = conv4s2_layer(z1, w2, prev_bn=None, want_stats=True)
    bn2 = _bn_from_stats(*aux2, g2, b2)

    # layer 3: fused BN2+LReLU prologue + conv + stats
    y3, aux3 = conv4s2_layer(y2, w3, prev_bn=bn2, want_stats=True)
    bn3 = _bn_from_stats(*aux3, g3, b3)

    # layer 4: fused BN3+LReLU prologue + conv + stats
    y4, aux4 = conv4s2_layer(y3, w4, prev_bn=bn3, want_stats=True)
    bn4 = _bn_from_stats(*aux4, g4, b4)

    # final standalone BN4 + LeakyReLU
    z4 = _bn_lrelu_apply(y4, *bn4)                  # (B, S3, S4, C1) f32

    # squeeze -> permute(2,3,0,1) -> view -> permute(2,3,0,1) of the PyTorch code
    Bz, S3, S4, C1 = z4.shape
    emb = z4.reshape(N, video_len, S3, S4, C1)
    emb = emb.transpose(0, 1, 4, 2, 3).reshape(N, video_len * C1, S3, S4)
    return emb


# ----------------------------- pure-JAX reference ---------------------------

def _ref_forward(story, params):
    """Reference mirroring the kernels' bf16 storage points (training-mode BN)."""
    N, C, video_len, D3, D4 = story.shape
    x = story.transpose(0, 2, 1, 3, 4).reshape(N * video_len, C, D3, D4)
    x = x.transpose(0, 2, 3, 1)

    def conv(z, w):
        return lax.conv_general_dilated(
            z.astype(jnp.bfloat16),
            jnp.transpose(w, (2, 3, 1, 0)).astype(jnp.bfloat16),
            window_strides=(2, 2), padding=((1, 1), (1, 1)),
            dimension_numbers=("NHWC", "HWIO", "NHWC"),
            preferred_element_type=jnp.float32)

    (w1, _, _) = params[0]
    y = conv(x, w1)
    z = jnp.where(y > 0, y, LRELU_SLOPE * y).astype(jnp.bfloat16)
    for li, (w, gamma, beta) in enumerate(params[1:]):
        y = conv(z, w)
        mean = jnp.mean(y, axis=(0, 1, 2))
        var = jnp.mean(jnp.square(y - mean), axis=(0, 1, 2))
        scale = gamma * lax.rsqrt(var + BN_EPS)
        shift = beta - mean * scale
        yb = y.astype(jnp.bfloat16).astype(jnp.float32)     # bf16 storage of raw conv
        a = yb * scale + shift
        a = jnp.where(a > 0, a, LRELU_SLOPE * a)
        z = a.astype(jnp.bfloat16) if li < 2 else a         # last layer stays f32

    Bz, S3, S4, C1 = z.shape
    emb = z.reshape(N, video_len, S3, S4, C1)
    emb = emb.transpose(0, 1, 4, 2, 3).reshape(N, video_len * C1, S3, S4)
    return emb.astype(jnp.float32)


# --------------------------------- main -------------------------------------

if __name__ == "__main__":
    ndf = 8                           # cfg.GAN.DF_DIM (small synthetic value)
    N, C, video_len = 2, 3, 2
    D3, D4 = 64, 32                   # non-square to exercise the output permutes

    key = jax.random.PRNGKey(0)
    k_story, k_params = jax.random.split(key)
    story = jax.random.normal(k_story, (N, C, video_len, D3, D4), jnp.float32)
    params = init_params(k_params, ndf)

    out = jax.block_until_ready(jax.jit(d_sty_forward)(story, params))
    assert out.shape == (N, video_len * ndf * 8, D3 // 16, D4 // 16), out.shape
    assert bool(jnp.all(jnp.isfinite(out)))

    ref = jax.block_until_ready(jax.jit(_ref_forward)(story, params))
    err = float(jnp.max(jnp.abs(out - ref)))
    assert err < 0.1, f"max abs error vs reference: {err}"

    print("KERNEL_OK")
</pallas_src>

<mosaic_0001>
module attributes {stable_mosaic.version = 11 : i64} {
  func.func @k(%arg0: i32, %arg1: memref<8x128xf32, #tpu.memory_space<vmem>>, %arg2: memref<8x128xf32, #tpu.memory_space<vmem>>) attributes {dimension_semantics = [#tpu.dimension_semantics<arbitrary>], iteration_bounds = array<i64: 2>, scalar_prefetch = 0 : i64, scratch_operands = 0 : i64, tpu.core_type = #tpu.core_type<tc>, window_params = [{pipeline_mode = #tpu.pipeline_mode<synchronous>, transform_indices = @transform_0, window_bounds = array<i64: 8, 128>}, {transform_indices = @transform_1, window_bounds = array<i64: 8, 128>}]} {
    %c0 = arith.constant 0 : index
    %c0_0 = arith.constant 0 : index
    %0 = vector.load %arg1[%c0, %c0_0] : memref<8x128xf32, #tpu.memory_space<vmem>>, vector<8x128xf32>
    %cst = arith.constant 1.000000e+00 : f32
    %1 = vector.broadcast %cst : f32 to vector<8x128xf32>
    %2 = arith.addf %0, %1 : vector<8x128xf32>
    %c0_1 = arith.constant 0 : index
    %c0_2 = arith.constant 0 : index
    %3 = vector.load %arg2[%c0_1, %c0_2] : memref<8x128xf32, #tpu.memory_space<vmem>>, vector<8x128xf32>
    tpu.vector_store %arg2[%c0_1, %c0_2], %2 {strides = array<i32>} : memref<8x128xf32, #tpu.memory_space<vmem>>, vector<8x128xf32>,
    return
  }
  func.func @transform_0(%arg0: i32) -> (i32, i32) {
    %c0_i32 = arith.constant 0 : i32
    %c0_i32_0 = arith.constant 0 : i32
    %c0_i32_1 = arith.constant 0 : i32
    return %c0_i32, %c0_i32_0 : i32, i32
  }
  func.func @transform_1(%arg0: i32) -> (i32, i32) {
    %c0_i32 = arith.constant 0 : i32
    %c0_i32_0 = arith.constant 0 : i32
    return %arg0, %c0_i32 : i32, i32
  }
}

module attributes {stable_mosaic.version = 11 : i64} {
  func.func @kernel(%arg0: i32, %arg1: i32, %arg2: memref<1x33x17x12xbf16, #tpu.memory_space<vmem>>, %arg3: memref<4x12x8xbf16, #tpu.memory_space<vmem>>, %arg4: memref<1x32x16x8xbf16, #tpu.memory_space<vmem>>) attributes {dimension_semantics = [#tpu.dimension_semantics<parallel>, #tpu.dimension_semantics<arbitrary>], iteration_bounds = array<i64: 4, 1>, scalar_prefetch = 0 : i64, scratch_operands = 0 : i64, tpu.core_type = #tpu.core_type<tc>, window_params = [{transform_indices = @transform_0, window_bounds = array<i64: 1, 33, 17, 12>}, {pipeline_mode = #tpu.pipeline_mode<synchronous>, transform_indices = @transform_1, window_bounds = array<i64: 4, 12, 8>}, {transform_indices = @transform_2, window_bounds = array<i64: 1, 32, 16, 8>}]} {
    %c32_i32 = arith.constant 32 : i32
    %0 = arith.muli %arg1, %c32_i32 : i32
    %1 = tpu.assume_multiple %0, 32 : i32
    %c0 = arith.constant 0 : index
    %2 = arith.index_cast %1 : i32 to index
    %c0_0 = arith.constant 0 : index
    %c0_1 = arith.constant 0 : index
    %3 = vector.load %arg2[%c0, %2, %c0_0, %c0_1] : memref<1x33x17x12xbf16, #tpu.memory_space<vmem>>, vector<1x33x17x12xbf16>
    %4 = vector.shape_cast %3 : vector<1x33x17x12xbf16> to vector<33x17x12xbf16>
    %5 = vector.extract_strided_slice %4 {offsets = [0, 0, 0], sizes = [32, 16, 12], strides = [1, 1, 1]} : vector<33x17x12xbf16> to vector<32x16x12xbf16>
    %6 = vector.shape_cast %5 : vector<32x16x12xbf16> to vector<512x12xbf16>
    %c0_2 = arith.constant 0 : index
    %c0_3 = arith.constant 0 : index
    %c0_4 = arith.constant 0 : index
    %7 = vector.load %arg3[%c0_2, %c0_3, %c0_4] : memref<4x12x8xbf16, #tpu.memory_space<vmem>>, vector<1x12x8xbf16>
    %8 = vector.shape_cast %7 : vector<1x12x8xbf16> to vector<12x8xbf16>
    %cst = arith.constant dense<0.000000e+00> : vector<512x8xf32>
    %9 = tpu.matmul %6, %8, %cst {dimension_numbers = #tpu.dot_dimension_numbers<[1], [0], [0], [1], [0, 0, 1, 1], [], []>} : vector<512x12xbf16>, vector<12x8xbf16>, vector<512x8xf32> -> vector<512x8xf32>
    %10 = vector.extract_strided_slice %4 {offsets = [0, 1, 0], sizes = [32, 16, 12], strides = [1, 1, 1]} : vector<33x17x12xbf16> to vector<32x16x12xbf16>
    %11 = vector.shape_cast %10 : vector<32x16x12xbf16> to vector<512x12xbf16>
    %c1 = arith.constant 1 : index
    %c0_5 = arith.constant 0 : index
    %c0_6 = arith.constant 0 : index
    %12 = vector.load %arg3[%c1, %c0_5, %c0_6] : memref<4x12x8xbf16, #tpu.memory_space<vmem>>, vector<1x12x8xbf16>
    %13 = vector.shape_cast %12 : vector<1x12x8xbf16> to vector<12x8xbf16>
    %cst_7 = arith.constant dense<0.000000e+00> : vector<512x8xf32>
    %14 = tpu.matmul %11, %13, %cst_7 {dimension_numbers = #tpu.dot_dimension_numbers<[1], [0], [0], [1], [0, 0, 1, 1], [], []>} : vector<512x12xbf16>, vector<12x8xbf16>, vector<512x8xf32> -> vector<512x8xf32>
    %15 = arith.addf %9, %14 : vector<512x8xf32>
    %16 = vector.extract_strided_slice %4 {offsets = [1, 0, 0], sizes = [32, 16, 12], strides = [1, 1, 1]} : vector<33x17x12xbf16> to vector<32x16x12xbf16>
    %17 = vector.shape_cast %16 : vector<32x16x12xbf16> to vector<512x12xbf16>
    %c2 = arith.constant 2 : index
    %c0_8 = arith.constant 0 : index
    %c0_9 = arith.constant 0 : index
    %18 = vector.load %arg3[%c2, %c0_8, %c0_9] : memref<4x12x8xbf16, #tpu.memory_space<vmem>>, vector<1x12x8xbf16>
    %19 = vector.shape_cast %18 : vector<1x12x8xbf16> to vector<12x8xbf16>
    %cst_10 = arith.constant dense<0.000000e+00> : vector<512x8xf32>
    %20 = tpu.matmul %17, %19, %cst_10 {dimension_numbers = #tpu.dot_dimension_numbers<[1], [0], [0], [1], [0, 0, 1, 1], [], []>} : vector<512x12xbf16>, vector<12x8xbf16>, vector<512x8xf32> -> vector<512x8xf32>
    %21 = arith.addf %15, %20 : vector<512x8xf32>
    %22 = vector.extract_strided_slice %4 {offsets = [1, 1, 0], sizes = [32, 16, 12], strides = [1, 1, 1]} : vector<33x17x12xbf16> to vector<32x16x12xbf16>
    %23 = vector.shape_cast %22 : vector<32x16x12xbf16> to vector<512x12xbf16>
    %c3 = arith.constant 3 : index
    %c0_11 = arith.constant 0 : index
    %c0_12 = arith.constant 0 : index
    %24 = vector.load %arg3[%c3, %c0_11, %c0_12] : memref<4x12x8xbf16, #tpu.memory_space<vmem>>, vector<1x12x8xbf16>
    %25 = vector.shape_cast %24 : vector<1x12x8xbf16> to vector<12x8xbf16>
    %cst_13 = arith.constant dense<0.000000e+00> : vector<512x8xf32>
    %26 = tpu.matmul %23, %25, %cst_13 {dimension_numbers = #tpu.dot_dimension_numbers<[1], [0], [0], [1], [0, 0, 1, 1], [], []>} : vector<512x12xbf16>, vector<12x8xbf16>, vector<512x8xf32> -> vector<512x8xf32>
    %27 = arith.addf %21, %26 : vector<512x8xf32>
    %28 = vector.shape_cast %27 : vector<512x8xf32> to vector<32x16x8xf32>
    %cst_14 = arith.constant 0.000000e+00 : f32
    %29 = vector.broadcast %cst_14 : f32 to vector<32x16x8xf32>
    %30 = arith.cmpf ogt, %28, %29 : vector<32x16x8xf32>
    %cst_15 = arith.constant 2.000000e-01 : f32
    %31 = vector.broadcast %cst_15 : f32 to vector<32x16x8xf32>
    %32 = arith.mulf %31, %28 : vector<32x16x8xf32>
    %33 = arith.select %30, %28, %32 : vector<32x16x8xi1>, vector<32x16x8xf32>
    %34 = arith.truncf %33 : vector<32x16x8xf32> to vector<32x16x8xbf16>
    %c0_16 = arith.constant 0 : index
    %c0_17 = arith.constant 0 : index
    %c0_18 = arith.constant 0 : index
    %c0_19 = arith.constant 0 : index
    %35 = vector.load %arg4[%c0_16, %c0_17, %c0_18, %c0_19] : memref<1x32x16x8xbf16, #tpu.memory_space<vmem>>, vector<1x32x16x8xbf16>
    %36 = vector.shape_cast %35 : vector<1x32x16x8xbf16> to vector<32x16x8xbf16>
    %37 = vector.shape_cast %34 : vector<32x16x8xbf16> to vector<1x32x16x8xbf16>
    tpu.vector_store %arg4[%c0_16, %c0_17, %c0_18, %c0_19], %37 {strides = array<i32>} : memref<1x32x16x8xbf16, #tpu.memory_space<vmem>>, vector<1x32x16x8xbf16>,
    return
  }
  func.func @transform_0(%arg0: i32, %arg1: i32) -> (i32, i32, i32, i32) {
    %c0_i32 = arith.constant 0 : i32
    %c0_i32_0 = arith.constant 0 : i32
    %c0_i32_1 = arith.constant 0 : i32
    %c0_i32_2 = arith.constant 0 : i32
    return %arg0, %c0_i32, %c0_i32_0, %c0_i32_1 : i32, i32, i32, i32
  }
  func.func @transform_1(%arg0: i32, %arg1: i32) -> (i32, i32, i32) {
    %c0_i32 = arith.constant 0 : i32
    %c0_i32_0 = arith.constant 0 : i32
    %c0_i32_1 = arith.constant 0 : i32
    %c0_i32_2 = arith.constant 0 : i32
    return %c0_i32, %c0_i32_0, %c0_i32_1 : i32, i32, i32
  }
  func.func @transform_2(%arg0: i32, %arg1: i32) -> (i32, i32, i32, i32) {
    %c0_i32 = arith.constant 0 : i32
    %c0_i32_0 = arith.constant 0 : i32
    %c0_i32_1 = arith.constant 0 : i32
    return %arg0, %arg1, %c0_i32, %c0_i32_0 : i32, i32, i32, i32
  }
}

module attributes {stable_mosaic.version = 11 : i64} {
  func.func @kernel(%arg0: i32, %arg1: i32, %arg2: memref<1x17x17x32xbf16, #tpu.memory_space<vmem>>, %arg3: memref<4x32x16xbf16, #tpu.memory_space<vmem>>, %arg4: memref<1x16x8x16xbf16, #tpu.memory_space<vmem>>, %arg5: memref<1x8x16xf32, #tpu.memory_space<vmem>>) attributes {dimension_semantics = [#tpu.dimension_semantics<parallel>, #tpu.dimension_semantics<arbitrary>], iteration_bounds = array<i64: 4, 1>, scalar_prefetch = 0 : i64, scratch_operands = 0 : i64, tpu.core_type = #tpu.core_type<tc>, window_params = [{transform_indices = @transform_0, window_bounds = array<i64: 1, 17, 17, 32>}, {pipeline_mode = #tpu.pipeline_mode<synchronous>, transform_indices = @transform_1, window_bounds = array<i64: 4, 32, 16>}, {transform_indices = @transform_2, window_bounds = array<i64: 1, 16, 8, 16>}, {transform_indices = @transform_3, window_bounds = array<i64: 1, 8, 16>}]} {
    %c16_i32 = arith.constant 16 : i32
    %0 = arith.muli %arg1, %c16_i32 : i32
    %1 = tpu.assume_multiple %0, 16 : i32
    %c0 = arith.constant 0 : index
    %2 = arith.index_cast %1 : i32 to index
    %c0_0 = arith.constant 0 : index
    %c0_1 = arith.constant 0 : index
    %3 = vector.load %arg2[%c0, %2, %c0_0, %c0_1] : memref<1x17x17x32xbf16, #tpu.memory_space<vmem>>, vector<1x17x17x32xbf16>
    %4 = vector.shape_cast %3 : vector<1x17x17x32xbf16> to vector<17x17x32xbf16>
    %5 = vector.extract_strided_slice %4 {offsets = [0, 0, 0], sizes = [16, 16, 32], strides = [1, 1, 1]} : vector<17x17x32xbf16> to vector<16x16x32xbf16>
    %6 = vector.shape_cast %5 : vector<16x16x32xbf16> to vector<256x32xbf16>
    %c0_2 = arith.constant 0 : index
    %c0_3 = arith.constant 0 : index
    %c0_4 = arith.constant 0 : index
    %7 = vector.load %arg3[%c0_2, %c0_3, %c0_4] : memref<4x32x16xbf16, #tpu.memory_space<vmem>>, vector<1x32x16xbf16>
    %8 = vector.shape_cast %7 : vector<1x32x16xbf16> to vector<32x16xbf16>
    %cst = arith.constant dense<0.000000e+00> : vector<256x16xf32>
    %9 = tpu.matmul %6, %8, %cst {dimension_numbers = #tpu.dot_dimension_numbers<[1], [0], [0], [1], [0, 0, 1, 1], [], []>} : vector<256x32xbf16>, vector<32x16xbf16>, vector<256x16xf32> -> vector<256x16xf32>
    %10 = vector.extract_strided_slice %4 {offsets = [0, 1, 0], sizes = [16, 16, 32], strides = [1, 1, 1]} : vector<17x17x32xbf16> to vector<16x16x32xbf16>
    %11 = vector.shape_cast %10 : vector<16x16x32xbf16> to vector<256x32xbf16>
    %c1 = arith.constant 1 : index
    %c0_5 = arith.constant 0 : index
    %c0_6 = arith.constant 0 : index
    %12 = vector.load %arg3[%c1, %c0_5, %c0_6] : memref<4x32x16xbf16, #tpu.memory_space<vmem>>, vector<1x32x16xbf16>
    %13 = vector.shape_cast %12 : vector<1x32x16xbf16> to vector<32x16xbf16>
    %cst_7 = arith.constant dense<0.000000e+00> : vector<256x16xf32>
    %14 = tpu.matmul %11, %13, %cst_7 {dimension_numbers = #tpu.dot_dimension_numbers<[1], [0], [0], [1], [0, 0, 1, 1], [], []>} : vector<256x32xbf16>, vector<32x16xbf16>, vector<256x16xf32> -> vector<256x16xf32>
    %15 = arith.addf %9, %14 : vector<256x16xf32>
    %16 = vector.extract_strided_slice %4 {offsets = [1, 0, 0], sizes = [16, 16, 32], strides = [1, 1, 1]} : vector<17x17x32xbf16> to vector<16x16x32xbf16>
    %17 = vector.shape_cast %16 : vector<16x16x32xbf16> to vector<256x32xbf16>
    %c2 = arith.constant 2 : index
    %c0_8 = arith.constant 0 : index
    %c0_9 = arith.constant 0 : index
    %18 = vector.load %arg3[%c2, %c0_8, %c0_9] : memref<4x32x16xbf16, #tpu.memory_space<vmem>>, vector<1x32x16xbf16>
    %19 = vector.shape_cast %18 : vector<1x32x16xbf16> to vector<32x16xbf16>
    %cst_10 = arith.constant dense<0.000000e+00> : vector<256x16xf32>
    %20 = tpu.matmul %17, %19, %cst_10 {dimension_numbers = #tpu.dot_dimension_numbers<[1], [0], [0], [1], [0, 0, 1, 1], [], []>} : vector<256x32xbf16>, vector<32x16xbf16>, vector<256x16xf32> -> vector<256x16xf32>
    %21 = arith.addf %15, %20 : vector<256x16xf32>
    %22 = vector.extract_strided_slice %4 {offsets = [1, 1, 0], sizes = [16, 16, 32], strides = [1, 1, 1]} : vector<17x17x32xbf16> to vector<16x16x32xbf16>
    %23 = vector.shape_cast %22 : vector<16x16x32xbf16> to vector<256x32xbf16>
    %c3 = arith.constant 3 : index
    %c0_11 = arith.constant 0 : index
    %c0_12 = arith.constant 0 : index
    %24 = vector.load %arg3[%c3, %c0_11, %c0_12] : memref<4x32x16xbf16, #tpu.memory_space<vmem>>, vector<1x32x16xbf16>
    %25 = vector.shape_cast %24 : vector<1x32x16xbf16> to vector<32x16xbf16>
    %cst_13 = arith.constant dense<0.000000e+00> : vector<256x16xf32>
    %26 = tpu.matmul %23, %25, %cst_13 {dimension_numbers = #tpu.dot_dimension_numbers<[1], [0], [0], [1], [0, 0, 1, 1], [], []>} : vector<256x32xbf16>, vector<32x16xbf16>, vector<256x16xf32> -> vector<256x16xf32>
    %27 = arith.addf %21, %26 : vector<256x16xf32>
    %28 = vector.shape_cast %27 : vector<256x16xf32> to vector<16x16x16xf32>
    %29 = vector.extract_strided_slice %28 {offsets = [0, 0, 0], sizes = [16, 8, 16], strides = [1, 1, 1]} : vector<16x16x16xf32> to vector<16x8x16xf32>
    %cst_14 = arith.constant dense<0.000000e+00> : vector<16xf32>
    %30 = vector.multi_reduction <add>, %29, %cst_14 [0, 1] : vector<16x8x16xf32> to vector<16xf32>
    %31 = vector.shape_cast %30 : vector<16xf32> to vector<1x16xf32>
    %cst_15 = arith.constant 1.280000e+02 : f32
    %32 = vector.broadcast %cst_15 : f32 to vector<1x16xf32>
    %33 = arith.divf %31, %32 : vector<1x16xf32>
    %34 = vector.shape_cast %33 : vector<1x16xf32> to vector<1x1x16xf32>
    %35 = vector.broadcast %34 : vector<1x1x16xf32> to vector<16x8x16xf32>
    %36 = arith.subf %29, %35 : vector<16x8x16xf32>
    %37 = arith.mulf %36, %36 : vector<16x8x16xf32>
    %cst_16 = arith.constant dense<0.000000e+00> : vector<16xf32>
    %38 = vector.multi_reduction <add>, %37, %cst_16 [0, 1] : vector<16x8x16xf32> to vector<16xf32>
    %39 = vector.shape_cast %38 : vector<16xf32> to vector<1x16xf32>
    %c0_17 = arith.constant 0 : index
    %c0_18 = arith.constant 0 : index
    %c0_19 = arith.constant 0 : index
    %40 = vector.load %arg5[%c0_17, %c0_18, %c0_19] : memref<1x8x16xf32, #tpu.memory_space<vmem>>, vector<1x1x16xf32>
    %41 = vector.shape_cast %40 : vector<1x1x16xf32> to vector<1x16xf32>
    %42 = vector.shape_cast %31 : vector<1x16xf32> to vector<1x1x16xf32>
    tpu.vector_store %arg5[%c0_17, %c0_18, %c0_19], %42 {strides = array<i32>} : memref<1x8x16xf32, #tpu.memory_space<vmem>>, vector<1x1x16xf32>,
    %c0_20 = arith.constant 0 : index
    %c1_21 = arith.constant 1 : index
    %c0_22 = arith.constant 0 : index
    %43 = vector.load %arg5[%c0_20, %c1_21, %c0_22] : memref<1x8x16xf32, #tpu.memory_space<vmem>>, vector<1x1x16xf32>
    %44 = vector.shape_cast %43 : vector<1x1x16xf32> to vector<1x16xf32>
    %45 = vector.shape_cast %39 : vector<1x16xf32> to vector<1x1x16xf32>
    tpu.vector_store %arg5[%c0_20, %c1_21, %c0_22], %45 {strides = array<i32>} : memref<1x8x16xf32, #tpu.memory_space<vmem>>, vector<1x1x16xf32>,
    %cst_23 = arith.constant 0.000000e+00 : f32
    %46 = vector.broadcast %cst_23 : f32 to vector<6x16xf32>
    %c0_24 = arith.constant 0 : index
    %c2_25 = arith.constant 2 : index
    %c0_26 = arith.constant 0 : index
    %47 = vector.load %arg5[%c0_24, %c2_25, %c0_26] : memref<1x8x16xf32, #tpu.memory_space<vmem>>, vector<1x6x16xf32>
    %48 = vector.shape_cast %47 : vector<1x6x16xf32> to vector<6x16xf32>
    %49 = vector.shape_cast %46 : vector<6x16xf32> to vector<1x6x16xf32>
    tpu.vector_store %arg5[%c0_24, %c2_25, %c0_26], %49 {strides = array<i32>} : memref<1x8x16xf32, #tpu.memory_space<vmem>>, vector<1x6x16xf32>,
    %50 = arith.truncf %29 : vector<16x8x16xf32> to vector<16x8x16xbf16>
    %c0_27 = arith.constant 0 : index
    %c0_28 = arith.constant 0 : index
    %c0_29 = arith.constant 0 : index
    %c0_30 = arith.constant 0 : index
    %51 = vector.load %arg4[%c0_27, %c0_28, %c0_29, %c0_30] : memref<1x16x8x16xbf16, #tpu.memory_space<vmem>>, vector<1x16x8x16xbf16>
    %52 = vector.shape_cast %51 : vector<1x16x8x16xbf16> to vector<16x8x16xbf16>
    %53 = vector.shape_cast %50 : vector<16x8x16xbf16> to vector<1x16x8x16xbf16>
    tpu.vector_store %arg4[%c0_27, %c0_28, %c0_29, %c0_30], %53 {strides = array<i32>} : memref<1x16x8x16xbf16, #tpu.memory_space<vmem>>, vector<1x16x8x16xbf16>,
    return
  }
  func.func @transform_0(%arg0: i32, %arg1: i32) -> (i32, i32, i32, i32) {
    %c0_i32 = arith.constant 0 : i32
    %c0_i32_0 = arith.constant 0 : i32
    %c0_i32_1 = arith.constant 0 : i32
    %c0_i32_2 = arith.constant 0 : i32
    return %arg0, %c0_i32, %c0_i32_0, %c0_i32_1 : i32, i32, i32, i32
  }
  func.func @transform_1(%arg0: i32, %arg1: i32) -> (i32, i32, i32) {
    %c0_i32 = arith.constant 0 : i32
    %c0_i32_0 = arith.constant 0 : i32
    %c0_i32_1 = arith.constant 0 : i32
    %c0_i32_2 = arith.constant 0 : i32
    return %c0_i32, %c0_i32_0, %c0_i32_1 : i32, i32, i32
  }
  func.func @transform_2(%arg0: i32, %arg1: i32) -> (i32, i32, i32, i32) {
    %c0_i32 = arith.constant 0 : i32
    %c0_i32_0 = arith.constant 0 : i32
    %c0_i32_1 = arith.constant 0 : i32
    return %arg0, %arg1, %c0_i32, %c0_i32_0 : i32, i32, i32, i32
  }
  func.func @transform_3(%arg0: i32, %arg1: i32) -> (i32, i32, i32) {
    %c0_i32 = arith.constant 0 : i32
    %c0_i32_0 = arith.constant 0 : i32
    return %arg0, %arg1, %c0_i32 : i32, i32, i32
  }
}

module attributes {stable_mosaic.version = 11 : i64} {
  func.func @kernel(%arg0: i32, %arg1: i32, %arg2: memref<1x9x17x64xbf16, #tpu.memory_space<vmem>>, %arg3: memref<4x64x32xbf16, #tpu.memory_space<vmem>>, %arg4: memref<1x64xf32, #tpu.memory_space<vmem>>, %arg5: memref<1x64xf32, #tpu.memory_space<vmem>>, %arg6: memref<1x8x4x32xbf16, #tpu.memory_space<vmem>>, %arg7: memref<1x8x32xf32, #tpu.memory_space<vmem>>) attributes {dimension_semantics = [#tpu.dimension_semantics<parallel>, #tpu.dimension_semantics<arbitrary>], iteration_bounds = array<i64: 4, 1>, scalar_prefetch = 0 : i64, scratch_operands = 0 : i64, tpu.core_type = #tpu.core_type<tc>, window_params = [{transform_indices = @transform_0, window_bounds = array<i64: 1, 9, 17, 64>}, {pipeline_mode = #tpu.pipeline_mode<synchronous>, transform_indices = @transform_1, window_bounds = array<i64: 4, 64, 32>}, {pipeline_mode = #tpu.pipeline_mode<synchronous>, transform_indices = @transform_2, window_bounds = array<i64: 1, 64>}, {pipeline_mode = #tpu.pipeline_mode<synchronous>, transform_indices = @transform_3, window_bounds = array<i64: 1, 64>}, {transform_indices = @transform_4, window_bounds = array<i64: 1, 8, 4, 32>}, {transform_indices = @transform_5, window_bounds = array<i64: 1, 8, 32>}]} {
    %c8_i32 = arith.constant 8 : i32
    %0 = arith.muli %arg1, %c8_i32 : i32
    %1 = tpu.assume_multiple %0, 8 : i32
    %c0 = arith.constant 0 : index
    %2 = arith.index_cast %1 : i32 to index
    %c0_0 = arith.constant 0 : index
    %c0_1 = arith.constant 0 : index
    %3 = vector.load %arg2[%c0, %2, %c0_0, %c0_1] : memref<1x9x17x64xbf16, #tpu.memory_space<vmem>>, vector<1x9x17x64xbf16>
    %4 = vector.shape_cast %3 : vector<1x9x17x64xbf16> to vector<9x17x64xbf16>
    %5 = arith.extf %4 : vector<9x17x64xbf16> to vector<9x17x64xf32>
    %c0_2 = arith.constant 0 : index
    %c0_3 = arith.constant 0 : index
    %6 = vector.load %arg4[%c0_2, %c0_3] : memref<1x64xf32, #tpu.memory_space<vmem>>, vector<1x64xf32>
    %7 = vector.shape_cast %6 : vector<1x64xf32> to vector<1x1x64xf32>
    %8 = vector.broadcast %7 : vector<1x1x64xf32> to vector<9x17x64xf32>
    %9 = arith.mulf %5, %8 : vector<9x17x64xf32>
    %c0_4 = arith.constant 0 : index
    %c0_5 = arith.constant 0 : index
    %10 = vector.load %arg5[%c0_4, %c0_5] : memref<1x64xf32, #tpu.memory_space<vmem>>, vector<1x64xf32>
    %11 = vector.shape_cast %10 : vector<1x64xf32> to vector<1x1x64xf32>
    %12 = vector.broadcast %11 : vector<1x1x64xf32> to vector<9x17x64xf32>
    %13 = arith.addf %9, %12 : vector<9x17x64xf32>
    %cst = arith.constant 0.000000e+00 : f32
    %14 = vector.broadcast %cst : f32 to vector<9x17x64xf32>
    %15 = arith.cmpf ogt, %13, %14 : vector<9x17x64xf32>
    %cst_6 = arith.constant 2.000000e-01 : f32
    %16 = vector.broadcast %cst_6 : f32 to vector<9x17x64xf32>
    %17 = arith.mulf %16, %13 : vector<9x17x64xf32>
    %18 = arith.select %15, %13, %17 : vector<9x17x64xi1>, vector<9x17x64xf32>
    %19 = arith.truncf %18 : vector<9x17x64xf32> to vector<9x17x64xbf16>
    %20 = vector.extract_strided_slice %19 {offsets = [0, 0, 0], sizes = [8, 16, 64], strides = [1, 1, 1]} : vector<9x17x64xbf16> to vector<8x16x64xbf16>
    %21 = vector.shape_cast %20 : vector<8x16x64xbf16> to vector<128x64xbf16>
    %c0_7 = arith.constant 0 : index
    %c0_8 = arith.constant 0 : index
    %c0_9 = arith.constant 0 : index
    %22 = vector.load %arg3[%c0_7, %c0_8, %c0_9] : memref<4x64x32xbf16, #tpu.memory_space<vmem>>, vector<1x64x32xbf16>
    %23 = vector.shape_cast %22 : vector<1x64x32xbf16> to vector<64x32xbf16>
    %cst_10 = arith.constant dense<0.000000e+00> : vector<128x32xf32>
    %24 = tpu.matmul %21, %23, %cst_10 {dimension_numbers = #tpu.dot_dimension_numbers<[1], [0], [0], [1], [0, 0, 1, 1], [], []>} : vector<128x64xbf16>, vector<64x32xbf16>, vector<128x32xf32> -> vector<128x32xf32>
    %25 = vector.extract_strided_slice %19 {offsets = [0, 1, 0], sizes = [8, 16, 64], strides = [1, 1, 1]} : vector<9x17x64xbf16> to vector<8x16x64xbf16>
    %26 = vector.shape_cast %25 : vector<8x16x64xbf16> to vector<128x64xbf16>
    %c1 = arith.constant 1 : index
    %c0_11 = arith.constant 0 : index
    %c0_12 = arith.constant 0 : index
    %27 = vector.load %arg3[%c1, %c0_11, %c0_12] : memref<4x64x32xbf16, #tpu.memory_space<vmem>>, vector<1x64x32xbf16>
    %28 = vector.shape_cast %27 : vector<1x64x32xbf16> to vector<64x32xbf16>
    %cst_13 = arith.constant dense<0.000000e+00> : vector<128x32xf32>
    %29 = tpu.matmul %26, %28, %cst_13 {dimension_numbers = #tpu.dot_dimension_numbers<[1], [0], [0], [1], [0, 0, 1, 1], [], []>} : vector<128x64xbf16>, vector<64x32xbf16>, vector<128x32xf32> -> vector<128x32xf32>
    %30 = arith.addf %24, %29 : vector<128x32xf32>
    %31 = vector.extract_strided_slice %19 {offsets = [1, 0, 0], sizes = [8, 16, 64], strides = [1, 1, 1]} : vector<9x17x64xbf16> to vector<8x16x64xbf16>
    %32 = vector.shape_cast %31 : vector<8x16x64xbf16> to vector<128x64xbf16>
    %c2 = arith.constant 2 : index
    %c0_14 = arith.constant 0 : index
    %c0_15 = arith.constant 0 : index
    %33 = vector.load %arg3[%c2, %c0_14, %c0_15] : memref<4x64x32xbf16, #tpu.memory_space<vmem>>, vector<1x64x32xbf16>
    %34 = vector.shape_cast %33 : vector<1x64x32xbf16> to vector<64x32xbf16>
    %cst_16 = arith.constant dense<0.000000e+00> : vector<128x32xf32>
    %35 = tpu.matmul %32, %34, %cst_16 {dimension_numbers = #tpu.dot_dimension_numbers<[1], [0], [0], [1], [0, 0, 1, 1], [], []>} : vector<128x64xbf16>, vector<64x32xbf16>, vector<128x32xf32> -> vector<128x32xf32>
    %36 = arith.addf %30, %35 : vector<128x32xf32>
    %37 = vector.extract_strided_slice %19 {offsets = [1, 1, 0], sizes = [8, 16, 64], strides = [1, 1, 1]} : vector<9x17x64xbf16> to vector<8x16x64xbf16>
    %38 = vector.shape_cast %37 : vector<8x16x64xbf16> to vector<128x64xbf16>
    %c3 = arith.constant 3 : index
    %c0_17 = arith.constant 0 : index
    %c0_18 = arith.constant 0 : index
    %39 = vector.load %arg3[%c3, %c0_17, %c0_18] : memref<4x64x32xbf16, #tpu.memory_space<vmem>>, vector<1x64x32xbf16>
    %40 = vector.shape_cast %39 : vector<1x64x32xbf16> to vector<64x32xbf16>
    %cst_19 = arith.constant dense<0.000000e+00> : vector<128x32xf32>
    %41 = tpu.matmul %38, %40, %cst_19 {dimension_numbers = #tpu.dot_dimension_numbers<[1], [0], [0], [1], [0, 0, 1, 1], [], []>} : vector<128x64xbf16>, vector<64x32xbf16>, vector<128x32xf32> -> vector<128x32xf32>
    %42 = arith.addf %36, %41 : vector<128x32xf32>
    %43 = vector.shape_cast %42 : vector<128x32xf32> to vector<8x16x32xf32>
    %44 = vector.extract_strided_slice %43 {offsets = [0, 0, 0], sizes = [8, 4, 32], strides = [1, 1, 1]} : vector<8x16x32xf32> to vector<8x4x32xf32>
    %cst_20 = arith.constant dense<0.000000e+00> : vector<32xf32>
    %45 = vector.multi_reduction <add>, %44, %cst_20 [0, 1] : vector<8x4x32xf32> to vector<32xf32>
    %46 = vector.shape_cast %45 : vector<32xf32> to vector<1x32xf32>
    %cst_21 = arith.constant 3.200000e+01 : f32
    %47 = vector.broadcast %cst_21 : f32 to vector<1x32xf32>
    %48 = arith.divf %46, %47 : vector<1x32xf32>
    %49 = vector.shape_cast %48 : vector<1x32xf32> to vector<1x1x32xf32>
    %50 = vector.broadcast %49 : vector<1x1x32xf32> to vector<8x4x32xf32>
    %51 = arith.subf %44, %50 : vector<8x4x32xf32>
    %52 = arith.mulf %51, %51 : vector<8x4x32xf32>
    %cst_22 = arith.constant dense<0.000000e+00> : vector<32xf32>
    %53 = vector.multi_reduction <add>, %52, %cst_22 [0, 1] : vector<8x4x32xf32> to vector<32xf32>
    %54 = vector.shape_cast %53 : vector<32xf32> to vector<1x32xf32>
    %c0_23 = arith.constant 0 : index
    %c0_24 = arith.constant 0 : index
    %c0_25 = arith.constant 0 : index
    %55 = vector.load %arg7[%c0_23, %c0_24, %c0_25] : memref<1x8x32xf32, #tpu.memory_space<vmem>>, vector<1x1x32xf32>
    %56 = vector.shape_cast %55 : vector<1x1x32xf32> to vector<1x32xf32>
    %57 = vector.shape_cast %46 : vector<1x32xf32> to vector<1x1x32xf32>
    tpu.vector_store %arg7[%c0_23, %c0_24, %c0_25], %57 {strides = array<i32>} : memref<1x8x32xf32, #tpu.memory_space<vmem>>, vector<1x1x32xf32>,
    %c0_26 = arith.constant 0 : index
    %c1_27 = arith.constant 1 : index
    %c0_28 = arith.constant 0 : index
    %58 = vector.load %arg7[%c0_26, %c1_27, %c0_28] : memref<1x8x32xf32, #tpu.memory_space<vmem>>, vector<1x1x32xf32>
    %59 = vector.shape_cast %58 : vector<1x1x32xf32> to vector<1x32xf32>
    %60 = vector.shape_cast %54 : vector<1x32xf32> to vector<1x1x32xf32>
    tpu.vector_store %arg7[%c0_26, %c1_27, %c0_28], %60 {strides = array<i32>} : memref<1x8x32xf32, #tpu.memory_space<vmem>>, vector<1x1x32xf32>,
    %cst_29 = arith.constant 0.000000e+00 : f32
    %61 = vector.broadcast %cst_29 : f32 to vector<6x32xf32>
    %c0_30 = arith.constant 0 : index
    %c2_31 = arith.constant 2 : index
    %c0_32 = arith.constant 0 : index
    %62 = vector.load %arg7[%c0_30, %c2_31, %c0_32] : memref<1x8x32xf32, #tpu.memory_space<vmem>>, vector<1x6x32xf32>
    %63 = vector.shape_cast %62 : vector<1x6x32xf32> to vector<6x32xf32>
    %64 = vector.shape_cast %61 : vector<6x32xf32> to vector<1x6x32xf32>
    tpu.vector_store %arg7[%c0_30, %c2_31, %c0_32], %64 {strides = array<i32>} : memref<1x8x32xf32, #tpu.memory_space<vmem>>, vector<1x6x32xf32>,
    %65 = arith.truncf %44 : vector<8x4x32xf32> to vector<8x4x32xbf16>
    %c0_33 = arith.constant 0 : index
    %c0_34 = arith.constant 0 : index
    %c0_35 = arith.constant 0 : index
    %c0_36 = arith.constant 0 : index
    %66 = vector.load %arg6[%c0_33, %c0_34, %c0_35, %c0_36] : memref<1x8x4x32xbf16, #tpu.memory_space<vmem>>, vector<1x8x4x32xbf16>
    %67 = vector.shape_cast %66 : vector<1x8x4x32xbf16> to vector<8x4x32xbf16>
    %68 = vector.shape_cast %65 : vector<8x4x32xbf16> to vector<1x8x4x32xbf16>
    tpu.vector_store %arg6[%c0_33, %c0_34, %c0_35, %c0_36], %68 {strides = array<i32>} : memref<1x8x4x32xbf16, #tpu.memory_space<vmem>>, vector<1x8x4x32xbf16>,
    return
  }
  func.func @transform_0(%arg0: i32, %arg1: i32) -> (i32, i32, i32, i32) {
    %c0_i32 = arith.constant 0 : i32
    %c0_i32_0 = arith.constant 0 : i32
    %c0_i32_1 = arith.constant 0 : i32
    %c0_i32_2 = arith.constant 0 : i32
    return %arg0, %c0_i32, %c0_i32_0, %c0_i32_1 : i32, i32, i32, i32
  }
  func.func @transform_1(%arg0: i32, %arg1: i32) -> (i32, i32, i32) {
    %c0_i32 = arith.constant 0 : i32
    %c0_i32_0 = arith.constant 0 : i32
    %c0_i32_1 = arith.constant 0 : i32
    %c0_i32_2 = arith.constant 0 : i32
    return %c0_i32, %c0_i32_0, %c0_i32_1 : i32, i32, i32
  }
  func.func @transform_2(%arg0: i32, %arg1: i32) -> (i32, i32) {
    %c0_i32 = arith.constant 0 : i32
    %c0_i32_0 = arith.constant 0 : i32
    %c0_i32_1 = arith.constant 0 : i32
    return %c0_i32, %c0_i32_0 : i32, i32
  }
  func.func @transform_3(%arg0: i32, %arg1: i32) -> (i32, i32) {
    %c0_i32 = arith.constant 0 : i32
    %c0_i32_0 = arith.constant 0 : i32
    %c0_i32_1 = arith.constant 0 : i32
    return %c0_i32, %c0_i32_0 : i32, i32
  }
  func.func @transform_4(%arg0: i32, %arg1: i32) -> (i32, i32, i32, i32) {
    %c0_i32 = arith.constant 0 : i32
    %c0_i32_0 = arith.constant 0 : i32
    %c0_i32_1 = arith.constant 0 : i32
    return %arg0, %arg1, %c0_i32, %c0_i32_0 : i32, i32, i32, i32
  }
  func.func @transform_5(%arg0: i32, %arg1: i32) -> (i32, i32, i32) {
    %c0_i32 = arith.constant 0 : i32
    %c0_i32_0 = arith.constant 0 : i32
    return %arg0, %arg1, %c0_i32 : i32, i32, i32
  }
}

module attributes {stable_mosaic.version = 11 : i64} {
  func.func @kernel(%arg0: i32, %arg1: i32, %arg2: memref<1x5x17x128xbf16, #tpu.memory_space<vmem>>, %arg3: memref<4x128x64xbf16, #tpu.memory_space<vmem>>, %arg4: memref<1x128xf32, #tpu.memory_space<vmem>>, %arg5: memref<1x128xf32, #tpu.memory_space<vmem>>, %arg6: memref<1x4x2x64xbf16, #tpu.memory_space<vmem>>, %arg7: memref<1x8x64xf32, #tpu.memory_space<vmem>>) attributes {dimension_semantics = [#tpu.dimension_semantics<parallel>, #tpu.dimension_semantics<arbitrary>], iteration_bounds = array<i64: 4, 1>, scalar_prefetch = 0 : i64, scratch_operands = 0 : i64, tpu.core_type = #tpu.core_type<tc>, window_params = [{transform_indices = @transform_0, window_bounds = array<i64: 1, 5, 17, 128>}, {pipeline_mode = #tpu.pipeline_mode<synchronous>, transform_indices = @transform_1, window_bounds = array<i64: 4, 128, 64>}, {pipeline_mode = #tpu.pipeline_mode<synchronous>, transform_indices = @transform_2, window_bounds = array<i64: 1, 128>}, {pipeline_mode = #tpu.pipeline_mode<synchronous>, transform_indices = @transform_3, window_bounds = array<i64: 1, 128>}, {transform_indices = @transform_4, window_bounds = array<i64: 1, 4, 2, 64>}, {transform_indices = @transform_5, window_bounds = array<i64: 1, 8, 64>}]} {
    %c4_i32 = arith.constant 4 : i32
    %0 = arith.muli %arg1, %c4_i32 : i32
    %1 = tpu.assume_multiple %0, 4 : i32
    %c0 = arith.constant 0 : index
    %2 = arith.index_cast %1 : i32 to index
    %c0_0 = arith.constant 0 : index
    %c0_1 = arith.constant 0 : index
    %3 = vector.load %arg2[%c0, %2, %c0_0, %c0_1] : memref<1x5x17x128xbf16, #tpu.memory_space<vmem>>, vector<1x5x17x128xbf16>
    %4 = vector.shape_cast %3 : vector<1x5x17x128xbf16> to vector<5x17x128xbf16>
    %5 = arith.extf %4 : vector<5x17x128xbf16> to vector<5x17x128xf32>
    %c0_2 = arith.constant 0 : index
    %c0_3 = arith.constant 0 : index
    %6 = vector.load %arg4[%c0_2, %c0_3] : memref<1x128xf32, #tpu.memory_space<vmem>>, vector<1x128xf32>
    %7 = vector.shape_cast %6 : vector<1x128xf32> to vector<1x1x128xf32>
    %8 = vector.broadcast %7 : vector<1x1x128xf32> to vector<5x17x128xf32>
    %9 = arith.mulf %5, %8 : vector<5x17x128xf32>
    %c0_4 = arith.constant 0 : index
    %c0_5 = arith.constant 0 : index
    %10 = vector.load %arg5[%c0_4, %c0_5] : memref<1x128xf32, #tpu.memory_space<vmem>>, vector<1x128xf32>
    %11 = vector.shape_cast %10 : vector<1x128xf32> to vector<1x1x128xf32>
    %12 = vector.broadcast %11 : vector<1x1x128xf32> to vector<5x17x128xf32>
    %13 = arith.addf %9, %12 : vector<5x17x128xf32>
    %cst = arith.constant 0.000000e+00 : f32
    %14 = vector.broadcast %cst : f32 to vector<5x17x128xf32>
    %15 = arith.cmpf ogt, %13, %14 : vector<5x17x128xf32>
    %cst_6 = arith.constant 2.000000e-01 : f32
    %16 = vector.broadcast %cst_6 : f32 to vector<5x17x128xf32>
    %17 = arith.mulf %16, %13 : vector<5x17x128xf32>
    %18 = arith.select %15, %13, %17 : vector<5x17x128xi1>, vector<5x17x128xf32>
    %19 = arith.truncf %18 : vector<5x17x128xf32> to vector<5x17x128xbf16>
    %20 = vector.extract_strided_slice %19 {offsets = [0, 0, 0], sizes = [4, 16, 128], strides = [1, 1, 1]} : vector<5x17x128xbf16> to vector<4x16x128xbf16>
    %21 = vector.shape_cast %20 : vector<4x16x128xbf16> to vector<64x128xbf16>
    %c0_7 = arith.constant 0 : index
    %c0_8 = arith.constant 0 : index
    %c0_9 = arith.constant 0 : index
    %22 = vector.load %arg3[%c0_7, %c0_8, %c0_9] : memref<4x128x64xbf16, #tpu.memory_space<vmem>>, vector<1x128x64xbf16>
    %23 = vector.shape_cast %22 : vector<1x128x64xbf16> to vector<128x64xbf16>
    %cst_10 = arith.constant dense<0.000000e+00> : vector<64x64xf32>
    %24 = tpu.matmul %21, %23, %cst_10 {dimension_numbers = #tpu.dot_dimension_numbers<[1], [0], [0], [1], [0, 0, 1, 1], [], []>} : vector<64x128xbf16>, vector<128x64xbf16>, vector<64x64xf32> -> vector<64x64xf32>
    %25 = vector.extract_strided_slice %19 {offsets = [0, 1, 0], sizes = [4, 16, 128], strides = [1, 1, 1]} : vector<5x17x128xbf16> to vector<4x16x128xbf16>
    %26 = vector.shape_cast %25 : vector<4x16x128xbf16> to vector<64x128xbf16>
    %c1 = arith.constant 1 : index
    %c0_11 = arith.constant 0 : index
    %c0_12 = arith.constant 0 : index
    %27 = vector.load %arg3[%c1, %c0_11, %c0_12] : memref<4x128x64xbf16, #tpu.memory_space<vmem>>, vector<1x128x64xbf16>
    %28 = vector.shape_cast %27 : vector<1x128x64xbf16> to vector<128x64xbf16>
    %cst_13 = arith.constant dense<0.000000e+00> : vector<64x64xf32>
    %29 = tpu.matmul %26, %28, %cst_13 {dimension_numbers = #tpu.dot_dimension_numbers<[1], [0], [0], [1], [0, 0, 1, 1], [], []>} : vector<64x128xbf16>, vector<128x64xbf16>, vector<64x64xf32> -> vector<64x64xf32>
    %30 = arith.addf %24, %29 : vector<64x64xf32>
    %31 = vector.extract_strided_slice %19 {offsets = [1, 0, 0], sizes = [4, 16, 128], strides = [1, 1, 1]} : vector<5x17x128xbf16> to vector<4x16x128xbf16>
    %32 = vector.shape_cast %31 : vector<4x16x128xbf16> to vector<64x128xbf16>
    %c2 = arith.constant 2 : index
    %c0_14 = arith.constant 0 : index
    %c0_15 = arith.constant 0 : index
    %33 = vector.load %arg3[%c2, %c0_14, %c0_15] : memref<4x128x64xbf16, #tpu.memory_space<vmem>>, vector<1x128x64xbf16>
    %34 = vector.shape_cast %33 : vector<1x128x64xbf16> to vector<128x64xbf16>
    %cst_16 = arith.constant dense<0.000000e+00> : vector<64x64xf32>
    %35 = tpu.matmul %32, %34, %cst_16 {dimension_numbers = #tpu.dot_dimension_numbers<[1], [0], [0], [1], [0, 0, 1, 1], [], []>} : vector<64x128xbf16>, vector<128x64xbf16>, vector<64x64xf32> -> vector<64x64xf32>
    %36 = arith.addf %30, %35 : vector<64x64xf32>
    %37 = vector.extract_strided_slice %19 {offsets = [1, 1, 0], sizes = [4, 16, 128], strides = [1, 1, 1]} : vector<5x17x128xbf16> to vector<4x16x128xbf16>
    %38 = vector.shape_cast %37 : vector<4x16x128xbf16> to vector<64x128xbf16>
    %c3 = arith.constant 3 : index
    %c0_17 = arith.constant 0 : index
    %c0_18 = arith.constant 0 : index
    %39 = vector.load %arg3[%c3, %c0_17, %c0_18] : memref<4x128x64xbf16, #tpu.memory_space<vmem>>, vector<1x128x64xbf16>
    %40 = vector.shape_cast %39 : vector<1x128x64xbf16> to vector<128x64xbf16>
    %cst_19 = arith.constant dense<0.000000e+00> : vector<64x64xf32>
    %41 = tpu.matmul %38, %40, %cst_19 {dimension_numbers = #tpu.dot_dimension_numbers<[1], [0], [0], [1], [0, 0, 1, 1], [], []>} : vector<64x128xbf16>, vector<128x64xbf16>, vector<64x64xf32> -> vector<64x64xf32>
    %42 = arith.addf %36, %41 : vector<64x64xf32>
    %43 = vector.shape_cast %42 : vector<64x64xf32> to vector<4x16x64xf32>
    %44 = vector.extract_strided_slice %43 {offsets = [0, 0, 0], sizes = [4, 2, 64], strides = [1, 1, 1]} : vector<4x16x64xf32> to vector<4x2x64xf32>
    %cst_20 = arith.constant dense<0.000000e+00> : vector<64xf32>
    %45 = vector.multi_reduction <add>, %44, %cst_20 [0, 1] : vector<4x2x64xf32> to vector<64xf32>
    %46 = vector.shape_cast %45 : vector<64xf32> to vector<1x64xf32>
    %cst_21 = arith.constant 8.000000e+00 : f32
    %47 = vector.broadcast %cst_21 : f32 to vector<1x64xf32>
    %48 = arith.divf %46, %47 : vector<1x64xf32>
    %49 = vector.shape_cast %48 : vector<1x64xf32> to vector<1x1x64xf32>
    %50 = vector.broadcast %49 : vector<1x1x64xf32> to vector<4x2x64xf32>
    %51 = arith.subf %44, %50 : vector<4x2x64xf32>
    %52 = arith.mulf %51, %51 : vector<4x2x64xf32>
    %cst_22 = arith.constant dense<0.000000e+00> : vector<64xf32>
    %53 = vector.multi_reduction <add>, %52, %cst_22 [0, 1] : vector<4x2x64xf32> to vector<64xf32>
    %54 = vector.shape_cast %53 : vector<64xf32> to vector<1x64xf32>
    %c0_23 = arith.constant 0 : index
    %c0_24 = arith.constant 0 : index
    %c0_25 = arith.constant 0 : index
    %55 = vector.load %arg7[%c0_23, %c0_24, %c0_25] : memref<1x8x64xf32, #tpu.memory_space<vmem>>, vector<1x1x64xf32>
    %56 = vector.shape_cast %55 : vector<1x1x64xf32> to vector<1x64xf32>
    %57 = vector.shape_cast %46 : vector<1x64xf32> to vector<1x1x64xf32>
    tpu.vector_store %arg7[%c0_23, %c0_24, %c0_25], %57 {strides = array<i32>} : memref<1x8x64xf32, #tpu.memory_space<vmem>>, vector<1x1x64xf32>,
    %c0_26 = arith.constant 0 : index
    %c1_27 = arith.constant 1 : index
    %c0_28 = arith.constant 0 : index
    %58 = vector.load %arg7[%c0_26, %c1_27, %c0_28] : memref<1x8x64xf32, #tpu.memory_space<vmem>>, vector<1x1x64xf32>
    %59 = vector.shape_cast %58 : vector<1x1x64xf32> to vector<1x64xf32>
    %60 = vector.shape_cast %54 : vector<1x64xf32> to vector<1x1x64xf32>
    tpu.vector_store %arg7[%c0_26, %c1_27, %c0_28], %60 {strides = array<i32>} : memref<1x8x64xf32, #tpu.memory_space<vmem>>, vector<1x1x64xf32>,
    %cst_29 = arith.constant 0.000000e+00 : f32
    %61 = vector.broadcast %cst_29 : f32 to vector<6x64xf32>
    %c0_30 = arith.constant 0 : index
    %c2_31 = arith.constant 2 : index
    %c0_32 = arith.constant 0 : index
    %62 = vector.load %arg7[%c0_30, %c2_31, %c0_32] : memref<1x8x64xf32, #tpu.memory_space<vmem>>, vector<1x6x64xf32>
    %63 = vector.shape_cast %62 : vector<1x6x64xf32> to vector<6x64xf32>
    %64 = vector.shape_cast %61 : vector<6x64xf32> to vector<1x6x64xf32>
    tpu.vector_store %arg7[%c0_30, %c2_31, %c0_32], %64 {strides = array<i32>} : memref<1x8x64xf32, #tpu.memory_space<vmem>>, vector<1x6x64xf32>,
    %65 = arith.truncf %44 : vector<4x2x64xf32> to vector<4x2x64xbf16>
    %c0_33 = arith.constant 0 : index
    %c0_34 = arith.constant 0 : index
    %c0_35 = arith.constant 0 : index
    %c0_36 = arith.constant 0 : index
    %66 = vector.load %arg6[%c0_33, %c0_34, %c0_35, %c0_36] : memref<1x4x2x64xbf16, #tpu.memory_space<vmem>>, vector<1x4x2x64xbf16>
    %67 = vector.shape_cast %66 : vector<1x4x2x64xbf16> to vector<4x2x64xbf16>
    %68 = vector.shape_cast %65 : vector<4x2x64xbf16> to vector<1x4x2x64xbf16>
    tpu.vector_store %arg6[%c0_33, %c0_34, %c0_35, %c0_36], %68 {strides = array<i32>} : memref<1x4x2x64xbf16, #tpu.memory_space<vmem>>, vector<1x4x2x64xbf16>,
    return
  }
  func.func @transform_0(%arg0: i32, %arg1: i32) -> (i32, i32, i32, i32) {
    %c0_i32 = arith.constant 0 : i32
    %c0_i32_0 = arith.constant 0 : i32
    %c0_i32_1 = arith.constant 0 : i32
    %c0_i32_2 = arith.constant 0 : i32
    return %arg0, %c0_i32, %c0_i32_0, %c0_i32_1 : i32, i32, i32, i32
  }
  func.func @transform_1(%arg0: i32, %arg1: i32) -> (i32, i32, i32) {
    %c0_i32 = arith.constant 0 : i32
    %c0_i32_0 = arith.constant 0 : i32
    %c0_i32_1 = arith.constant 0 : i32
    %c0_i32_2 = arith.constant 0 : i32
    return %c0_i32, %c0_i32_0, %c0_i32_1 : i32, i32, i32
  }
  func.func @transform_2(%arg0: i32, %arg1: i32) -> (i32, i32) {
    %c0_i32 = arith.constant 0 : i32
    %c0_i32_0 = arith.constant 0 : i32
    %c0_i32_1 = arith.constant 0 : i32
    return %c0_i32, %c0_i32_0 : i32, i32
  }
  func.func @transform_3(%arg0: i32, %arg1: i32) -> (i32, i32) {
    %c0_i32 = arith.constant 0 : i32
    %c0_i32_0 = arith.constant 0 : i32
    %c0_i32_1 = arith.constant 0 : i32
    return %c0_i32, %c0_i32_0 : i32, i32
  }
  func.func @transform_4(%arg0: i32, %arg1: i32) -> (i32, i32, i32, i32) {
    %c0_i32 = arith.constant 0 : i32
    %c0_i32_0 = arith.constant 0 : i32
    %c0_i32_1 = arith.constant 0 : i32
    return %arg0, %arg1, %c0_i32, %c0_i32_0 : i32, i32, i32, i32
  }
  func.func @transform_5(%arg0: i32, %arg1: i32) -> (i32, i32, i32) {
    %c0_i32 = arith.constant 0 : i32
    %c0_i32_0 = arith.constant 0 : i32
    return %arg0, %arg1, %c0_i32 : i32, i32, i32
  }
}

module attributes {stable_mosaic.version = 11 : i64} {
  func.func @_bn_lrelu_kernel(%arg0: i32, %arg1: memref<32x64xbf16, #tpu.memory_space<vmem>>, %arg2: memref<1x64xf32, #tpu.memory_space<vmem>>, %arg3: memref<1x64xf32, #tpu.memory_space<vmem>>, %arg4: memref<32x64xf32, #tpu.memory_space<vmem>>) attributes {dimension_semantics = [#tpu.dimension_semantics<parallel>], iteration_bounds = array<i64: 1>, scalar_prefetch = 0 : i64, scratch_operands = 0 : i64, tpu.core_type = #tpu.core_type<tc>, window_params = [{transform_indices = @transform_0, window_bounds = array<i64: 32, 64>}, {pipeline_mode = #tpu.pipeline_mode<synchronous>, transform_indices = @transform_1, window_bounds = array<i64: 1, 64>}, {pipeline_mode = #tpu.pipeline_mode<synchronous>, transform_indices = @transform_2, window_bounds = array<i64: 1, 64>}, {transform_indices = @transform_3, window_bounds = array<i64: 32, 64>}]} {
    %c0 = arith.constant 0 : index
    %c0_0 = arith.constant 0 : index
    %0 = vector.load %arg1[%c0, %c0_0] : memref<32x64xbf16, #tpu.memory_space<vmem>>, vector<32x64xbf16>
    %1 = arith.extf %0 : vector<32x64xbf16> to vector<32x64xf32>
    %c0_1 = arith.constant 0 : index
    %c0_2 = arith.constant 0 : index
    %2 = vector.load %arg2[%c0_1, %c0_2] : memref<1x64xf32, #tpu.memory_space<vmem>>, vector<1x64xf32>
    %3 = vector.broadcast %2 : vector<1x64xf32> to vector<32x64xf32>
    %4 = arith.mulf %1, %3 : vector<32x64xf32>
    %c0_3 = arith.constant 0 : index
    %c0_4 = arith.constant 0 : index
    %5 = vector.load %arg3[%c0_3, %c0_4] : memref<1x64xf32, #tpu.memory_space<vmem>>, vector<1x64xf32>
    %6 = vector.broadcast %5 : vector<1x64xf32> to vector<32x64xf32>
    %7 = arith.addf %4, %6 : vector<32x64xf32>
    %cst = arith.constant 0.000000e+00 : f32
    %8 = vector.broadcast %cst : f32 to vector<32x64xf32>
    %9 = arith.cmpf ogt, %7, %8 : vector<32x64xf32>
    %cst_5 = arith.constant 2.000000e-01 : f32
    %10 = vector.broadcast %cst_5 : f32 to vector<32x64xf32>
    %11 = arith.mulf %10, %7 : vector<32x64xf32>
    %12 = arith.select %9, %7, %11 : vector<32x64xi1>, vector<32x64xf32>
    %c0_6 = arith.constant 0 : index
    %c0_7 = arith.constant 0 : index
    %13 = vector.load %arg4[%c0_6, %c0_7] : memref<32x64xf32, #tpu.memory_space<vmem>>, vector<32x64xf32>
    tpu.vector_store %arg4[%c0_6, %c0_7], %12 {strides = array<i32>} : memref<32x64xf32, #tpu.memory_space<vmem>>, vector<32x64xf32>,
    return
  }
  func.func @transform_0(%arg0: i32) -> (i32, i32) {
    %c0_i32 = arith.constant 0 : i32
    %c0_i32_0 = arith.constant 0 : i32
    return %arg0, %c0_i32 : i32, i32
  }
  func.func @transform_1(%arg0: i32) -> (i32, i32) {
    %c0_i32 = arith.constant 0 : i32
    %c0_i32_0 = arith.constant 0 : i32
    %c0_i32_1 = arith.constant 0 : i32
    return %c0_i32, %c0_i32_0 : i32, i32
  }
  func.func @transform_2(%arg0: i32) -> (i32, i32) {
    %c0_i32 = arith.constant 0 : i32
    %c0_i32_0 = arith.constant 0 : i32
    %c0_i32_1 = arith.constant 0 : i32
    return %c0_i32, %c0_i32_0 : i32, i32
  }
  func.func @transform_3(%arg0: i32) -> (i32, i32) {
    %c0_i32 = arith.constant 0 : i32
    %c0_i32_0 = arith.constant 0 : i32
    return %arg0, %c0_i32 : i32, i32
  }
}

</mosaic_0001>

<bundles_post_ra>
// kernel: tpu_custom_call.1
= control target key start
LH: loop header
LB: loop body
LE: loop exit
PB: predicated region body
PF: predicated region fallthrough
CT: control target
= control target key end

     0   :  { %6 = vsyncpa [#allocation3], 0  ;;  %s482_s0 = inlined_call_operand.hbm [shape: f32[8,128], index: 0, kind: input, shape index: {}]   ;;  %s483_s1 = inlined_call_operand.hbm [shape: f32[16,128], index: 1, kind: output, shape index: {}]  }
   0x1   :  { %7 = vsyncpa [#allocation4], 0 }
   0x2   :  { %9 = vsyncpa [#allocation4 + $0x1], 0  ;;  %s352_s6 = smov 0   ;;  %s354_s7 = smov 0  }
   0x3   :  { %s356_s8 = smov 0   ;;  %s358_s9 = smov 0  }
   0x4 LB: > { %s373_s10 = sadd.s32 4294967295, %s338_s9   ;;  %s184_s11 = sadd.s32 4294967294, %s338_s9   ;;  %s338_s9 = sphi %s358_s9, %s499_s9   ;;  %s334_s8 = sphi %s356_s8, %s498_s8   ;;  %s330_s7 = sphi %s354_s7, %s497_s7   ;;  %s326_s6 = sphi %s352_s6, %s496_s6  }
   0x5   : > { %s377_s12 = sadd.s32 1, %s338_s9   ;;  %s43_s13 = sadd.s32 1, %s334_s8 }
   0x6   : > { %s40_s14 = ssub.s32 %s338_s9, %s377_s12  ;;  %p53_p0 = scmp.ne.s32.totalorder %s334_s8, %s330_s7 }
   0x7   : > { %p41_p1 = scmp.eq.s32.totalorder %s40_s14, 0  ;;  %p54_p2 = scmp.eq.s32.totalorder %s373_s10, 1 }
   0x8   : > { %p59_p3 = scmp.ne.s32.totalorder %s330_s7, %s326_s6  ;;  %p60_p4 = scmp.eq.s32.totalorder %s184_s11, 1 }
   0x9   : > { %s388_s15 = scalar_select %p41_p1, %s334_s8, %s43_s13  }
   0xa   : > { %p390_p5 = por %p54_p2, %p53_p0  ;;  %p394_p6 = por %p60_p4, %p59_p3 }
   0xb   : > { %p185_p7 = scmp.ge.s32.totalorder %s338_s9, 1  ;;  %p67_p8 = scmp.lt.s32.totalorder %s338_s9, 3 }
   0xc   : > { %s487_s16 = scalar_select %p390_p5, 1, 0 }
   0xd   : > { %s488_s17 = scalar_select %p394_p6, 1, 0 }
   0xe   : > { %p484_p9 = scmp.eq.s32.totalorder %s373_s10, 0  ;;  %p401_p10 = pnand %p185_p7, %p67_p8 }
   0xf   : > { %s340_s19 = smov [#allocation2]   ;;  %s244_s24 = scalar_lea.hbm %s482_s0, 128 }
  0x10   : > { %s489_s18 = scalar_select %p401_p10, 1, 0 }
  0x11   : > { %s80_s20 = sshll.u32 %s340_s19, 4  ;;  %p200_p11 = pneg %p401_p10  ;;  %s81_s20 = int_to_ptr.vmem [resolvable:$true] %s80_s20 }
  0x12   : > { %p245_p13 = scmp.ne.s32.totalorder %s482_s0, %s244_s24  ;;  %p251_p3 = scmp.lt.u32.totalorder %s244_s24, %s482_s0 }
  0x13   : > { %p409_p12 = pnand %p484_p9, %p200_p11 }
  0x15   : > { %p246_p0 = pneg %p409_p12 }
  0x17   : > { %p247_p1 = pnand %p246_p0, %p245_p13 }
  0x19   : > { %p248_p2 = pneg %p247_p1 }
  0x1b   : > { %p253_p4 = pnand %p251_p3, %p248_p2 }
  0x1d   : > { %256 = shalt.err (!%p253_p4)
}
  0x1e   : > { %s257_s29 = scalar_lea.vmem %s81_s20, 128  ;;  %p265_p9 = scmp.lt.s32.totalorder %s81_s20, %s81_s20 }
  0x1f   : > { %p258_p7 = scmp.ne.s32.totalorder %s81_s20, %s257_s29  ;;  %p266_p6 = scmp.lt.s32.totalorder %s257_s29, %s257_s29 }
  0x21   : > { %p260_p8 = pnand %p258_p7, %p246_p0  ;;  %p267_p5 = por %p266_p6, %p265_p9 }
  0x23   : > { %p261_p11 = pneg %p260_p8 }
  0x25   : > { %p268_p10 = pnand %p267_p5, %p261_p11 }
  0x27   : > { %271 = shalt.err (!%p268_p10)
}
  0x28   : > { %203 = dma.hbm_to_vmem [thread:$0]  (!%p409_p12), %s482_s0, 128, %s81_s20, [#allocation3]  }
  0x29   : > { %p491_p13 = scmp.ne.s32.totalorder %s489_s18, 0 }
  0x2a   : > { %p492_p1 = scmp.eq.s32.totalorder (!%p491_p13), %s373_s10, 0 }
  0x2b   : > { %93 = sbr.rel (%p491_p13) target bundleno = 77 (0x4d), region = 24 }
  0x32   : > { %317 = dma.done.wait (%p492_p1), [#allocation3], 128   ;;  %p493_p0 = pmov %p492_p1 }
  0x33   : > { %s105_s3 = sand.u32 1, %s330_s7   ;;  %s191_s13 = sshll.u32 %s373_s10, 7  ;;  %v108_v0 = vld [vmem:[#allocation2] sm:$0xff] }
  0x34   : > { %319 = vsyncadd (%p493_p0), [#allocation3], 4294967168  ;;  %s189_s4 = sshll.u32 %s105_s3, 3  ;;  %v109_v1 = vadd.f32 1.0, %v108_v0  ;;  %s442_s19 = scalar_lea.hbm %s483_s1, %s191_s13 }
  0x35   : > { %s107_s5 = scalar_lea.vmem [#allocation5], %s189_s4  ;;  %s112_s20 = scalar_lea.sflag [#allocation4], %s105_s3 }
  0x36   : > { %s125_s11 = sshll.u32 %s107_s5, 4  ;;  %110 = vst [vmem:[%s107_s5] sm:$0xff] %v109_v1  ;;  %p494_p6 = scmp.ne.s32.totalorder %s487_s16, 0  ;;  %s437_s11 = int_to_ptr.vmem [resolvable:$true] %s125_s11 }
  0x37   : > { %s272_s21 = scalar_lea.vmem %s437_s11, 128  ;;  %s341_s10 = smov [#allocation5]  }
  0x38   : > { %p273_p5 = scmp.ne.s32.totalorder %s437_s11, %s272_s21  ;;  %s276_s22 = sshll.u32 %s341_s10, 4  ;;  %s277_s22 = int_to_ptr.vmem [resolvable:$false] %s276_s22 }
  0x39   : > { %s278_s23 = scalar_lea.vmem %s277_s22, 256  ;;  %p279_p12 = scmp.lt.s32.totalorder %s437_s11, %s277_s22 }
  0x3a   : > { %p274_p9 = pnand %p273_p5, %p494_p6  ;;  %p280_p2 = scmp.lt.s32.totalorder %s278_s23, %s272_s21 }
  0x3c   : > { %p275_p10 = pneg %p274_p9  ;;  %p281_p3 = por %p280_p2, %p279_p12 }
  0x3e   : > { %p282_p4 = pnand %p281_p3, %p275_p10 }
  0x40   : > { %285 = shalt.err (!%p282_p4)
}
  0x41   : > { %s286_s24 = scalar_lea.hbm %s442_s19, 128  ;;  %s290_s27 = scalar_lea.hbm %s483_s1, 256 }
  0x42   : > { %p287_p7 = scmp.ne.s32.totalorder %s442_s19, %s286_s24  ;;  %p291_p13 = scmp.lt.u32.totalorder %s442_s19, %s483_s1 }
  0x43   : > { %p292_p1 = scmp.lt.u32.totalorder %s290_s27, %s286_s24  ;;  %p294_p5 = scmp.lt.u32.totalorder %s286_s24, %s442_s19 }
  0x44   : > { %p288_p8 = pnand %p287_p7, %p494_p6 }
  0x45   : > { %p293_p0 = por %p292_p1, %p291_p13 }
  0x46   : > { %p289_p11 = pneg %p288_p8 }
  0x47   : > { %p295_p9 = por %p294_p5, %p293_p0 }
  0x49   : > { %p296_p10 = pnand %p295_p9, %p289_p11 }
  0x4b   : > { %299 = shalt.err (!%p296_p10)
}
  0x4c   : > { %198 = dma.vmem_to_hbm [thread:$0]  (%p494_p6), %s437_s11, 128, %s442_s19, %s112_s20  }
  0x4d PF: > { %p210_p12 = scmp.ge.s32.totalorder %s338_s9, 2  ;;  %s137_s30 = sand.u32 1, %s326_s6  }
  0x4e   : > { %p495_p2 = scmp.ne.s32.totalorder %s488_s17, 0  ;;  %s138_s2 = scalar_lea.sflag [#allocation4], %s137_s30 }
  0x50   : > { %p205_p3 = pnand %p210_p12, %p495_p2 }
  0x52   : > { %321 = dma.done.wait (!%p205_p3), %s138_s2, 128  }
  0x53   : > { %323 = vsyncadd (!%p205_p3), %s138_s2, 4294967168  ;;  %p12_p4 = scmp.ge.s32.totalorder %s377_s12, 4   ;;  %s496_s6 = smov %s330_s7 }
  0x54   : > { %s497_s7 = smov %s334_s8  ;;  %s498_s8 = smov %s388_s15 }
  0x55   : > { %s499_s9 = smov %s377_s12  ;;  %14 = sbr.rel (!%p12_p4) target bundleno = 4 (0x4), region = 61 }
  0x5c   :  { %143 = vsyncpa [#allocation3], 1 }
  0x5d   :  { %145 = vsyncpa [#allocation3 + $0x1], 1 }
  0x5e   :  { %146 = vsyncpa [#allocation4], 1 }
  0x5f   :  { %148 = vsyncpa [#allocation4 + $0x1], 1 }

// kernel: d_sty_forward.5
= control target key start
LH: loop header
LB: loop body
LE: loop exit
PB: predicated region body
PF: predicated region fallthrough
CT: control target
= control target key end

     0   :  { %s4499_s9 = smov 0   ;;  %s4501_s10 = smov 0   ;;  %s5851_s0 = inlined_call_operand.vmem [shape: bf16[4,33,17,12], index: 0, kind: input, shape index: {}]   ;;  %s5852_s1 = inlined_call_operand.vmem [shape: bf16[4,12,8], index: 1, kind: input, shape index: {}]   ;;  %s5853_s2 = inlined_call_operand.vmem [shape: bf16[4,32,16,8], index: 2, kind: output, shape index: {}]  }
   0x1   :  { %s4503_s11 = smov 0  }
   0x2 LB: > { %s24_s12 = sadd.s32 1, %s4478_s10  ;;  %p3465_p0 = scmp.ge.s32.totalorder %s4482_s11, 1  ;;  %s4482_s11 = sphi %s4503_s11, %s12_s11   ;;  %s4478_s10 = sphi %s4501_s10, %s5941_s10   ;;  %s4474_s9 = sphi %s4499_s9, %s5940_s9  }
   0x3   : > { %p26_p1 = scmp.ge.s32.totalorder %s24_s12, 4  ;;  %p126_p2 = scmp.lt.s32.totalorder %s4482_s11, 5 }
   0x5   : > { %s5943_s12 = smov (%p26_p1, %s24_s12), 0  ;;  %p127_p3 = pnand %p3465_p0, %p126_p2 }
   0x7   : > { %130 = sbr.rel (%p127_p3) target bundleno = 527 (0x20f), region = 28 }
   0xe   : > { %vm1247_vm0 = vcmask 1045504   ;;  %p153_p4 = scmp.lt.s32.totalorder %s4474_s9, 3  ;;  %v4421_v0 = vld [vmem:[%s5852_s1 + $0x10] sm:$0x3f]   ;;  %v4424_v1 = vld [vmem:[%s5852_s1 + $0x8] sm:$0x3f]  }
   0xf   : > { %4394 = vmatprep.subr.msk.bf16.mxu0 %vm1247_vm0, %v4421_v0  ;;  %v2110_v2 = vsel %vm1247_vm0, %v4421_v0, 0  ;;  %vm1150_vm1 = vcmask 97280   ;;  %4392 = vmatprep.subr.msk.bf16.mxu1 %vm1247_vm0, %v4424_v1  ;;  %v1249_v3 = vsel %vm1247_vm0, %v4424_v1, 0  ;;  %v4533_v4 = vld [vmem:[%s5852_s1] sm:$0x3f]   ;;  %vm3307_vm7 = vcmask 60416  }
  0x10   : > { %s5945_s9 = smov (!%p153_p4, %s4474_s9), 3  ;;  %4069 = vmatpush3.bf16.msra.mxu0 %v2110_v2  ;;  %3937 = vmatpush3.bf16.msra.mxu1 %v1249_v3  ;;  %vm275_vm2 = vsmask.f32 3328  ;;  %vm276_vm3 = vsmask.f32 7440 }
  0x11   : > { %s4396_s17 = smul.u32 396, %s5945_s9  ;;  %v4543_v5 = vld [vmem:[%s5852_s1 + $0x18] sm:$0x3f]   ;;  %4393 = vmatprep.subr.msk.bf16.mxu1 %vm1247_vm0, %v4533_v4  ;;  %vm4595_vm4 = vmor %vm275_vm2, %vm276_vm3  ;;  %s3739_s25 = sshll.u32 %s5945_s9, 8 }
  0x12   : > { %4395 = vmatprep.subr.msk.bf16.mxu0 %vm1247_vm0, %v4543_v5  ;;  %s5564_s28 = scalar_lea.vmem %s5853_s2, %s3739_s25 }
  0x13   : > { %s4538_s22 = scalar_lea.vmem %s5851_s0, %s4396_s17 }
  0x14   : > { %v177_v6 = vld [vmem:[%s4538_s22 + $0xc] sm:$0xf]  ;;  %v178_v7 = vld [vmem:[%s4538_s22 + $0x10] sm:$0xf]  ;;  %v180_v8 = vld [vmem:[%s4538_s22 + $0x18] sm:$0xf] }
  0x15   : > { %v303_v9 = vshrl.u32 %v177_v6, 16  ;;  %v306_v10 = vshll.u32 %v177_v6, 16  ;;  %v312_v11 = vshll.u32 %v178_v7, 16  ;;  %v316_v12 = vshrl.u32 %v178_v7, 16  ;;  %v181_v13 = vld [vmem:[%s4538_s22 + $0x1c] sm:$0xf] }
  0x16   : > { %v4553_v14 = vcombine.low %v177_v6, %v178_v7  ;;  %v327_v15 = vshrl.u32 %v180_v8, 16  ;;  %v330_v16 = vshll.u32 %v180_v8, 16  ;;  %v336_v17 = vshll.u32 %v181_v13, 16  ;;  %v183_v18 = vld [vmem:[%s4538_s22 + $0x24] sm:$0xf] }
  0x17   : > { %v305_v19 = vrot.slane %v303_v9, 4  ;;  %v308_v20 = vrot.slane %v306_v10, 5  ;;  %v4556_v21 = vrot.slane %v312_v11, 5  ;;  %v318_v22 = vrot.slane %v316_v12, 4  ;;  %v184_v23 = vld [vmem:[%s4538_s22 + $0x28] sm:$0xf] }
  0x18   : > { %4070 = vmatprep.mubr.msk.bf16.mxu0 %vm1150_vm1, %v4553_v14  ;;  %v4561_v24 = vrot.slane %v327_v15, 4  ;;  %v4563_v25 = vrot.slane %v330_v16, 5  ;;  %v4565_v26 = vrot.slane %v336_v17, 5  ;;  %v340_v27 = vshrl.u32 %v181_v13, 16  ;;  %v174_v32 = vld [vmem:[%s4538_s22] sm:$0xf] }
  0x19   : > { %v309_v28 = vor.u32 %v308_v20, %v305_v19  ;;  %v319_v29 = vor.u32 %v318_v22, %v4556_v21  ;;  %v4568_v30 = vcombine.low %v180_v8, %v181_v13  ;;  %v351_v31 = vshrl.u32 %v183_v18, 16  ;;  %v175_v33 = vld [vmem:[%s4538_s22 + $0x4] sm:$0xf]  ;;  %v176_v38 = vld [vmem:[%s4538_s22 + $0x8] sm:$0x1] }
  0x1a   : > { %v4572_v34 = vrot.slane %v340_v27, 4  ;;  %v354_v35 = vshll.u32 %v183_v18, 16  ;;  %v360_v36 = vshll.u32 %v184_v23, 16  ;;  %v364_v37 = vshrl.u32 %v184_v23, 16  ;;  %v186_v47 = vld [vmem:[%s4538_s22 + $0x30] sm:$0xf] }
  0x1b   : > { %v4575_v39 = vrot.slane %v309_v28, 4  ;;  %v320_v40 = vrot.slane %v319_v29, 4  ;;  %4071 = vmatmul.mubr.msk.bf16.vlgmr.msra.gmra.mrb[0].mxu0 %vm1150_vm1, %v4568_v30  ;;  %v4579_v41 = vrot.slane %v351_v31, 4  ;;  %v4581_v42 = vcombine.low %v183_v18, %v184_v23  ;;  %v187_v52 = vld [vmem:[%s4538_s22 + $0x34] sm:$0xf] }
  0x1c   : > { %v4583_v43 = vrot.slane %v354_v35, 5  ;;  %v4585_v44 = vrot.slane %v360_v36, 5  ;;  %v4587_v45 = vrot.slane %v364_v37, 4  ;;  %v279_v46 = vshrl.u32 %v174_v32, 16  ;;  %v179_v62 = vld [vmem:[%s4538_s22 + $0x14] sm:$0x1] }
  0x1d   : > { %4074 = vmatprep.mubr.msk.bf16.mxu0 %vm1150_vm1, %v4581_v42  ;;  %v282_v48 = vshll.u32 %v174_v32, 16  ;;  %v288_v49 = vshll.u32 %v175_v33, 16  ;;  %v292_v50 = vshrl.u32 %v175_v33, 16  ;;  %v298_v51 = vshll.u32 %v176_v38, 16  ;;  %v189_v3 = vld [vmem:[%s4538_s22 + $0x3c] sm:$0xf] }
  0x1e   : > { %v281_v54 = vrot.slane %v279_v46, 4  ;;  %v375_v55 = vshrl.u32 %v186_v47, 16  ;;  %v378_v56 = vshll.u32 %v186_v47, 16  ;;  %v384_v57 = vshll.u32 %v187_v52, 16  ;;  %v190_v10 = vld [vmem:[%s4538_s22 + $0x40] sm:$0xf] }
  0x1f   : > { %v284_v58 = vrot.slane %v282_v48, 5  ;;  %v290_v59 = vrot.slane %v288_v49, 5  ;;  %v294_v60 = vrot.slane %v292_v50, 4  ;;  %v300_v61 = vrot.slane %v298_v51, 5  ;;  %v182_v27 = vld [vmem:[%s4538_s22 + $0x20] sm:$0x1] }
  0x20   : > { %v4600_v63 = vrot.slane %v375_v55, 4  ;;  %v4602_v0 = vrot.slane %v378_v56, 5  ;;  %v4604_v1 = vrot.slane %v384_v57, 5  ;;  %v388_v2 = vshrl.u32 %v187_v52, 16  ;;  %v192_v36 = vld [vmem:[%s4538_s22 + $0x48] sm:$0xf] }
  0x21   : > { %v285_v6 = vor.u32 %v284_v58, %v281_v54  ;;  %v295_v7 = vor.u32 %v294_v60, %v290_v59  ;;  %v4607_v8 = vcombine.low %v186_v47, %v187_v52  ;;  %v315_v9 = vsel %vm4595_vm4, %v4575_v39, %v4556_v21  ;;  %v193_v37 = vld [vmem:[%s4538_s22 + $0x4c] sm:$0xf] }
  0x22   : > { %v4614_v11 = vrot.slane %v388_v2, 4  ;;  %v322_v12 = vshll.u32 %v179_v62, 16  ;;  %v1802_v13 = vsel %vm1247_vm0, %v4533_v4, 0  ;;  %v2504_v15 = vsel %vm1247_vm0, %v4543_v5, 0  ;;  %v185_v51 = vld [vmem:[%s4538_s22 + $0x2c] sm:$0x1] }
  0x23   : > { %v286_v16 = vrot.slane %v285_v6, 4  ;;  %v296_v17 = vrot.slane %v295_v7, 4  ;;  %4075 = vmatmul.mubr.msk.bf16.gmra.mrb[4].mxu0 %vm1150_vm1, %v4607_v8  ;;  %v399_v18 = vshrl.u32 %v189_v3, 16  ;;  %v402_v19 = vshll.u32 %v189_v3, 16 }
  0x24   : > { %v324_v20 = vrot.slane %v322_v12, 5  ;;  %4135 = vmatpush3.bf16.msra.mxu0 %v2504_v15  ;;  %v408_v21 = vshll.u32 %v190_v10, 16  ;;  %v412_v22 = vshrl.u32 %v190_v10, 16  ;;  %v4622_v23 = vcombine.low %v189_v3, %v190_v10  ;;  %v188_v15 = vld [vmem:[%s4538_s22 + $0x38] sm:$0x1] }
  0x25   : > { %v291_v4 = vsel %vm4595_vm4, %v286_v16, %v290_v59  ;;  %v301_v5 = vsel %vm4595_vm4, %v296_v17, %v300_v61  ;;  %v4629_v28 = vrot.slane %v399_v18, 4  ;;  %v4631_v29 = vrot.slane %v402_v19, 5  ;;  %v196_v59 = vld [vmem:[%s4538_s22 + $0x58] sm:$0xf] }
  0x26   : > { %v3471_v31 = vcombine.low %v291_v4, %v301_v5  ;;  %v325_v32 = vsel %vm4595_vm4, %v320_v40, %v324_v20  ;;  %v4635_v33 = vrot.slane %v408_v21, 5  ;;  %v4637_v35 = vrot.slane %v412_v22, 4  ;;  %4078 = vmatprep.mubr.msk.bf16.mxu0 %vm1150_vm1, %v4622_v23  ;;  %v198_v21 = vld [vmem:[%s4538_s22 + $0x60] sm:$0xf] }
  0x27   : > { %v4643_v38 = vcombine.low %v315_v9, %v325_v32  ;;  %v333_v39 = vor.u32 %v4563_v25, %v4561_v24  ;;  %v343_v46 = vor.u32 %v4572_v34, %v4565_v26  ;;  %v346_v47 = vshll.u32 %v182_v27, 16  ;;  %v195_v24 = vld [vmem:[%s4538_s22 + $0x54] sm:$0xf] }
  0x28   : > { %3938 = vmatprep.mubr.msk.bf16.mxu1 %vm1150_vm1, %v3471_v31  ;;  %v423_v40 = vshrl.u32 %v192_v36, 16  ;;  %v426_v48 = vshll.u32 %v192_v36, 16  ;;  %v432_v49 = vshll.u32 %v193_v37, 16  ;;  %v436_v50 = vshrl.u32 %v193_v37, 16 }
  0x29   : > { %3939 = vmatmul.mubr.msk.bf16.vlgmr.msra.gmra.mrb[0].mxu1 %vm1150_vm1, %v4643_v38  ;;  %v334_v52 = vrot.slane %v333_v39, 4  ;;  %v344_v54 = vrot.slane %v343_v46, 4  ;;  %v348_v55 = vrot.slane %v346_v47, 5  ;;  %v4653_v56 = vcombine.low %v192_v36, %v193_v37 }
  0x2a   : > { %4003 = vmatpush3.bf16.msra.mxu1 %v1802_v13  ;;  %v4656_v25 = vrot.slane %v423_v40, 4  ;;  %v4658_v34 = vrot.slane %v426_v48, 5  ;;  %v4660_v57 = vrot.slane %v432_v49, 5  ;;  %v4662_v58 = vrot.slane %v436_v50, 4  ;;  %v201_v40 = vld [vmem:[%s4538_s22 + $0x6c] sm:$0xf] }
  0x2b   : > { %v339_v60 = vsel %vm4595_vm4, %v334_v52, %v4565_v26  ;;  %v349_v61 = vsel %vm4595_vm4, %v344_v54, %v348_v55  ;;  %4079 = vmatmul.mubr.msk.bf16.gmra.mrb[8].mxu0 %vm1150_vm1, %v4653_v56  ;;  %v357_v62 = vor.u32 %v4583_v43, %v4579_v41  ;;  %v367_v2 = vor.u32 %v4587_v45, %v4585_v44 }
  0x2c   : > { %v4676_v3 = vcombine.low %v339_v60, %v349_v61  ;;  %v370_v6 = vshll.u32 %v185_v51, 16  ;;  %v447_v7 = vshrl.u32 %v195_v24, 16  ;;  %v450_v9 = vshll.u32 %v195_v24, 16  ;;  %v202_v51 = vld [vmem:[%s4538_s22 + $0x70] sm:$0xf] }
  0x2d   : > { %v358_v10 = vrot.slane %v357_v62, 4  ;;  %v368_v26 = vrot.slane %v367_v2, 4  ;;  %v456_v12 = vshll.u32 %v196_v59, 16  ;;  %v460_v13 = vshrl.u32 %v196_v59, 16 }
  0x2e   : > { %3942 = vmatprep.mubr.msk.bf16.mxu1 %vm1150_vm1, %v4676_v3  ;;  %v372_v16 = vrot.slane %v370_v6, 5  ;;  %v4681_v41 = vrot.slane %v447_v7, 4  ;;  %v4683_v43 = vrot.slane %v450_v9, 5  ;;  %v4685_v45 = vcombine.low %v195_v24, %v196_v59  ;;  %v194_v9 = vld [vmem:[%s4538_s22 + $0x50] sm:$0x1] }
  0x2f   : > { %v363_v17 = vsel %vm4595_vm4, %v358_v10, %v4585_v44  ;;  %v4690_v18 = vrot.slane %v456_v12, 5  ;;  %v4692_v19 = vrot.slane %v460_v13, 4  ;;  %v381_v20 = vor.u32 %v4602_v0, %v4600_v63  ;;  %v199_v44 = vld [vmem:[%s4538_s22 + $0x64] sm:$0xf] }
  0x30   : > { %v373_v22 = vsel %vm4595_vm4, %v368_v26, %v372_v16  ;;  %4082 = vmatprep.mubr.msk.bf16.mxu0 %vm1150_vm1, %v4685_v45  ;;  %v391_v27 = vor.u32 %v4614_v11, %v4604_v1  ;;  %v394_v4 = vshll.u32 %v188_v15, 16  ;;  %v471_v5 = vshrl.u32 %v198_v21, 16  ;;  %v191_v0 = vld [vmem:[%s4538_s22 + $0x44] sm:$0x1]  ;;  %v204_v16 = vld [vmem:[%s4538_s22 + $0x78] sm:$0xf] }
  0x31   : > { %v4704_v31 = vcombine.low %v363_v17, %v373_v22  ;;  %v382_v32 = vrot.slane %v381_v20, 4  ;;  %v474_v36 = vshll.u32 %v198_v21, 16  ;;  %v480_v63 = vshll.u32 %v199_v44, 16 }
  0x32   : > { %v392_v37 = vrot.slane %v391_v27, 4  ;;  %v396_v39 = vrot.slane %v394_v4, 5  ;;  %v4707_v46 = vrot.slane %v471_v5, 4  ;;  %v484_v47 = vshrl.u32 %v199_v44, 16 }
  0x33   : > { %3943 = vmatmul.mubr.msk.bf16.gmra.mrb[4].mxu1 %vm1150_vm1, %v4704_v31  ;;  %v387_v11 = vsel %vm4595_vm4, %v382_v32, %v4604_v1  ;;  %v4715_v48 = vrot.slane %v474_v36, 5  ;;  %v4717_v49 = vrot.slane %v480_v63, 5  ;;  %v4719_v50 = vcombine.low %v198_v21, %v199_v44 }
  0x34   : > { %v397_v52 = vsel %vm4595_vm4, %v392_v37, %v396_v39  ;;  %v4724_v54 = vrot.slane %v484_v47, 4  ;;  %v405_v55 = vor.u32 %v4631_v29, %v4629_v28  ;;  %v415_v24 = vor.u32 %v4637_v35, %v4635_v33 }
  0x35   : > { %v4730_v1 = vcombine.low %v387_v11, %v397_v52  ;;  %4083 = vmatmul.mubr.msk.bf16.gmra.mrb[12].mxu0 %vm1150_vm1, %v4719_v50  ;;  %v418_v59 = vshll.u32 %v191_v0, 16  ;;  %v495_v60 = vshrl.u32 %v201_v40, 16  ;;  %v498_v61 = vshll.u32 %v201_v40, 16  ;;  %v207_v0 = vld [vmem:[%s4538_s22 + $0x84] sm:$0xf] }
  0x36   : > { %v406_v62 = vrot.slane %v405_v55, 4  ;;  %v416_v2 = vrot.slane %v415_v24, 4  ;;  %v504_v6 = vshll.u32 %v202_v51, 16  ;;  %v508_v7 = vshrl.u32 %v202_v51, 16 }
  0x37   : > { %3946 = vmatprep.mubr.msk.bf16.mxu1 %vm1150_vm1, %v4730_v1  ;;  %v420_v28 = vrot.slane %v418_v59, 5  ;;  %v4737_v29 = vrot.slane %v495_v60, 4  ;;  %v4739_v35 = vrot.slane %v498_v61, 5  ;;  %v4741_v10 = vcombine.low %v201_v40, %v202_v51  ;;  %v208_v40 = vld [vmem:[%s4538_s22 + $0x88] sm:$0xf] }
  0x38   : > { %v411_v26 = vsel %vm4595_vm4, %v406_v62, %v4635_v33  ;;  %v4746_v12 = vrot.slane %v504_v6, 5  ;;  %v4748_v13 = vrot.slane %v508_v7, 4  ;;  %v429_v15 = vor.u32 %v4658_v34, %v4656_v25  ;;  %v205_v33 = vld [vmem:[%s4538_s22 + $0x7c] sm:$0xf]  ;;  %v200_v7 = vld [vmem:[%s4538_s22 + $0x68] sm:$0x1] }
  0x39   : > { %v421_v17 = vsel %vm4595_vm4, %v416_v2, %v420_v28  ;;  %4086 = vmatprep.mubr.msk.bf16.mxu0 %vm1150_vm1, %v4741_v10  ;;  %v439_v20 = vor.u32 %v4662_v58, %v4660_v57  ;;  %v442_v21 = vshll.u32 %v194_v9, 16  ;;  %v519_v22 = vshrl.u32 %v204_v16, 16  ;;  %v197_v34 = vld [vmem:[%s4538_s22 + $0x5c] sm:$0x1] }
  0x3a   : > { %v4760_v27 = vcombine.low %v411_v26, %v421_v17  ;;  %v430_v4 = vrot.slane %v429_v15, 4  ;;  %v522_v44 = vshll.u32 %v204_v16, 16  ;;  %v528_v25 = vshll.u32 %v205_v33, 16  ;;  %v210_v17 = vld [vmem:[%s4538_s22 + $0x90] sm:$0xf] }
  0x3b   : > { %v440_v5 = vrot.slane %v439_v20, 4  ;;  %v444_v32 = vrot.slane %v442_v21, 5  ;;  %v4763_v36 = vrot.slane %v519_v22, 4  ;;  %v532_v63 = vshrl.u32 %v205_v33, 16 }
  0x3c   : > { %3947 = vmatmul.mubr.msk.bf16.gmra.mrb[8].mxu1 %vm1150_vm1, %v4760_v27  ;;  %v435_v58 = vsel %vm4595_vm4, %v430_v4, %v4660_v57  ;;  %v4771_v37 = vrot.slane %v522_v44, 5  ;;  %v4773_v39 = vrot.slane %v528_v25, 5  ;;  %v4775_v47 = vcombine.low %v204_v16, %v205_v33 }
  0x3d   : > { %v445_v11 = vsel %vm4595_vm4, %v440_v5, %v444_v32  ;;  %v4780_v51 = vrot.slane %v532_v63, 4  ;;  %v453_v52 = vor.u32 %v4683_v43, %v4681_v41  ;;  %v463_v55 = vor.u32 %v4692_v19, %v4690_v18 }
  0x3e   : > { %v4786_v57 = vcombine.low %v435_v58, %v445_v11  ;;  %4087 = vmatmul.mubr.msk.bf16.gmra.mrb[16].mxu0 %vm1150_vm1, %v4775_v47  ;;  %v466_v24 = vshll.u32 %v197_v34, 16  ;;  %v543_v59 = vshrl.u32 %v207_v0, 16  ;;  %v546_v60 = vshll.u32 %v207_v0, 16 }
  0x3f   : > { %v454_v61 = vrot.slane %v453_v52, 4  ;;  %v464_v62 = vrot.slane %v463_v55, 4  ;;  %v552_v2 = vshll.u32 %v208_v40, 16  ;;  %v556_v6 = vshrl.u32 %v208_v40, 16  ;;  %v214_v52 = vld [vmem:[%s4538_s22 + $0xa0] sm:$0xf] }
  0x40   : > { %3950 = vmatprep.mubr.msk.bf16.mxu1 %vm1150_vm1, %v4786_v57  ;;  %v468_v41 = vrot.slane %v466_v24, 5  ;;  %v4793_v43 = vrot.slane %v543_v59, 4  ;;  %v4795_v19 = vrot.slane %v546_v60, 5  ;;  %v4797_v9 = vcombine.low %v207_v0, %v208_v40  ;;  %v213_v0 = vld [vmem:[%s4538_s22 + $0x9c] sm:$0xf] }
  0x41   : > { %v459_v28 = vsel %vm4595_vm4, %v454_v61, %v4690_v18  ;;  %v4802_v26 = vrot.slane %v552_v2, 5  ;;  %v4804_v15 = vrot.slane %v556_v6, 4  ;;  %v477_v16 = vor.u32 %v4715_v48, %v4707_v46  ;;  %v211_v18 = vld [vmem:[%s4538_s22 + $0x94] sm:$0xf] }
  0x42   : > { %v469_v20 = vsel %vm4595_vm4, %v464_v62, %v468_v41  ;;  %4090 = vmatprep.mubr.msk.bf16.mxu0 %vm1150_vm1, %v4797_v9  ;;  %v487_v21 = vor.u32 %v4724_v54, %v4717_v49  ;;  %v490_v33 = vshll.u32 %v200_v7, 16  ;;  %v567_v22 = vshrl.u32 %v210_v17, 16  ;;  %v203_v48 = vld [vmem:[%s4538_s22 + $0x74] sm:$0x1] }
  0x43   : > { %v4816_v4 = vcombine.low %v459_v28, %v469_v20  ;;  %v478_v44 = vrot.slane %v477_v16, 4  ;;  %v570_v25 = vshll.u32 %v210_v17, 16  ;;  %v576_v46 = vshll.u32 %v211_v18, 16  ;;  %v206_v16 = vld [vmem:[%s4538_s22 + $0x80] sm:$0x1] }
  0x44   : > { %v488_v34 = vrot.slane %v487_v21, 4  ;;  %v492_v5 = vrot.slane %v490_v33, 5  ;;  %v4819_v32 = vrot.slane %v567_v22, 4  ;;  %v580_v63 = vshrl.u32 %v211_v18, 16  ;;  %v216_v22 = vld [vmem:[%s4538_s22 + $0xa8] sm:$0xf] }
  0x45   : > { %3951 = vmatmul.mubr.msk.bf16.gmra.mrb[12].mxu1 %vm1150_vm1, %v4816_v4  ;;  %v483_v54 = vsel %vm4595_vm4, %v478_v44, %v4717_v49  ;;  %v4827_v58 = vrot.slane %v570_v25, 5  ;;  %v4829_v40 = vrot.slane %v576_v46, 5  ;;  %v4831_v11 = vcombine.low %v210_v17, %v211_v18 }
  0x46   : > { %v493_v55 = vsel %vm4595_vm4, %v488_v34, %v492_v5  ;;  %v4836_v24 = vrot.slane %v580_v63, 4  ;;  %v501_v59 = vor.u32 %v4739_v35, %v4737_v29  ;;  %v511_v60 = vor.u32 %v4748_v13, %v4746_v12 }
  0x47   : > { %v4842_v49 = vcombine.low %v483_v54, %v493_v55  ;;  %4091 = vmatmul.mubr.msk.bf16.gmra.mrb[20].mxu0 %vm1150_vm1, %v4831_v11  ;;  %v514_v61 = vshll.u32 %v203_v48, 16  ;;  %v591_v62 = vshrl.u32 %v213_v0, 16  ;;  %v594_v2 = vshll.u32 %v213_v0, 16 }
  0x48   : > { %v502_v6 = vrot.slane %v501_v59, 4  ;;  %v512_v7 = vrot.slane %v511_v60, 4  ;;  %v600_v41 = vshll.u32 %v214_v52, 16  ;;  %v604_v28 = vshrl.u32 %v214_v52, 16  ;;  %v219_v59 = vld [vmem:[%s4538_s22 + $0xb4] sm:$0xf] }
  0x49   : > { %3954 = vmatprep.mubr.msk.bf16.mxu1 %vm1150_vm1, %v4842_v49  ;;  %v516_v29 = vrot.slane %v514_v61, 5  ;;  %v4849_v35 = vrot.slane %v591_v62, 4  ;;  %v4851_v13 = vrot.slane %v594_v2, 5  ;;  %v4853_v17 = vcombine.low %v213_v0, %v214_v52  ;;  %v220_v2 = vld [vmem:[%s4538_s22 + $0xb8] sm:$0xf] }
  0x4a   : > { %v507_v20 = vsel %vm4595_vm4, %v502_v6, %v4746_v12  ;;  %v4858_v21 = vrot.slane %v600_v41, 5  ;;  %v4860_v33 = vrot.slane %v604_v28, 4  ;;  %v525_v18 = vor.u32 %v4771_v37, %v4763_v36  ;;  %v217_v12 = vld [vmem:[%s4538_s22 + $0xac] sm:$0xf] }
  0x4b   : > { %5884 = vst [vmem:[#allocation2_spill] sm:$0xff] %v4853_v17  ;;  %v517_v44 = vsel %vm4595_vm4, %v512_v7, %v516_v29  ;;  %4094 = vmatprep.mubr.msk.bf16.mxu0 %vm1150_vm1, %v4853_v17  ;;  %v535_v25 = vor.u32 %v4780_v51, %v4773_v39  ;;  %v538_v46 = vshll.u32 %v206_v16, 16  ;;  %v615_v48 = vshrl.u32 %v216_v22, 16  ;;  %v209_v37 = vld [vmem:[%s4538_s22 + $0x8c] sm:$0x1] }
  0x4c   : > { %v4872_v34 = vcombine.low %v507_v20, %v517_v44  ;;  %v526_v5 = vrot.slane %v525_v18, 4  ;;  %v618_v63 = vshll.u32 %v216_v22, 16  ;;  %v624_v36 = vshll.u32 %v217_v12, 16 }
  0x4d   : > { %v536_v0 = vrot.slane %v535_v25, 4  ;;  %v540_v54 = vrot.slane %v538_v46, 5  ;;  %v4875_v52 = vrot.slane %v615_v48, 4  ;;  %v628_v55 = vshrl.u32 %v217_v12, 16  ;;  %v212_v46 = vld [vmem:[%s4538_s22 + $0x98] sm:$0x1] }
  0x4e   : > { %3955 = vmatmul.mubr.msk.bf16.gmra.mrb[16].mxu1 %vm1150_vm1, %v4872_v34  ;;  %v531_v51 = vsel %vm4595_vm4, %v526_v5, %v4773_v39  ;;  %v4883_v60 = vrot.slane %v618_v63, 5  ;;  %v4885_v61 = vrot.slane %v624_v36, 5  ;;  %v4887_v62 = vcombine.low %v216_v22, %v217_v12 }
  0x4f   : > { %v541_v6 = vsel %vm4595_vm4, %v536_v0, %v540_v54  ;;  %v4892_v7 = vrot.slane %v628_v55, 4  ;;  %v549_v41 = vor.u32 %v4795_v19, %v4793_v43  ;;  %v559_v28 = vor.u32 %v4804_v15, %v4802_v26 }
  0x50   : > { %5885 = vst [vmem:[#allocation3_spill] sm:$0xff] %v4887_v62  ;;  %v4898_v39 = vcombine.low %v531_v51, %v541_v6  ;;  %4095 = vmatmul.mubr.msk.bf16.gmra.mrb[24].mxu0 %vm1150_vm1, %v4887_v62  ;;  %v562_v16 = vshll.u32 %v209_v37, 16  ;;  %v639_v29 = vshrl.u32 %v219_v59, 16  ;;  %v642_v20 = vshll.u32 %v219_v59, 16  ;;  %v222_v37 = vld [vmem:[%s4538_s22 + $0xc0] sm:$0xf] }
  0x51   : > { %v550_v18 = vrot.slane %v549_v41, 4  ;;  %v560_v22 = vrot.slane %v559_v28, 4  ;;  %v648_v44 = vshll.u32 %v220_v2, 16  ;;  %v652_v25 = vshrl.u32 %v220_v2, 16 }
  0x52   : > { %3958 = vmatprep.mubr.msk.bf16.mxu1 %vm1150_vm1, %v4898_v39  ;;  %v564_v43 = vrot.slane %v562_v16, 5  ;;  %v4905_v19 = vrot.slane %v639_v29, 4  ;;  %v4907_v15 = vrot.slane %v642_v20, 5  ;;  %v4909_v12 = vcombine.low %v219_v59, %v220_v2  ;;  %v225_v20 = vld [vmem:[%s4538_s22 + $0xcc] sm:$0xf] }
  0x53   : > { %v555_v48 = vsel %vm4595_vm4, %v550_v18, %v4802_v26  ;;  %v4914_v5 = vrot.slane %v648_v44, 5  ;;  %v4916_v63 = vrot.slane %v652_v25, 4  ;;  %v573_v36 = vor.u32 %v4827_v58, %v4819_v32  ;;  %v223_v26 = vld [vmem:[%s4538_s22 + $0xc4] sm:$0xf]  ;;  %v226_v25 = vld [vmem:[%s4538_s22 + $0xd0] sm:$0xf] }
  0x54   : > { %5886 = vst [vmem:[#allocation4_spill] sm:$0xff] %v4909_v12  ;;  %v565_v0 = vsel %vm4595_vm4, %v560_v22, %v564_v43  ;;  %4098 = vmatprep.mubr.msk.bf16.mxu0 %vm1150_vm1, %v4909_v12  ;;  %v583_v54 = vor.u32 %v4836_v24, %v4829_v40  ;;  %v586_v55 = vshll.u32 %v212_v46, 16  ;;  %v663_v59 = vshrl.u32 %v222_v37, 16  ;;  %v215_v58 = vld [vmem:[%s4538_s22 + $0xa4] sm:$0x1] }
  0x55   : > { %v4928_v51 = vcombine.low %v555_v48, %v565_v0  ;;  %v574_v2 = vrot.slane %v573_v36, 4  ;;  %v666_v6 = vshll.u32 %v222_v37, 16  ;;  %v672_v32 = vshll.u32 %v223_v26, 16 }
  0x56   : > { %v584_v41 = vrot.slane %v583_v54, 4  ;;  %v588_v28 = vrot.slane %v586_v55, 5  ;;  %v4931_v16 = vrot.slane %v663_v59, 4  ;;  %v676_v29 = vshrl.u32 %v223_v26, 16 }
  0x57   : > { %3959 = vmatmul.mubr.msk.bf16.gmra.mrb[20].mxu1 %vm1150_vm1, %v4928_v51  ;;  %v579_v24 = vsel %vm4595_vm4, %v574_v2, %v4829_v40  ;;  %v4939_v18 = vrot.slane %v666_v6, 5  ;;  %v4941_v22 = vrot.slane %v672_v32, 5  ;;  %v4943_v44 = vcombine.low %v222_v37, %v223_v26  ;;  %v218_v6 = vld [vmem:[%s4538_s22 + $0xb0] sm:$0x1]  ;;  %v5915_v53 = vld [vmem:[#allocation3_spill] sm:$0xff] }
  0x58   : > { %v589_v46 = vsel %vm4595_vm4, %v584_v41, %v588_v28  ;;  %v4948_v43 = vrot.slane %v676_v29, 4  ;;  %v597_v48 = vor.u32 %v4851_v13, %v4849_v35  ;;  %v607_v36 = vor.u32 %v4860_v33, %v4858_v21 }
  0x59   : > { %5887 = vst [vmem:[#allocation5_spill] sm:$0xff] %v4943_v44  ;;  %v4954_v40 = vcombine.low %v579_v24, %v589_v46  ;;  %4099 = vmatmul.mubr.msk.bf16.gmra.mrb[28].mxu0 %vm1150_vm1, %v4943_v44  ;;  %v610_v0 = vshll.u32 %v215_v58, 16  ;;  %v687_v37 = vshrl.u32 %v225_v20, 16  ;;  %v690_v54 = vshll.u32 %v225_v20, 16  ;;  %v228_v24 = vld [vmem:[%s4538_s22 + $0xd8] sm:$0xf] }
  0x5a   : > { %v598_v55 = vrot.slane %v597_v48, 4  ;;  %v608_v26 = vrot.slane %v607_v36, 4  ;;  %v696_v59 = vshll.u32 %v226_v25, 16  ;;  %v700_v2 = vshrl.u32 %v226_v25, 16 }
  0x5b   : > { %3962 = vmatprep.mubr.msk.bf16.mxu1 %vm1150_vm1, %v4954_v40  ;;  %v612_v35 = vrot.slane %v610_v0, 5  ;;  %v4961_v13 = vrot.slane %v687_v37, 4  ;;  %v4963_v33 = vrot.slane %v690_v54, 5  ;;  %v4965_v32 = vcombine.low %v225_v20, %v226_v25 }
  0x5c   : > { %v603_v58 = vsel %vm4595_vm4, %v598_v55, %v4858_v21  ;;  %v4970_v41 = vrot.slane %v696_v59, 5  ;;  %v4972_v28 = vrot.slane %v700_v2, 4  ;;  %v621_v29 = vor.u32 %v4883_v60, %v4875_v52  ;;  %v229_v21 = vld [vmem:[%s4538_s22 + $0xdc] sm:$0xf]  ;;  %v231_v2 = vld [vmem:[%s4538_s22 + $0xe4] sm:$0xf] }
  0x5d   : > { %5888 = vst [vmem:[#allocation6_spill] sm:$0xff] %v4965_v32  ;;  %v613_v46 = vsel %vm4595_vm4, %v608_v26, %v612_v35  ;;  %4102 = vmatprep.mubr.msk.bf16.mxu0 %vm1150_vm1, %v4965_v32  ;;  %v631_v20 = vor.u32 %v4892_v7, %v4885_v61  ;;  %v634_v25 = vshll.u32 %v218_v6, 16  ;;  %v711_v48 = vshrl.u32 %v228_v24, 16  ;;  %v221_v60 = vld [vmem:[%s4538_s22 + $0xbc] sm:$0x1] }
  0x5e   : > { %v4984_v36 = vcombine.low %v603_v58, %v613_v46  ;;  %v622_v0 = vrot.slane %v621_v29, 4  ;;  %v714_v37 = vshll.u32 %v228_v24, 16  ;;  %v720_v52 = vshll.u32 %v229_v21, 16  ;;  %v232_v29 = vld [vmem:[%s4538_s22 + $0xe8] sm:$0xf] }
  0x5f   : > { %v632_v54 = vrot.slane %v631_v20, 4  ;;  %v636_v55 = vrot.slane %v634_v25, 5  ;;  %v4987_v59 = vrot.slane %v711_v48, 4  ;;  %v724_v26 = vshrl.u32 %v229_v21, 16 }
  0x60   : > { %3963 = vmatmul.mubr.msk.bf16.gmra.mrb[24].mxu1 %vm1150_vm1, %v4984_v36  ;;  %v627_v7 = vsel %vm4595_vm4, %v622_v0, %v4885_v61  ;;  %v4995_v6 = vrot.slane %v714_v37, 5  ;;  %v4997_v35 = vrot.slane %v720_v52, 5  ;;  %v4999_v58 = vcombine.low %v228_v24, %v229_v21 }
  0x61   : > { %v637_v46 = vsel %vm4595_vm4, %v632_v54, %v636_v55  ;;  %v5004_v20 = vrot.slane %v724_v26, 4  ;;  %v645_v25 = vor.u32 %v4907_v15, %v4905_v19  ;;  %v655_v48 = vor.u32 %v4916_v63, %v4914_v5  ;;  %v224_v26 = vld [vmem:[%s4538_s22 + $0xc8] sm:$0x1] }
  0x62   : > { %5889 = vst [vmem:[#allocation7_spill] sm:$0xff] %v4999_v58  ;;  %v5010_v61 = vcombine.low %v627_v7, %v637_v46  ;;  %4103 = vmatmul.mubr.msk.bf16.gmra.mrb[32].mxu0 %vm1150_vm1, %v4999_v58  ;;  %v658_v0 = vshll.u32 %v221_v60, 16  ;;  %v735_v24 = vshrl.u32 %v231_v2, 16  ;;  %v738_v21 = vshll.u32 %v231_v2, 16  ;;  %v234_v58 = vld [vmem:[%s4538_s22 + $0xf0] sm:$0xf] }
  0x63   : > { %v646_v37 = vrot.slane %v645_v25, 4  ;;  %v656_v52 = vrot.slane %v655_v48, 4  ;;  %v744_v54 = vshll.u32 %v232_v29, 16  ;;  %v748_v55 = vshrl.u32 %v232_v29, 16 }
  0x64   : > { %3966 = vmatprep.mubr.msk.bf16.mxu1 %vm1150_vm1, %v5010_v61  ;;  %v660_v19 = vrot.slane %v658_v0, 5  ;;  %v5017_v15 = vrot.slane %v735_v24, 4  ;;  %v5019_v63 = vrot.slane %v738_v21, 5  ;;  %v5021_v7 = vcombine.low %v231_v2, %v232_v29 }
  0x65   : > { %v651_v60 = vsel %vm4595_vm4, %v646_v37, %v4914_v5  ;;  %v5026_v46 = vrot.slane %v744_v54, 5  ;;  %v5028_v25 = vrot.slane %v748_v55, 4  ;;  %v669_v48 = vor.u32 %v4939_v18, %v4931_v16  ;;  %v235_v5 = vld [vmem:[%s4538_s22 + $0xf4] sm:$0xf] }
  0x66   : > { %5890 = vst [vmem:[#allocation8_spill] sm:$0xff] %v5021_v7  ;;  %v661_v0 = vsel %vm4595_vm4, %v656_v52, %v660_v19  ;;  %4106 = vmatprep.mubr.msk.bf16.mxu0 %vm1150_vm1, %v5021_v7  ;;  %v679_v2 = vor.u32 %v4948_v43, %v4941_v22  ;;  %v682_v29 = vshll.u32 %v224_v26, 16  ;;  %v759_v24 = vshrl.u32 %v234_v58, 16  ;;  %v227_v18 = vld [vmem:[%s4538_s22 + $0xd4] sm:$0x1] }
  0x67   : > { %v5040_v21 = vcombine.low %v651_v60, %v661_v0  ;;  %v670_v37 = vrot.slane %v669_v48, 4  ;;  %v762_v54 = vshll.u32 %v234_v58, 16  ;;  %v768_v16 = vshll.u32 %v235_v5, 16  ;;  %v237_v19 = vld [vmem:[%s4538_s22 + $0xfc] sm:$0xf] }
  0x68   : > { %v680_v55 = vrot.slane %v679_v2, 4  ;;  %v684_v32 = vrot.slane %v682_v29, 5  ;;  %v5043_v44 = vrot.slane %v759_v24, 4  ;;  %v772_v52 = vshrl.u32 %v235_v5, 16  ;;  %v238_v0 = vld [vmem:[%s4538_s22 + $0x100] sm:$0xf] }
  0x69   : > { %3967 = vmatmul.mubr.msk.bf16.gmra.mrb[28].mxu1 %vm1150_vm1, %v5040_v21  ;;  %v675_v43 = vsel %vm4595_vm4, %v670_v37, %v4941_v22  ;;  %v5051_v26 = vrot.slane %v762_v54, 5  ;;  %v5053_v60 = vrot.slane %v768_v16, 5  ;;  %v5055_v48 = vcombine.low %v234_v58, %v235_v5 }
  0x6a   : > { %v685_v2 = vsel %vm4595_vm4, %v680_v55, %v684_v32  ;;  %v5060_v29 = vrot.slane %v772_v52, 4  ;;  %v693_v24 = vor.u32 %v4963_v33, %v4961_v13  ;;  %v703_v7 = vor.u32 %v4972_v28, %v4970_v41  ;;  %v230_v52 = vld [vmem:[%s4538_s22 + $0xe0] sm:$0x1] }
  0x6b   : > { %5891 = vst [vmem:[#allocation9_spill] sm:$0xff] %v5055_v48  ;;  %v5066_v22 = vcombine.low %v675_v43, %v685_v2  ;;  %4107 = vmatmul.mubr.msk.bf16.gmra.mrb[36].mxu0 %vm1150_vm1, %v5055_v48  ;;  %v706_v37 = vshll.u32 %v227_v18, 16  ;;  %v783_v58 = vshrl.u32 %v237_v19, 16  ;;  %v786_v5 = vshll.u32 %v237_v19, 16  ;;  %v240_v48 = vld [vmem:[%s4538_s22 + $0x108] sm:$0xf] }
  0x6c   : > { %v694_v54 = vrot.slane %v693_v24, 4  ;;  %v704_v16 = vrot.slane %v703_v7, 4  ;;  %v792_v32 = vshll.u32 %v238_v0, 16  ;;  %v796_v55 = vshrl.u32 %v238_v0, 16 }
  0x6d   : > { %3970 = vmatprep.mubr.msk.bf16.mxu1 %vm1150_vm1, %v5066_v22  ;;  %v708_v13 = vrot.slane %v706_v37, 5  ;;  %v5073_v33 = vrot.slane %v783_v58, 4  ;;  %v5075_v28 = vrot.slane %v786_v5, 5  ;;  %v5077_v43 = vcombine.low %v237_v19, %v238_v0 }
  0x6e   : > { %v699_v18 = vsel %vm4595_vm4, %v694_v54, %v4970_v41  ;;  %v5082_v7 = vrot.slane %v792_v32, 5  ;;  %v5084_v2 = vrot.slane %v796_v55, 4  ;;  %v717_v24 = vor.u32 %v4995_v6, %v4987_v59  ;;  %v241_v41 = vld [vmem:[%s4538_s22 + $0x10c] sm:$0xf] }
  0x6f   : > { %5892 = vst [vmem:[#allocation10_spill] sm:$0xff] %v5077_v43  ;;  %v709_v37 = vsel %vm4595_vm4, %v704_v16, %v708_v13  ;;  %4110 = vmatprep.mubr.msk.bf16.mxu0 %vm1150_vm1, %v5077_v43  ;;  %v727_v19 = vor.u32 %v5004_v20, %v4997_v35  ;;  %v730_v0 = vshll.u32 %v230_v52, 16  ;;  %v807_v58 = vshrl.u32 %v240_v48, 16  ;;  %v233_v6 = vld [vmem:[%s4538_s22 + $0xec] sm:$0x1] }
  0x70   : > { %v5096_v5 = vcombine.low %v699_v18, %v709_v37  ;;  %v718_v54 = vrot.slane %v717_v24, 4  ;;  %v810_v32 = vshll.u32 %v240_v48, 16  ;;  %v816_v59 = vshll.u32 %v241_v41, 16  ;;  %v243_v13 = vld [vmem:[%s4538_s22 + $0x114] sm:$0xf] }
  0x71   : > { %v728_v55 = vrot.slane %v727_v19, 4  ;;  %v732_v12 = vrot.slane %v730_v0, 5  ;;  %v5099_v62 = vrot.slane %v807_v58, 4  ;;  %v820_v16 = vshrl.u32 %v241_v41, 16  ;;  %v244_v37 = vld [vmem:[%s4538_s22 + $0x118] sm:$0xf] }
  0x72   : > { %5893 = vst [vmem:[#allocation11_spill] sm:$0xff] %v5096_v5  ;;  %3971 = vmatmul.mubr.msk.bf16.gmra.mrb[32].mxu1 %vm1150_vm1, %v5096_v5  ;;  %v723_v20 = vsel %vm4595_vm4, %v718_v54, %v4997_v35  ;;  %v5107_v52 = vrot.slane %v810_v32, 5  ;;  %v5109_v18 = vrot.slane %v816_v59, 5  ;;  %v5111_v24 = vcombine.low %v240_v48, %v241_v41  ;;  %v271_v5 = vld [vmem:[%s4538_s22 + $0x184] sm:$0xf] }
  0x73   : > { %v733_v19 = vsel %vm4595_vm4, %v728_v55, %v732_v12  ;;  %v5116_v0 = vrot.slane %v820_v16, 4  ;;  %v741_v58 = vor.u32 %v5019_v63, %v5017_v15  ;;  %v751_v43 = vor.u32 %v5028_v25, %v5026_v46  ;;  %v236_v16 = vld [vmem:[%s4538_s22 + $0xf8] sm:$0x1] }
  0x74   : > { %5894 = vst [vmem:[#allocation12_spill] sm:$0xff] %v5111_v24  ;;  %v5122_v35 = vcombine.low %v723_v20, %v733_v19  ;;  %4111 = vmatmul.mubr.msk.bf16.gmra.mrb[40].mxu0 %vm1150_vm1, %v5111_v24  ;;  %v754_v54 = vshll.u32 %v233_v6, 16  ;;  %v831_v48 = vshrl.u32 %v243_v13, 16  ;;  %v834_v41 = vshll.u32 %v243_v13, 16  ;;  %v246_v24 = vld [vmem:[%s4538_s22 + $0x120] sm:$0xf] }
  0x75   : > { %v742_v32 = vrot.slane %v741_v58, 4  ;;  %v752_v59 = vrot.slane %v751_v43, 4  ;;  %v840_v12 = vshll.u32 %v244_v37, 16  ;;  %v844_v55 = vshrl.u32 %v244_v37, 16 }
  0x76   : > { %5895 = vst [vmem:[#allocation13_spill] sm:$0xff] %v5122_v35  ;;  %3974 = vmatprep.mubr.msk.bf16.mxu1 %vm1150_vm1, %v5122_v35  ;;  %v756_v15 = vrot.slane %v754_v54, 5  ;;  %v5129_v63 = vrot.slane %v831_v48, 4  ;;  %v5131_v25 = vrot.slane %v834_v41, 5  ;;  %v5133_v20 = vcombine.low %v243_v13, %v244_v37 }
  0x77   : > { %v747_v6 = vsel %vm4595_vm4, %v742_v32, %v5026_v46  ;;  %v5138_v43 = vrot.slane %v840_v12, 5  ;;  %v5140_v19 = vrot.slane %v844_v55, 4  ;;  %v765_v58 = vor.u32 %v5051_v26, %v5043_v44  ;;  %v247_v46 = vld [vmem:[%s4538_s22 + $0x124] sm:$0xf] }
  0x78   : > { %5896 = vst [vmem:[#allocation14_spill] sm:$0xff] %v5133_v20  ;;  %v757_v54 = vsel %vm4595_vm4, %v752_v59, %v756_v15  ;;  %4114 = vmatprep.mubr.msk.bf16.mxu0 %vm1150_vm1, %v5133_v20  ;;  %v775_v13 = vor.u32 %v5060_v29, %v5053_v60  ;;  %v778_v37 = vshll.u32 %v236_v16, 16  ;;  %v855_v48 = vshrl.u32 %v246_v24, 16  ;;  %v239_v26 = vld [vmem:[%s4538_s22 + $0x104] sm:$0x1] }
  0x79   : > { %v5152_v41 = vcombine.low %v747_v6, %v757_v54  ;;  %v766_v32 = vrot.slane %v765_v58, 4  ;;  %v858_v12 = vshll.u32 %v246_v24, 16  ;;  %v864_v44 = vshll.u32 %v247_v46, 16  ;;  %v249_v15 = vld [vmem:[%s4538_s22 + $0x12c] sm:$0xf] }
  0x7a   : > { %v776_v55 = vrot.slane %v775_v13, 4  ;;  %v780_v35 = vrot.slane %v778_v37, 5  ;;  %v5155_v17 = vrot.slane %v855_v48, 4  ;;  %v868_v59 = vshrl.u32 %v247_v46, 16  ;;  %v250_v54 = vld [vmem:[%s4538_s22 + $0x130] sm:$0xf] }
  0x7b   : > { %5897 = vst [vmem:[#allocation15_spill] sm:$0xff] %v5152_v41  ;;  %3975 = vmatmul.mubr.msk.bf16.gmra.mrb[36].mxu1 %vm1150_vm1, %v5152_v41  ;;  %v771_v29 = vsel %vm4595_vm4, %v766_v32, %v5053_v60  ;;  %v5163_v16 = vrot.slane %v858_v12, 5  ;;  %v5165_v6 = vrot.slane %v864_v44, 5  ;;  %v5167_v58 = vcombine.low %v246_v24, %v247_v46 }
  0x7c   : > { %v781_v13 = vsel %vm4595_vm4, %v776_v55, %v780_v35  ;;  %v5172_v37 = vrot.slane %v868_v59, 4  ;;  %v789_v48 = vor.u32 %v5075_v28, %v5073_v33  ;;  %v799_v20 = vor.u32 %v5084_v2, %v5082_v7  ;;  %v242_v59 = vld [vmem:[%s4538_s22 + $0x110] sm:$0x1] }
  0x7d   : > { %5898 = vst [vmem:[#allocation16_spill] sm:$0xff] %v5167_v58  ;;  %v5178_v60 = vcombine.low %v771_v29, %v781_v13  ;;  %4115 = vmatmul.mubr.msk.bf16.gmra.mrb[44].mxu0 %vm1150_vm1, %v5167_v58  ;;  %v802_v32 = vshll.u32 %v239_v26, 16  ;;  %v879_v24 = vshrl.u32 %v249_v15, 16  ;;  %v882_v46 = vshll.u32 %v249_v15, 16  ;;  %v252_v58 = vld [vmem:[%s4538_s22 + $0x138] sm:$0xf] }
  0x7e   : > { %v790_v12 = vrot.slane %v789_v48, 4  ;;  %v800_v44 = vrot.slane %v799_v20, 4  ;;  %v888_v35 = vshll.u32 %v250_v54, 16  ;;  %v892_v55 = vshrl.u32 %v250_v54, 16 }
  0x7f   : > { %5899 = vst [vmem:[#allocation17_spill] sm:$0xff] %v5178_v60  ;;  %3978 = vmatprep.mubr.msk.bf16.mxu1 %vm1150_vm1, %v5178_v60  ;;  %v804_v33 = vrot.slane %v802_v32, 5  ;;  %v5185_v28 = vrot.slane %v879_v24, 4  ;;  %v5187_v2 = vrot.slane %v882_v46, 5  ;;  %v5189_v29 = vcombine.low %v249_v15, %v250_v54 }
  0x80   : > { %v795_v26 = vsel %vm4595_vm4, %v790_v12, %v5082_v7  ;;  %v5194_v20 = vrot.slane %v888_v35, 5  ;;  %v5196_v13 = vrot.slane %v892_v55, 4  ;;  %v813_v48 = vor.u32 %v5107_v52, %v5099_v62  ;;  %v253_v7 = vld [vmem:[%s4538_s22 + $0x13c] sm:$0xf] }
  0x81   : > { %5900 = vst [vmem:[#allocation18_spill] sm:$0xff] %v5189_v29  ;;  %v805_v32 = vsel %vm4595_vm4, %v800_v44, %v804_v33  ;;  %4118 = vmatprep.mubr.msk.bf16.mxu0 %vm1150_vm1, %v5189_v29  ;;  %v823_v15 = vor.u32 %v5116_v0, %v5109_v18  ;;  %v826_v54 = vshll.u32 %v242_v59, 16  ;;  %v903_v24 = vshrl.u32 %v252_v58, 16  ;;  %v245_v52 = vld [vmem:[%s4538_s22 + $0x11c] sm:$0x1] }
  0x82   : > { %v5208_v46 = vcombine.low %v795_v26, %v805_v32  ;;  %v814_v12 = vrot.slane %v813_v48, 4  ;;  %v906_v35 = vshll.u32 %v252_v58, 16  ;;  %v912_v62 = vshll.u32 %v253_v7, 16  ;;  %v255_v33 = vld [vmem:[%s4538_s22 + $0x144] sm:$0xf] }
  0x83   : > { %v824_v55 = vrot.slane %v823_v15, 4  ;;  %v828_v60 = vrot.slane %v826_v54, 5  ;;  %v5211_v41 = vrot.slane %v903_v24, 4  ;;  %v916_v44 = vshrl.u32 %v253_v7, 16  ;;  %v256_v32 = vld [vmem:[%s4538_s22 + $0x148] sm:$0xf] }
  0x84   : > { %5901 = vst [vmem:[#allocation19_spill] sm:$0xff] %v5208_v46  ;;  %3979 = vmatmul.mubr.msk.bf16.gmra.mrb[40].mxu1 %vm1150_vm1, %v5208_v46  ;;  %v819_v0 = vsel %vm4595_vm4, %v814_v12, %v5109_v18  ;;  %v5219_v59 = vrot.slane %v906_v35, 5  ;;  %v5221_v26 = vrot.slane %v912_v62, 5  ;;  %v5223_v48 = vcombine.low %v252_v58, %v253_v7 }
  0x85   : > { %v829_v15 = vsel %vm4595_vm4, %v824_v55, %v828_v60  ;;  %v5228_v54 = vrot.slane %v916_v44, 4  ;;  %v837_v24 = vor.u32 %v5131_v25, %v5129_v63  ;;  %v847_v29 = vor.u32 %v5140_v19, %v5138_v43  ;;  %v248_v44 = vld [vmem:[%s4538_s22 + $0x128] sm:$0x1] }
  0x86   : > { %5902 = vst [vmem:[#allocation20_spill] sm:$0xff] %v5223_v48  ;;  %v5234_v18 = vcombine.low %v819_v0, %v829_v15  ;;  %4119 = vmatmul.mubr.msk.bf16.gmra.mrb[48].mxu0 %vm1150_vm1, %v5223_v48  ;;  %v850_v12 = vshll.u32 %v245_v52, 16  ;;  %v927_v58 = vshrl.u32 %v255_v33, 16  ;;  %v930_v7 = vshll.u32 %v255_v33, 16  ;;  %v258_v48 = vld [vmem:[%s4538_s22 + $0x150] sm:$0xf] }
  0x87   : > { %v838_v35 = vrot.slane %v837_v24, 4  ;;  %v848_v62 = vrot.slane %v847_v29, 4  ;;  %v936_v60 = vshll.u32 %v256_v32, 16  ;;  %v940_v55 = vshrl.u32 %v256_v32, 16 }
  0x88   : > { %5903 = vst [vmem:[#allocation21_spill] sm:$0xff] %v5234_v18  ;;  %3982 = vmatprep.mubr.msk.bf16.mxu1 %vm1150_vm1, %v5234_v18  ;;  %v852_v63 = vrot.slane %v850_v12, 5  ;;  %v5241_v25 = vrot.slane %v927_v58, 4  ;;  %v5243_v19 = vrot.slane %v930_v7, 5  ;;  %v5245_v0 = vcombine.low %v255_v33, %v256_v32 }
  0x89   : > { %v843_v52 = vsel %vm4595_vm4, %v838_v35, %v5138_v43  ;;  %v5250_v29 = vrot.slane %v936_v60, 5  ;;  %v5252_v15 = vrot.slane %v940_v55, 4  ;;  %v861_v24 = vor.u32 %v5163_v16, %v5155_v17  ;;  %v259_v43 = vld [vmem:[%s4538_s22 + $0x154] sm:$0xf] }
  0x8a   : > { %5904 = vst [vmem:[#allocation22_spill] sm:$0xff] %v5245_v0  ;;  %v853_v12 = vsel %vm4595_vm4, %v848_v62, %v852_v63  ;;  %4122 = vmatprep.mubr.msk.bf16.mxu0 %vm1150_vm1, %v5245_v0  ;;  %v871_v33 = vor.u32 %v5172_v37, %v5165_v6  ;;  %v874_v32 = vshll.u32 %v248_v44, 16  ;;  %v951_v58 = vshrl.u32 %v258_v48, 16  ;;  %v251_v16 = vld [vmem:[%s4538_s22 + $0x134] sm:$0x1] }
  0x8b   : > { %v5264_v7 = vcombine.low %v843_v52, %v853_v12  ;;  %v862_v35 = vrot.slane %v861_v24, 4  ;;  %v954_v60 = vshll.u32 %v258_v48, 16  ;;  %v960_v17 = vshll.u32 %v259_v43, 16  ;;  %v261_v63 = vld [vmem:[%s4538_s22 + $0x15c] sm:$0xf] }
  0x8c   : > { %v872_v55 = vrot.slane %v871_v33, 4  ;;  %v876_v18 = vrot.slane %v874_v32, 5  ;;  %v5267_v46 = vrot.slane %v951_v58, 4  ;;  %v964_v62 = vshrl.u32 %v259_v43, 16  ;;  %v262_v12 = vld [vmem:[%s4538_s22 + $0x160] sm:$0xf] }
  0x8d   : > { %5905 = vst [vmem:[#allocation23_spill] sm:$0xff] %v5264_v7  ;;  %3983 = vmatmul.mubr.msk.bf16.gmra.mrb[44].mxu1 %vm1150_vm1, %v5264_v7  ;;  %v867_v37 = vsel %vm4595_vm4, %v862_v35, %v5165_v6  ;;  %v5275_v44 = vrot.slane %v954_v60, 5  ;;  %v5277_v52 = vrot.slane %v960_v17, 5  ;;  %v5279_v24 = vcombine.low %v258_v48, %v259_v43 }
  0x8e   : > { %v877_v33 = vsel %vm4595_vm4, %v872_v55, %v876_v18  ;;  %v5284_v32 = vrot.slane %v964_v62, 4  ;;  %v885_v58 = vor.u32 %v5187_v2, %v5185_v28  ;;  %v895_v0 = vor.u32 %v5196_v13, %v5194_v20  ;;  %v254_v62 = vld [vmem:[%s4538_s22 + $0x140] sm:$0x1] }
  0x8f   : > { %5906 = vst [vmem:[#allocation24_spill] sm:$0xff] %v5279_v24  ;;  %v5290_v6 = vcombine.low %v867_v37, %v877_v33  ;;  %4123 = vmatmul.mubr.msk.bf16.gmra.mrb[52].mxu0 %vm1150_vm1, %v5279_v24  ;;  %v898_v35 = vshll.u32 %v251_v16, 16  ;;  %v975_v48 = vshrl.u32 %v261_v63, 16  ;;  %v978_v43 = vshll.u32 %v261_v63, 16  ;;  %v264_v24 = vld [vmem:[%s4538_s22 + $0x168] sm:$0xf] }
  0x90   : > { %v886_v60 = vrot.slane %v885_v58, 4  ;;  %v896_v17 = vrot.slane %v895_v0, 4  ;;  %v984_v18 = vshll.u32 %v262_v12, 16  ;;  %v988_v55 = vshrl.u32 %v262_v12, 16 }
  0x91   : > { %5907 = vst [vmem:[#allocation25_spill] sm:$0xff] %v5290_v6  ;;  %3986 = vmatprep.mubr.msk.bf16.mxu1 %vm1150_vm1, %v5290_v6  ;;  %v900_v28 = vrot.slane %v898_v35, 5  ;;  %v5297_v2 = vrot.slane %v975_v48, 4  ;;  %v5299_v13 = vrot.slane %v978_v43, 5  ;;  %v5301_v37 = vcombine.low %v261_v63, %v262_v12 }
  0x92   : > { %v891_v16 = vsel %vm4595_vm4, %v886_v60, %v5194_v20  ;;  %v5306_v0 = vrot.slane %v984_v18, 5  ;;  %v5308_v33 = vrot.slane %v988_v55, 4  ;;  %v909_v58 = vor.u32 %v5219_v59, %v5211_v41  ;;  %v265_v20 = vld [vmem:[%s4538_s22 + $0x16c] sm:$0xf] }
  0x93   : > { %5908 = vst [vmem:[#allocation26_spill] sm:$0xff] %v5301_v37  ;;  %v901_v35 = vsel %vm4595_vm4, %v896_v17, %v900_v28  ;;  %4126 = vmatprep.mubr.msk.bf16.mxu0 %vm1150_vm1, %v5301_v37  ;;  %v919_v63 = vor.u32 %v5228_v54, %v5221_v26  ;;  %v922_v12 = vshll.u32 %v254_v62, 16  ;;  %v999_v48 = vshrl.u32 %v264_v24, 16  ;;  %v257_v59 = vld [vmem:[%s4538_s22 + $0x14c] sm:$0x1] }
  0x94   : > { %v5320_v43 = vcombine.low %v891_v16, %v901_v35  ;;  %v910_v60 = vrot.slane %v909_v58, 4  ;;  %v1002_v18 = vshll.u32 %v264_v24, 16  ;;  %v1008_v41 = vshll.u32 %v265_v20, 16  ;;  %v267_v37 = vld [vmem:[%s4538_s22 + $0x174] sm:$0xf] }
  0x95   : > { %v920_v55 = vrot.slane %v919_v63, 4  ;;  %v924_v6 = vrot.slane %v922_v12, 5  ;;  %v5323_v17 = vrot.slane %v999_v48, 4  ;;  %v1012_v28 = vshrl.u32 %v265_v20, 16  ;;  %v268_v35 = vld [vmem:[%s4538_s22 + $0x178] sm:$0xf] }
  0x96   : > { %5909 = vst [vmem:[#allocation27_spill] sm:$0xff] %v5320_v43  ;;  %3987 = vmatmul.mubr.msk.bf16.gmra.mrb[48].mxu1 %vm1150_vm1, %v5320_v43  ;;  %v915_v54 = vsel %vm4595_vm4, %v910_v60, %v5221_v26  ;;  %v5331_v62 = vrot.slane %v1002_v18, 5  ;;  %v5333_v16 = vrot.slane %v1008_v41, 5  ;;  %v5335_v58 = vcombine.low %v264_v24, %v265_v20  ;;  %v260_v26 = vld [vmem:[%s4538_s22 + $0x158] sm:$0x1] }
  0x97   : > { %v925_v63 = vsel %vm4595_vm4, %v920_v55, %v924_v6  ;;  %v5340_v12 = vrot.slane %v1012_v28, 4  ;;  %v933_v48 = vor.u32 %v5243_v19, %v5241_v25  ;;  %v943_v43 = vor.u32 %v5252_v15, %v5250_v29  ;;  %v270_v41 = vld [vmem:[%s4538_s22 + $0x180] sm:$0xf] }
  0x98   : > { %5910 = vst [vmem:[#allocation28_spill] sm:$0xff] %v5335_v58  ;;  %v5347_v60 = vcombine.low %v915_v54, %v925_v63  ;;  %4127 = vmatmul.mubr.msk.bf16.gmra.mrb[56].mxu0 %vm1150_vm1, %v5335_v58  ;;  %v946_v24 = vshll.u32 %v257_v59, 16  ;;  %v1023_v20 = vshrl.u32 %v267_v37, 16  ;;  %v1026_v18 = vshll.u32 %v267_v37, 16 }
  0x99   : > { %v934_v7 = vrot.slane %v933_v48, 4  ;;  %v944_v6 = vrot.slane %v943_v43, 4  ;;  %v1032_v55 = vshll.u32 %v268_v35, 16  ;;  %v1036_v28 = vshrl.u32 %v268_v35, 16 }
  0x9a   : > { %5911 = vst [vmem:[#allocation29_spill] sm:$0xff] %v5347_v60  ;;  %3990 = vmatprep.mubr.msk.bf16.mxu1 %vm1150_vm1, %v5347_v60  ;;  %v948_v25 = vrot.slane %v946_v24, 5  ;;  %v1025_v19 = vrot.slane %v1023_v20, 4  ;;  %v1028_v15 = vrot.slane %v1026_v18, 5  ;;  %v5355_v54 = vcombine.low %v267_v37, %v268_v35  ;;  %v263_v60 = vld [vmem:[%s4538_s22 + $0x164] sm:$0x1] }
  0x9b   : > { %v939_v59 = vsel %vm4595_vm4, %v934_v7, %v5250_v29  ;;  %v5360_v63 = vrot.slane %v1032_v55, 5  ;;  %v1038_v48 = vrot.slane %v1036_v28, 4  ;;  %v957_v43 = vor.u32 %v5275_v44, %v5267_v46 }
  0x9c   : > { %v949_v58 = vsel %vm4595_vm4, %v944_v6, %v948_v25  ;;  %4130 = vmatprep.mubr.msk.bf16.mxu0 %vm1150_vm1, %v5355_v54  ;;  %v967_v37 = vor.u32 %v5284_v32, %v5277_v52  ;;  %v970_v35 = vshll.u32 %v260_v26, 16  ;;  %v3603_v24 = vcombine.low %v270_v41, %v271_v5  ;;  %v266_v25 = vld [vmem:[%s4538_s22 + $0x170] sm:$0x1] }
  0x9d   : > { %v5370_v29 = vcombine.low %v939_v59, %v949_v58  ;;  %v958_v7 = vrot.slane %v957_v43, 4  ;;  %v2466_v20 = vshrl.u32 %v270_v41, 16  ;;  %v2469_v18 = vshll.u32 %v270_v41, 16 }
  0x9e   : > { %v968_v55 = vrot.slane %v967_v37, 4  ;;  %v972_v28 = vrot.slane %v970_v35, 5  ;;  %v2475_v46 = vshll.u32 %v271_v5, 16  ;;  %v2479_v44 = vshrl.u32 %v271_v5, 16 }
  0x9f   : > { %3991 = vmatmul.mubr.msk.bf16.gmra.mrb[52].mxu1 %vm1150_vm1, %v5370_v29  ;;  %v963_v32 = vsel %vm4595_vm4, %v958_v7, %v5277_v52  ;;  %v2468_v26 = vrot.slane %v2466_v20, 4  ;;  %v2471_v6 = vrot.slane %v2469_v18, 5  ;;  %v981_v58 = vor.u32 %v5299_v13, %v5297_v2  ;;  %v269_v13 = vld [vmem:[%s4538_s22 + $0x17c] sm:$0x1] }
  0xa0   : > { %v973_v41 = vsel %vm4595_vm4, %v968_v55, %v972_v28  ;;  %4131 = vmatmul.mubr.msk.bf16.gmra.mrb[60].mxu0 %vm1150_vm1, %v3603_v24  ;;  %v2477_v5 = vrot.slane %v2475_v46, 5  ;;  %v2481_v59 = vrot.slane %v2479_v44, 4  ;;  %v991_v43 = vor.u32 %v5308_v33, %v5306_v0  ;;  %v272_v44 = vld [vmem:[%s4538_s22 + $0x188] sm:$0x1] }
  0xa1   : > { %v5386_v37 = vcombine.low %v963_v32, %v973_v41  ;;  %v982_v35 = vrot.slane %v981_v58, 4  ;;  %v994_v52 = vshll.u32 %v263_v60, 16  ;;  %4136 = vmatprep.mubr.msk.bf16.mxu0 %vm1150_vm1, %v4643_v38  ;;  %v1005_v2 = vor.u32 %v5331_v62, %v5323_v17 }
  0xa2   : > { %v992_v7 = vrot.slane %v991_v43, 4  ;;  %v1015_v24 = vor.u32 %v5340_v12, %v5333_v16  ;;  %v1018_v20 = vshll.u32 %v266_v25, 16  ;;  %v1029_v18 = vor.u32 %v1028_v15, %v1025_v19 }
  0xa3   : > { %3994 = vmatprep.mubr.msk.bf16.mxu1 %vm1150_vm1, %v5386_v37  ;;  %v987_v33 = vsel %vm4595_vm4, %v982_v35, %v5306_v0  ;;  %v996_v60 = vrot.slane %v994_v52, 5  ;;  %v1006_v38 = vrot.slane %v1005_v2, 4  ;;  %v1039_v55 = vor.u32 %v1038_v48, %v5360_v63 }
  0xa4   : > { %v1016_v28 = vrot.slane %v1015_v24, 4  ;;  %v1020_v17 = vrot.slane %v1018_v20, 5  ;;  %v1030_v62 = vrot.slane %v1029_v18, 4  ;;  %v1042_v46 = vshll.u32 %v269_v13, 16  ;;  %v4458_v13 = vld [vmem:[%s4538_s22] sm:$0xf] }
  0xa5   : > { %v997_v12 = vsel %vm4595_vm4, %v992_v7, %v996_v60  ;;  %v1011_v19 = vsel %vm4595_vm4, %v1006_v38, %v5333_v16  ;;  %v1040_v15 = vrot.slane %v1039_v55, 4  ;;  %v2472_v25 = vor.u32 %v2471_v6, %v2468_v26  ;;  %v4459_v7 = vld [vmem:[%s4538_s22 + $0x4] sm:$0xf] }
  0xa6   : > { %v5407_v32 = vcombine.low %v987_v33, %v997_v12  ;;  %v1021_v0 = vsel %vm4595_vm4, %v1016_v28, %v1020_v17  ;;  %v1044_v58 = vrot.slane %v1042_v46, 5  ;;  %v2482_v41 = vor.u32 %v2481_v59, %v2477_v5 }
  0xa7   : > { %v5411_v48 = vcombine.low %v1011_v19, %v1021_v0  ;;  %v2485_v43 = vshll.u32 %v272_v44, 16  ;;  %v1035_v16 = vsel %vm4595_vm4, %v1030_v62, %v5360_v63  ;;  %v2473_v6 = vrot.slane %v2472_v25, 4 }
  0xa8   : > { %3995 = vmatmul.mubr.msk.bf16.gmra.mrb[56].mxu1 %vm1150_vm1, %v5407_v32  ;;  %4137 = vmatmul.mubr.msk.bf16.vlgmr.msra.gmra.mrb[0].mxu0 %vm1150_vm1, %v4676_v3  ;;  %v1045_v26 = vsel %vm4595_vm4, %v1040_v15, %v1044_v58  ;;  %v2483_v59 = vrot.slane %v2482_v41, 4  ;;  %v3536_v24 = vcombine.low %v4458_v13, %v4459_v7 }
  0xa9   : > { %3998 = vmatprep.mubr.msk.bf16.mxu1 %vm1150_vm1, %v5411_v48  ;;  %4140 = vmatprep.mubr.msk.bf16.mxu0 %vm1150_vm1, %v4704_v31  ;;  %v2487_v35 = vrot.slane %v2485_v43, 5  ;;  %v2478_v52 = vsel %vm4595_vm4, %v2473_v6, %v2477_v5  ;;  %v3502_v2 = vcombine.low %v1035_v16, %v1045_v26  ;;  %v5920_v31 = vld [vmem:[#allocation19_spill] sm:$0xff] }
  0xab   : > { %v2488_v3 = vsel %vm4595_vm4, %v2483_v59, %v2487_v35 }
  0xac   : > { %v3639_v63 = vcombine.low %v2478_v52, %v2488_v3 }
  0xb0   : > { %3999 = vmatmul.mubr.msk.bf16.gmra.mrb[60].mxu1 %vm1150_vm1, %v3502_v2  ;;  %4141 = vmatmul.mubr.msk.bf16.gmra.mrb[4].mxu0 %vm1150_vm1, %v4730_v1  ;;  %v5922_v1 = vld [vmem:[#allocation21_spill] sm:$0xff] }
  0xb1   : > { %4004 = vmatprep.mubr.msk.bf16.mxu1 %vm1150_vm1, %v3536_v24  ;;  %4144 = vmatprep.mubr.msk.bf16.mxu0 %vm1150_vm1, %v4760_v27  ;;  %v5924_v27 = vld [vmem:[#allocation23_spill] sm:$0xff] }
  0xb8   : > { %4005 = vmatmul.mubr.msk.bf16.vlgmr.msra.gmra.mrb[0].mxu1 %vm1150_vm1, %v4553_v14  ;;  %4145 = vmatmul.mubr.msk.bf16.gmra.mrb[8].mxu0 %vm1150_vm1, %v4786_v57  ;;  %v5912_v14 = vld [vmem:[#allocation11_spill] sm:$0xff]  ;;  %v5926_v57 = vld [vmem:[#allocation25_spill] sm:$0xff] }
  0xb9   : > { %4008 = vmatprep.mubr.msk.bf16.mxu1 %vm1150_vm1, %v4568_v30  ;;  %4148 = vmatprep.mubr.msk.bf16.mxu0 %vm1150_vm1, %v4816_v4  ;;  %v5913_v30 = vld [vmem:[#allocation2_spill] sm:$0xff]  ;;  %v5928_v4 = vld [vmem:[#allocation27_spill] sm:$0xff] }
  0xc0   : > { %4009 = vmatmul.mubr.msk.bf16.gmra.mrb[4].mxu1 %vm1150_vm1, %v4581_v42  ;;  %4149 = vmatmul.mubr.msk.bf16.gmra.mrb[12].mxu0 %vm1150_vm1, %v4842_v49  ;;  %v5914_v42 = vld [vmem:[#allocation13_spill] sm:$0xff] }
  0xc1   : > { %4012 = vmatprep.mubr.msk.bf16.mxu1 %vm1150_vm1, %v4607_v8  ;;  %4152 = vmatprep.mubr.msk.bf16.mxu0 %vm1150_vm1, %v4872_v34  ;;  %v5916_v8 = vld [vmem:[#allocation15_spill] sm:$0xff]  ;;  %v5930_v49 = vld [vmem:[#allocation29_spill] sm:$0xff]  ;;  %v5931_v34 = vld [vmem:[#allocation12_spill] sm:$0xff] }
  0xc8   : > { %4013 = vmatmul.mubr.msk.bf16.gmra.mrb[8].mxu1 %vm1150_vm1, %v4622_v23  ;;  %4153 = vmatmul.mubr.msk.bf16.gmra.mrb[16].mxu0 %vm1150_vm1, %v4898_v39  ;;  %v5917_v23 = vld [vmem:[#allocation4_spill] sm:$0xff]  ;;  %v5932_v39 = vld [vmem:[#allocation14_spill] sm:$0xff] }
  0xc9   : > { %4016 = vmatprep.mubr.msk.bf16.mxu1 %vm1150_vm1, %v4653_v56  ;;  %4156 = vmatprep.mubr.msk.bf16.mxu0 %vm1150_vm1, %v4928_v51  ;;  %v5918_v56 = vld [vmem:[#allocation17_spill] sm:$0xff]  ;;  %v5933_v51 = vld [vmem:[#allocation16_spill] sm:$0xff] }
  0xd0   : > { %4017 = vmatmul.mubr.msk.bf16.gmra.mrb[12].mxu1 %vm1150_vm1, %v4685_v45  ;;  %4157 = vmatmul.mubr.msk.bf16.gmra.mrb[20].mxu0 %vm1150_vm1, %v4954_v40  ;;  %v5919_v45 = vld [vmem:[#allocation5_spill] sm:$0xff]  ;;  %v5934_v40 = vld [vmem:[#allocation18_spill] sm:$0xff] }
  0xd1   : > { %4020 = vmatprep.mubr.msk.bf16.mxu1 %vm1150_vm1, %v4719_v50  ;;  %4160 = vmatprep.mubr.msk.bf16.mxu0 %vm1150_vm1, %v4984_v36  ;;  %v5921_v50 = vld [vmem:[#allocation6_spill] sm:$0xff]  ;;  %v5935_v36 = vld [vmem:[#allocation20_spill] sm:$0xff] }
  0xd8   : > { %4021 = vmatmul.mubr.msk.bf16.gmra.mrb[16].mxu1 %vm1150_vm1, %v4741_v10  ;;  %4161 = vmatmul.mubr.msk.bf16.gmra.mrb[24].mxu0 %vm1150_vm1, %v5010_v61  ;;  %v5923_v10 = vld [vmem:[#allocation7_spill] sm:$0xff]  ;;  %v5936_v61 = vld [vmem:[#allocation22_spill] sm:$0xff] }
  0xd9   : > { %4024 = vmatprep.mubr.msk.bf16.mxu1 %vm1150_vm1, %v4775_v47  ;;  %4164 = vmatprep.mubr.msk.bf16.mxu0 %vm1150_vm1, %v5040_v21  ;;  %v5925_v47 = vld [vmem:[#allocation8_spill] sm:$0xff] }
  0xda   : > { %v5937_v21 = vld [vmem:[#allocation24_spill] sm:$0xff] }
  0xe0   : > { %4025 = vmatmul.mubr.msk.bf16.gmra.mrb[20].mxu1 %vm1150_vm1, %v4797_v9  ;;  %4165 = vmatmul.mubr.msk.bf16.gmra.mrb[28].mxu0 %vm1150_vm1, %v5066_v22  ;;  %v5927_v9 = vld [vmem:[#allocation9_spill] sm:$0xff]  ;;  %v5938_v22 = vld [vmem:[#allocation26_spill] sm:$0xff] }
  0xe1   : > { %4028 = vmatprep.mubr.msk.bf16.mxu1 %vm1150_vm1, %v4831_v11  ;;  %4168 = vmatprep.mubr.msk.bf16.mxu0 %vm1150_vm1, %v5912_v14  ;;  %v5929_v11 = vld [vmem:[#allocation10_spill] sm:$0xff] }
  0xe8   : > { %4029 = vmatmul.mubr.msk.bf16.gmra.mrb[24].mxu1 %vm1150_vm1, %v5913_v30  ;;  %4169 = vmatmul.mubr.msk.bf16.gmra.mrb[32].mxu0 %vm1150_vm1, %v5914_v42 }
  0xe9   : > { %4032 = vmatprep.mubr.msk.bf16.mxu1 %vm1150_vm1, %v5915_v53  ;;  %4172 = vmatprep.mubr.msk.bf16.mxu0 %vm1150_vm1, %v5916_v8 }
  0xf0   : > { %4033 = vmatmul.mubr.msk.bf16.gmra.mrb[28].mxu1 %vm1150_vm1, %v5917_v23  ;;  %4173 = vmatmul.mubr.msk.bf16.gmra.mrb[36].mxu0 %vm1150_vm1, %v5918_v56 }
  0xf1   : > { %4036 = vmatprep.mubr.msk.bf16.mxu1 %vm1150_vm1, %v5919_v45  ;;  %4176 = vmatprep.mubr.msk.bf16.mxu0 %vm1150_vm1, %v5920_v31 }
  0xf8   : > { %4037 = vmatmul.mubr.msk.bf16.gmra.mrb[32].mxu1 %vm1150_vm1, %v5921_v50  ;;  %4177 = vmatmul.mubr.msk.bf16.gmra.mrb[40].mxu0 %vm1150_vm1, %v5922_v1 }
  0xf9   : > { %4040 = vmatprep.mubr.msk.bf16.mxu1 %vm1150_vm1, %v5923_v10  ;;  %4180 = vmatprep.mubr.msk.bf16.mxu0 %vm1150_vm1, %v5924_v27 }
 0x100   : > { %4041 = vmatmul.mubr.msk.bf16.gmra.mrb[36].mxu1 %vm1150_vm1, %v5925_v47  ;;  %4181 = vmatmul.mubr.msk.bf16.gmra.mrb[44].mxu0 %vm1150_vm1, %v5926_v57 }
 0x101   : > { %4044 = vmatprep.mubr.msk.bf16.mxu1 %vm1150_vm1, %v5927_v9  ;;  %4184 = vmatprep.mubr.msk.bf16.mxu0 %vm1150_vm1, %v5928_v4 }
 0x108   : > { %4045 = vmatmul.mubr.msk.bf16.gmra.mrb[40].mxu1 %vm1150_vm1, %v5929_v11  ;;  %4185 = vmatmul.mubr.msk.bf16.gmra.mrb[48].mxu0 %vm1150_vm1, %v5930_v49 }
 0x109   : > { %4048 = vmatprep.mubr.msk.bf16.mxu1 %vm1150_vm1, %v5931_v34  ;;  %4188 = vmatprep.mubr.msk.bf16.mxu0 %vm1150_vm1, %v5370_v29  ;;  %v5939_v29 = vld [vmem:[#allocation28_spill] sm:$0xff] }
 0x110   : > { %4049 = vmatmul.mubr.msk.bf16.gmra.mrb[44].mxu1 %vm1150_vm1, %v5932_v39  ;;  %4189 = vmatmul.mubr.msk.bf16.gmra.mrb[52].mxu0 %vm1150_vm1, %v5386_v37 }
 0x111   : > { %4052 = vmatprep.mubr.msk.bf16.mxu1 %vm1150_vm1, %v5933_v51  ;;  %4192 = vmatprep.mubr.msk.bf16.mxu0 %vm1150_vm1, %v5407_v32 }
 0x118   : > { %4053 = vmatmul.mubr.msk.bf16.gmra.mrb[48].mxu1 %vm1150_vm1, %v5934_v40  ;;  %4193 = vmatmul.mubr.msk.bf16.gmra.mrb[56].mxu0 %vm1150_vm1, %v5411_v48 }
 0x119   : > { %4056 = vmatprep.mubr.msk.bf16.mxu1 %vm1150_vm1, %v5935_v36  ;;  %4196 = vmatprep.mubr.msk.bf16.mxu0 %vm1150_vm1, %v3502_v2 }
 0x120   : > { %4057 = vmatmul.mubr.msk.bf16.gmra.mrb[52].mxu1 %vm1150_vm1, %v5936_v61  ;;  %4197 = vmatmul.mubr.msk.bf16.gmra.mrb[60].mxu0 %vm1150_vm1, %v3639_v63 }
 0x121   : > { %4060 = vmatprep.mubr.msk.bf16.mxu1 %vm1150_vm1, %v5937_v21 }
 0x128   : > { %4061 = vmatmul.mubr.msk.bf16.gmra.mrb[56].mxu1 %vm1150_vm1, %v5938_v22 }
 0x129   : > { %4064 = vmatprep.mubr.msk.bf16.mxu1 %vm1150_vm1, %v5939_v29 }
 0x130   : > { %4065 = vmatmul.mubr.msk.bf16.gmra.mrb[60].mxu1 %vm1150_vm1, %v5355_v54 }
 0x17b   : > { %v4138_v5 = vpop.f32.mrb[0].mxu0 }
 0x17c   : > { %v2540_v37 = vpop.f32.mrb[1].mxu0 }
 0x17d   : > { %v4139_v20 = vpop.f32.mrb[2].mxu0 }
 0x17e   : > { %v2543_v18 = vpop.f32.mrb[3].mxu0 }
 0x183   : > { %v4142_v33 = vpop.f32.mrb[4].mxu0 }
 0x184   : > { %v2556_v60 = vpop.f32.mrb[5].mxu0 }
 0x185   : > { %v4143_v38 = vpop.f32.mrb[6].mxu0 }
 0x186   : > { %v2559_v55 = vpop.f32.mrb[7].mxu0 }
 0x18b   : > { %v4006_v28 = vpop.f32.mrb[0].mxu1  ;;  %v5552_v17 = vpop.f32.mrb[8].mxu0 }
 0x18c   : > { %v4200_v62 = vadd.f32 %v4138_v5, %v4006_v28  ;;  %v1838_v46 = vpop.f32.mrb[1].mxu1  ;;  %v5554_v44 = vpop.f32.mrb[9].mxu0 }
 0x18d   : > { %v4201_v12 = vadd.f32 %v2540_v37, %v1838_v46  ;;  %v4007_v19 = vpop.f32.mrb[2].mxu1  ;;  %v5557_v15 = vpop.f32.mrb[10].mxu0 }
 0x18e   : > { %vm2861_vm5 = vcmp.gt.f32.partialorder %v4200_v62, 0.0  ;;  %v2925_v54 = vmul.f32 0.2, %v4200_v62  ;;  %v4202_v32 = vadd.f32 %v4139_v20, %v4007_v19  ;;  %v1841_v0 = vpop.f32.mrb[3].mxu1  ;;  %v5559_v58 = vpop.f32.mrb[11].mxu0 }
 0x18f   : > { %vm2859_vm6 = vcmp.gt.f32.partialorder %v4201_v12, 0.0  ;;  %v2923_v48 = vmul.f32 0.2, %v4201_v12  ;;  %v4203_v25 = vadd.f32 %v2543_v18, %v1841_v0 }
 0x190   : > { %v2989_v41 = vsel %vm2861_vm5, %v4200_v62, %v2925_v54  ;;  %vm2862_vm8 = vcmp.gt.f32.partialorder %v4202_v32, 0.0  ;;  %v2926_v43 = vmul.f32 0.2, %v4202_v32 }
 0x191   : > { %v3742_v16 = vpack.c.bf16 %v2989_v41, %v2989_v41  ;;  %v2987_v26 = vsel %vm2859_vm6, %v4201_v12, %v2923_v48  ;;  %vm2860_vm9 = vcmp.gt.f32.partialorder %v4203_v25, 0.0  ;;  %v2924_v6 = vmul.f32 0.2, %v4203_v25 }
 0x192   : > { %v3740_v59 = vpack.c.bf16 %v2987_v26, %v2987_v26  ;;  %v2990_v35 = vsel %vm2862_vm8, %v4202_v32, %v2926_v43 }
 0x193   : > { %3310 = vst.msk [vmem:[%s5564_s28 + $0x8] sm:$0xf] %vm3307_vm7, %v3742_v16  ;;  %v3743_v52 = vpack.c.bf16 %v2990_v35, %v2990_v35  ;;  %v2988_v3 = vsel %vm2860_vm9, %v4203_v25, %v2924_v6  ;;  %v4010_v2 = vpop.f32.mrb[4].mxu1  ;;  %v5568_v63 = vpop.f32.mrb[12].mxu0 }
 0x194   : > { %3308 = vst.msk [vmem:[%s5564_s28] sm:$0xf] %vm3307_vm7, %v3740_v59  ;;  %v3741_v13 = vpack.c.bf16 %v2988_v3, %v2988_v3  ;;  %v4204_v7 = vadd.f32 %v4142_v33, %v4010_v2  ;;  %v1854_v24 = vpop.f32.mrb[5].mxu1  ;;  %v5572_v14 = vpop.f32.mrb[13].mxu0 }
 0x195   : > { %3311 = vst.msk [vmem:[%s5564_s28 + $0xc] sm:$0xf] %vm3307_vm7, %v3743_v52  ;;  %v4205_v30 = vadd.f32 %v2556_v60, %v1854_v24  ;;  %v4011_v42 = vpop.f32.mrb[6].mxu1  ;;  %v5576_v53 = vpop.f32.mrb[14].mxu0 }
 0x196   : > { %3309 = vst.msk [vmem:[%s5564_s28 + $0x4] sm:$0xf] %vm3307_vm7, %v3741_v13  ;;  %vm2865_vm10 = vcmp.gt.f32.partialorder %v4204_v7, 0.0  ;;  %v2929_v8 = vmul.f32 0.2, %v4204_v7  ;;  %v4206_v23 = vadd.f32 %v4143_v38, %v4011_v42  ;;  %v1857_v56 = vpop.f32.mrb[7].mxu1 }
 0x197   : > { %v5580_v45 = vpop.f32.mrb[15].mxu0  ;;  %vm2863_vm11 = vcmp.gt.f32.partialorder %v4205_v30, 0.0  ;;  %v2927_v31 = vmul.f32 0.2, %v4205_v30  ;;  %v4207_v50 = vadd.f32 %v2559_v55, %v1857_v56 }
 0x198   : > { %v2993_v1 = vsel %vm2865_vm10, %v4204_v7, %v2929_v8  ;;  %vm2866_vm12 = vcmp.gt.f32.partialorder %v4206_v23, 0.0  ;;  %v2930_v10 = vmul.f32 0.2, %v4206_v23 }
 0x199   : > { %v3746_v27 = vpack.c.bf16 %v2993_v1, %v2993_v1  ;;  %v2991_v47 = vsel %vm2863_vm11, %v4205_v30, %v2927_v31  ;;  %vm2864_vm13 = vcmp.gt.f32.partialorder %v4207_v50, 0.0  ;;  %v2928_v57 = vmul.f32 0.2, %v4207_v50 }
 0x19a   : > { %v3744_v9 = vpack.c.bf16 %v2991_v47, %v2991_v47  ;;  %v2994_v4 = vsel %vm2866_vm12, %v4206_v23, %v2930_v10 }
 0x19b   : > { %3314 = vst.msk [vmem:[%s5564_s28 + $0x18] sm:$0xf] %vm3307_vm7, %v3746_v27  ;;  %v3747_v11 = vpack.c.bf16 %v2994_v4, %v2994_v4  ;;  %v2992_v49 = vsel %vm2864_vm13, %v4207_v50, %v2928_v57  ;;  %v4014_v34 = vpop.f32.mrb[8].mxu1  ;;  %v5584_v39 = vpop.f32.mrb[16].mxu0 }
 0x19c   : > { %3312 = vst.msk [vmem:[%s5564_s28 + $0x10] sm:$0xf] %vm3307_vm7, %v3744_v9  ;;  %v3745_v51 = vpack.c.bf16 %v2992_v49, %v2992_v49  ;;  %v4208_v40 = vadd.f32 %v5552_v17, %v4014_v34  ;;  %v1870_v36 = vpop.f32.mrb[9].mxu1  ;;  %v5589_v61 = vpop.f32.mrb[17].mxu0 }
 0x19d   : > { %3315 = vst.msk [vmem:[%s5564_s28 + $0x1c] sm:$0xf] %vm3307_vm7, %v3747_v11  ;;  %v4209_v21 = vadd.f32 %v5554_v44, %v1870_v36  ;;  %v4015_v22 = vpop.f32.mrb[10].mxu1  ;;  %v5594_v29 = vpop.f32.mrb[18].mxu0 }
 0x19e   : > { %3313 = vst.msk [vmem:[%s5564_s28 + $0x14] sm:$0xf] %vm3307_vm7, %v3745_v51  ;;  %vm2869_vm14 = vcmp.gt.f32.partialorder %v4208_v40, 0.0  ;;  %v2933_v5 = vmul.f32 0.2, %v4208_v40  ;;  %v4210_v37 = vadd.f32 %v5557_v15, %v4015_v22  ;;  %v1873_v20 = vpop.f32.mrb[11].mxu1 }
 0x19f   : > { %v5599_v18 = vpop.f32.mrb[19].mxu0  ;;  %vm2867_vm15 = vcmp.gt.f32.partialorder %v4209_v21, 0.0  ;;  %v2931_v33 = vmul.f32 0.2, %v4209_v21  ;;  %v4211_v60 = vadd.f32 %v5559_v58, %v1873_v20 }
 0x1a0   : > { %v2997_v38 = vsel %vm2869_vm14, %v4208_v40, %v2933_v5  ;;  %vm2870_vm0 = vcmp.gt.f32.partialorder %v4210_v37, 0.0  ;;  %v2934_v55 = vmul.f32 0.2, %v4210_v37 }
 0x1a1   : > { %v3750_v28 = vpack.c.bf16 %v2997_v38, %v2997_v38  ;;  %v2995_v17 = vsel %vm2867_vm15, %v4209_v21, %v2931_v33  ;;  %vm2868_vm1 = vcmp.gt.f32.partialorder %v4211_v60, 0.0  ;;  %v2932_v62 = vmul.f32 0.2, %v4211_v60 }
 0x1a2   : > { %v3748_v46 = vpack.c.bf16 %v2995_v17, %v2995_v17  ;;  %v2998_v44 = vsel %vm2870_vm0, %v4210_v37, %v2934_v55 }
 0x1a3   : > { %3318 = vst.msk [vmem:[%s5564_s28 + $0x28] sm:$0xf] %vm3307_vm7, %v3750_v28  ;;  %v3751_v12 = vpack.c.bf16 %v2998_v44, %v2998_v44  ;;  %v2996_v19 = vsel %vm2868_vm1, %v4211_v60, %v2932_v62  ;;  %v4018_v15 = vpop.f32.mrb[12].mxu1  ;;  %v5604_v54 = vpop.f32.mrb[20].mxu0 }
 0x1a4   : > { %3316 = vst.msk [vmem:[%s5564_s28 + $0x20] sm:$0xf] %vm3307_vm7, %v3748_v46  ;;  %v3749_v32 = vpack.c.bf16 %v2996_v19, %v2996_v19  ;;  %v4212_v0 = vadd.f32 %v5568_v63, %v4018_v15  ;;  %v1886_v58 = vpop.f32.mrb[13].mxu1  ;;  %v5609_v48 = vpop.f32.mrb[21].mxu0 }
 0x1a5   : > { %3319 = vst.msk [vmem:[%s5564_s28 + $0x2c] sm:$0xf] %vm3307_vm7, %v3751_v12  ;;  %v4213_v25 = vadd.f32 %v5572_v14, %v1886_v58  ;;  %v4019_v41 = vpop.f32.mrb[14].mxu1  ;;  %v5614_v43 = vpop.f32.mrb[22].mxu0 }
 0x1a6   : > { %3317 = vst.msk [vmem:[%s5564_s28 + $0x24] sm:$0xf] %vm3307_vm7, %v3749_v32  ;;  %vm2873_vm2 = vcmp.gt.f32.partialorder %v4212_v0, 0.0  ;;  %v2937_v16 = vmul.f32 0.2, %v4212_v0  ;;  %v4214_v26 = vadd.f32 %v5576_v53, %v4019_v41  ;;  %v1889_v6 = vpop.f32.mrb[15].mxu1 }
 0x1a7   : > { %v5619_v59 = vpop.f32.mrb[23].mxu0  ;;  %vm2871_vm3 = vcmp.gt.f32.partialorder %v4213_v25, 0.0  ;;  %v2935_v35 = vmul.f32 0.2, %v4213_v25  ;;  %v4215_v52 = vadd.f32 %v5580_v45, %v1889_v6 }
 0x1a8   : > { %v3001_v3 = vsel %vm2873_vm2, %v4212_v0, %v2937_v16  ;;  %vm2874_vm4 = vcmp.gt.f32.partialorder %v4214_v26, 0.0  ;;  %v2938_v2 = vmul.f32 0.2, %v4214_v26 }
 0x1a9   : > { %v3754_v63 = vpack.c.bf16 %v3001_v3, %v3001_v3  ;;  %v2999_v13 = vsel %vm2871_vm3, %v4213_v25, %v2935_v35  ;;  %vm2872_vm5 = vcmp.gt.f32.partialorder %v4215_v52, 0.0  ;;  %v2936_v7 = vmul.f32 0.2, %v4215_v52 }
 0x1aa   : > { %v3752_v24 = vpack.c.bf16 %v2999_v13, %v2999_v13  ;;  %v3002_v14 = vsel %vm2874_vm4, %v4214_v26, %v2938_v2 }
 0x1ab   : > { %3322 = vst.msk [vmem:[%s5564_s28 + $0x38] sm:$0xf] %vm3307_vm7, %v3754_v63  ;;  %v3755_v30 = vpack.c.bf16 %v3002_v14, %v3002_v14  ;;  %v3000_v42 = vsel %vm2872_vm5, %v4215_v52, %v2936_v7  ;;  %v4022_v53 = vpop.f32.mrb[16].mxu1  ;;  %v5624_v8 = vpop.f32.mrb[24].mxu0 }
 0x1ac   : > { %3320 = vst.msk [vmem:[%s5564_s28 + $0x30] sm:$0xf] %vm3307_vm7, %v3752_v24  ;;  %v3753_v23 = vpack.c.bf16 %v3000_v42, %v3000_v42  ;;  %v4216_v56 = vadd.f32 %v5584_v39, %v4022_v53  ;;  %v1902_v45 = vpop.f32.mrb[17].mxu1  ;;  %v5629_v31 = vpop.f32.mrb[25].mxu0 }
 0x1ad   : > { %3323 = vst.msk [vmem:[%s5564_s28 + $0x3c] sm:$0xf] %vm3307_vm7, %v3755_v30  ;;  %v4217_v50 = vadd.f32 %v5589_v61, %v1902_v45  ;;  %v4023_v1 = vpop.f32.mrb[18].mxu1  ;;  %v5634_v10 = vpop.f32.mrb[26].mxu0 }
 0x1ae   : > { %3321 = vst.msk [vmem:[%s5564_s28 + $0x34] sm:$0xf] %vm3307_vm7, %v3753_v23  ;;  %vm2877_vm6 = vcmp.gt.f32.partialorder %v4216_v56, 0.0  ;;  %v2941_v27 = vmul.f32 0.2, %v4216_v56  ;;  %v4218_v47 = vadd.f32 %v5594_v29, %v4023_v1  ;;  %v1905_v57 = vpop.f32.mrb[19].mxu1 }
 0x1af   : > { %v5639_v9 = vpop.f32.mrb[27].mxu0  ;;  %vm2875_vm8 = vcmp.gt.f32.partialorder %v4217_v50, 0.0  ;;  %v2939_v4 = vmul.f32 0.2, %v4217_v50  ;;  %v4219_v11 = vadd.f32 %v5599_v18, %v1905_v57 }
 0x1b0   : > { %v3005_v49 = vsel %vm2877_vm6, %v4216_v56, %v2941_v27  ;;  %vm2878_vm9 = vcmp.gt.f32.partialorder %v4218_v47, 0.0  ;;  %v2942_v34 = vmul.f32 0.2, %v4218_v47 }
 0x1b1   : > { %v3758_v39 = vpack.c.bf16 %v3005_v49, %v3005_v49  ;;  %v3003_v51 = vsel %vm2875_vm8, %v4217_v50, %v2939_v4  ;;  %vm2876_vm10 = vcmp.gt.f32.partialorder %v4219_v11, 0.0  ;;  %v2940_v40 = vmul.f32 0.2, %v4219_v11 }
 0x1b2   : > { %v3756_v36 = vpack.c.bf16 %v3003_v51, %v3003_v51  ;;  %v3006_v61 = vsel %vm2878_vm9, %v4218_v47, %v2942_v34 }
 0x1b3   : > { %3326 = vst.msk [vmem:[%s5564_s28 + $0x48] sm:$0xf] %vm3307_vm7, %v3758_v39  ;;  %v3759_v21 = vpack.c.bf16 %v3006_v61, %v3006_v61  ;;  %v3004_v22 = vsel %vm2876_vm10, %v4219_v11, %v2940_v40  ;;  %v4026_v29 = vpop.f32.mrb[20].mxu1  ;;  %v5644_v5 = vpop.f32.mrb[28].mxu0 }
 0x1b4   : > { %3324 = vst.msk [vmem:[%s5564_s28 + $0x40] sm:$0xf] %vm3307_vm7, %v3756_v36  ;;  %v3757_v37 = vpack.c.bf16 %v3004_v22, %v3004_v22  ;;  %v4220_v20 = vadd.f32 %v5604_v54, %v4026_v29  ;;  %v1918_v18 = vpop.f32.mrb[21].mxu1  ;;  %v5649_v33 = vpop.f32.mrb[29].mxu0 }
 0x1b5   : > { %3327 = vst.msk [vmem:[%s5564_s28 + $0x4c] sm:$0xf] %vm3307_vm7, %v3759_v21  ;;  %v4221_v60 = vadd.f32 %v5609_v48, %v1918_v18  ;;  %v4027_v38 = vpop.f32.mrb[22].mxu1  ;;  %v5654_v55 = vpop.f32.mrb[30].mxu0 }
 0x1b6   : > { %3325 = vst.msk [vmem:[%s5564_s28 + $0x44] sm:$0xf] %vm3307_vm7, %v3757_v37  ;;  %vm2881_vm11 = vcmp.gt.f32.partialorder %v4220_v20, 0.0  ;;  %v2945_v28 = vmul.f32 0.2, %v4220_v20  ;;  %v4222_v17 = vadd.f32 %v5614_v43, %v4027_v38  ;;  %v1921_v62 = vpop.f32.mrb[23].mxu1 }
 0x1b7   : > { %v5659_v46 = vpop.f32.mrb[31].mxu0  ;;  %vm2879_vm12 = vcmp.gt.f32.partialorder %v4221_v60, 0.0  ;;  %v2943_v44 = vmul.f32 0.2, %v4221_v60  ;;  %v4223_v12 = vadd.f32 %v5619_v59, %v1921_v62 }
 0x1b8   : > { %v3009_v19 = vsel %vm2881_vm11, %v4220_v20, %v2945_v28  ;;  %vm2882_vm13 = vcmp.gt.f32.partialorder %v4222_v17, 0.0  ;;  %v2946_v15 = vmul.f32 0.2, %v4222_v17 }
 0x1b9   : > { %v3762_v54 = vpack.c.bf16 %v3009_v19, %v3009_v19  ;;  %v3007_v32 = vsel %vm2879_vm12, %v4221_v60, %v2943_v44  ;;  %vm2880_vm14 = vcmp.gt.f32.partialorder %v4223_v12, 0.0  ;;  %v2944_v0 = vmul.f32 0.2, %v4223_v12 }
 0x1ba   : > { %v3760_v58 = vpack.c.bf16 %v3007_v32, %v3007_v32  ;;  %v3010_v48 = vsel %vm2882_vm13, %v4222_v17, %v2946_v15 }
 0x1bb   : > { %3330 = vst.msk [vmem:[%s5564_s28 + $0x58] sm:$0xf] %vm3307_vm7, %v3762_v54  ;;  %v3763_v25 = vpack.c.bf16 %v3010_v48, %v3010_v48  ;;  %v3008_v41 = vsel %vm2880_vm14, %v4223_v12, %v2944_v0  ;;  %v4030_v43 = vpop.f32.mrb[24].mxu1  ;;  %v5664_v16 = vpop.f32.mrb[32].mxu0 }
 0x1bc   : > { %3328 = vst.msk [vmem:[%s5564_s28 + $0x50] sm:$0xf] %vm3307_vm7, %v3760_v58  ;;  %v3761_v26 = vpack.c.bf16 %v3008_v41, %v3008_v41  ;;  %v4224_v6 = vadd.f32 %v5624_v8, %v4030_v43  ;;  %v1934_v59 = vpop.f32.mrb[25].mxu1  ;;  %v5669_v35 = vpop.f32.mrb[33].mxu0 }
 0x1bd   : > { %3331 = vst.msk [vmem:[%s5564_s28 + $0x5c] sm:$0xf] %vm3307_vm7, %v3763_v25  ;;  %v4225_v52 = vadd.f32 %v5629_v31, %v1934_v59  ;;  %v4031_v3 = vpop.f32.mrb[26].mxu1  ;;  %v5674_v2 = vpop.f32.mrb[34].mxu0 }
 0x1be   : > { %3329 = vst.msk [vmem:[%s5564_s28 + $0x54] sm:$0xf] %vm3307_vm7, %v3761_v26  ;;  %vm2885_vm15 = vcmp.gt.f32.partialorder %v4224_v6, 0.0  ;;  %v2949_v63 = vmul.f32 0.2, %v4224_v6  ;;  %v4226_v13 = vadd.f32 %v5634_v10, %v4031_v3  ;;  %v1937_v7 = vpop.f32.mrb[27].mxu1 }
 0x1bf   : > { %v5679_v24 = vpop.f32.mrb[35].mxu0  ;;  %vm2883_vm0 = vcmp.gt.f32.partialorder %v4225_v52, 0.0  ;;  %v2947_v14 = vmul.f32 0.2, %v4225_v52  ;;  %v4227_v30 = vadd.f32 %v5639_v9, %v1937_v7 }
 0x1c0   : > { %v3013_v42 = vsel %vm2885_vm15, %v4224_v6, %v2949_v63  ;;  %vm2886_vm1 = vcmp.gt.f32.partialorder %v4226_v13, 0.0  ;;  %v2950_v53 = vmul.f32 0.2, %v4226_v13 }
 0x1c1   : > { %v3766_v8 = vpack.c.bf16 %v3013_v42, %v3013_v42  ;;  %v3011_v23 = vsel %vm2883_vm0, %v4225_v52, %v2947_v14  ;;  %vm2884_vm2 = vcmp.gt.f32.partialorder %v4227_v30, 0.0  ;;  %v2948_v56 = vmul.f32 0.2, %v4227_v30 }
 0x1c2   : > { %v3764_v45 = vpack.c.bf16 %v3011_v23, %v3011_v23  ;;  %v3014_v31 = vsel %vm2886_vm1, %v4226_v13, %v2950_v53 }
 0x1c3   : > { %3334 = vst.msk [vmem:[%s5564_s28 + $0x68] sm:$0xf] %vm3307_vm7, %v3766_v8  ;;  %v3767_v50 = vpack.c.bf16 %v3014_v31, %v3014_v31  ;;  %v3012_v1 = vsel %vm2884_vm2, %v4227_v30, %v2948_v56  ;;  %v4034_v10 = vpop.f32.mrb[28].mxu1  ;;  %v5684_v27 = vpop.f32.mrb[36].mxu0 }
 0x1c4   : > { %3332 = vst.msk [vmem:[%s5564_s28 + $0x60] sm:$0xf] %vm3307_vm7, %v3764_v45  ;;  %v3765_v47 = vpack.c.bf16 %v3012_v1, %v3012_v1  ;;  %v4228_v57 = vadd.f32 %v5644_v5, %v4034_v10  ;;  %v1950_v9 = vpop.f32.mrb[29].mxu1  ;;  %v5689_v4 = vpop.f32.mrb[37].mxu0 }
 0x1c5   : > { %3335 = vst.msk [vmem:[%s5564_s28 + $0x6c] sm:$0xf] %vm3307_vm7, %v3767_v50  ;;  %v4229_v11 = vadd.f32 %v5649_v33, %v1950_v9  ;;  %v4035_v49 = vpop.f32.mrb[30].mxu1  ;;  %v5694_v34 = vpop.f32.mrb[38].mxu0 }
 0x1c6   : > { %3333 = vst.msk [vmem:[%s5564_s28 + $0x64] sm:$0xf] %vm3307_vm7, %v3765_v47  ;;  %vm2889_vm3 = vcmp.gt.f32.partialorder %v4228_v57, 0.0  ;;  %v2953_v39 = vmul.f32 0.2, %v4228_v57  ;;  %v4230_v51 = vadd.f32 %v5654_v55, %v4035_v49  ;;  %v1953_v40 = vpop.f32.mrb[31].mxu1 }
 0x1c7   : > { %v5699_v36 = vpop.f32.mrb[39].mxu0  ;;  %vm2887_vm4 = vcmp.gt.f32.partialorder %v4229_v11, 0.0  ;;  %v2951_v61 = vmul.f32 0.2, %v4229_v11  ;;  %v4231_v21 = vadd.f32 %v5659_v46, %v1953_v40 }
 0x1c8   : > { %v3017_v22 = vsel %vm2889_vm3, %v4228_v57, %v2953_v39  ;;  %vm2890_vm5 = vcmp.gt.f32.partialorder %v4230_v51, 0.0  ;;  %v2954_v29 = vmul.f32 0.2, %v4230_v51 }
 0x1c9   : > { %v3770_v5 = vpack.c.bf16 %v3017_v22, %v3017_v22  ;;  %v3015_v37 = vsel %vm2887_vm4, %v4229_v11, %v2951_v61  ;;  %vm2888_vm6 = vcmp.gt.f32.partialorder %v4231_v21, 0.0  ;;  %v2952_v20 = vmul.f32 0.2, %v4231_v21 }
 0x1ca   : > { %v3768_v18 = vpack.c.bf16 %v3015_v37, %v3015_v37  ;;  %v3018_v33 = vsel %vm2890_vm5, %v4230_v51, %v2954_v29 }
 0x1cb   : > { %3338 = vst.msk [vmem:[%s5564_s28 + $0x78] sm:$0xf] %vm3307_vm7, %v3770_v5  ;;  %v3771_v60 = vpack.c.bf16 %v3018_v33, %v3018_v33  ;;  %v3016_v38 = vsel %vm2888_vm6, %v4231_v21, %v2952_v20  ;;  %v4038_v55 = vpop.f32.mrb[32].mxu1  ;;  %v5704_v28 = vpop.f32.mrb[40].mxu0 }
 0x1cc   : > { %3336 = vst.msk [vmem:[%s5564_s28 + $0x70] sm:$0xf] %vm3307_vm7, %v3768_v18  ;;  %v3769_v17 = vpack.c.bf16 %v3016_v38, %v3016_v38  ;;  %v4232_v62 = vadd.f32 %v5664_v16, %v4038_v55  ;;  %v1966_v46 = vpop.f32.mrb[33].mxu1  ;;  %v5709_v44 = vpop.f32.mrb[41].mxu0 }
 0x1cd   : > { %3339 = vst.msk [vmem:[%s5564_s28 + $0x7c] sm:$0xf] %vm3307_vm7, %v3771_v60  ;;  %v4233_v12 = vadd.f32 %v5669_v35, %v1966_v46  ;;  %v4039_v19 = vpop.f32.mrb[34].mxu1  ;;  %v5714_v15 = vpop.f32.mrb[42].mxu0 }
 0x1ce   : > { %3337 = vst.msk [vmem:[%s5564_s28 + $0x74] sm:$0xf] %vm3307_vm7, %v3769_v17  ;;  %vm2893_vm8 = vcmp.gt.f32.partialorder %v4232_v62, 0.0  ;;  %v2957_v54 = vmul.f32 0.2, %v4232_v62  ;;  %v4234_v32 = vadd.f32 %v5674_v2, %v4039_v19  ;;  %v1969_v0 = vpop.f32.mrb[35].mxu1 }
 0x1cf   : > { %v5719_v58 = vpop.f32.mrb[43].mxu0  ;;  %vm2891_vm9 = vcmp.gt.f32.partialorder %v4233_v12, 0.0  ;;  %v2955_v48 = vmul.f32 0.2, %v4233_v12  ;;  %v4235_v25 = vadd.f32 %v5679_v24, %v1969_v0 }
 0x1d0   : > { %v3021_v41 = vsel %vm2893_vm8, %v4232_v62, %v2957_v54  ;;  %vm2894_vm10 = vcmp.gt.f32.partialorder %v4234_v32, 0.0  ;;  %v2958_v43 = vmul.f32 0.2, %v4234_v32 }
 0x1d1   : > { %v3774_v16 = vpack.c.bf16 %v3021_v41, %v3021_v41  ;;  %v3019_v26 = vsel %vm2891_vm9, %v4233_v12, %v2955_v48  ;;  %vm2892_vm11 = vcmp.gt.f32.partialorder %v4235_v25, 0.0  ;;  %v2956_v6 = vmul.f32 0.2, %v4235_v25 }
 0x1d2   : > { %v3772_v59 = vpack.c.bf16 %v3019_v26, %v3019_v26  ;;  %v3022_v35 = vsel %vm2894_vm10, %v4234_v32, %v2958_v43 }
 0x1d3   : > { %3342 = vst.msk [vmem:[%s5564_s28 + $0x88] sm:$0xf] %vm3307_vm7, %v3774_v16  ;;  %v3775_v52 = vpack.c.bf16 %v3022_v35, %v3022_v35  ;;  %v3020_v3 = vsel %vm2892_vm11, %v4235_v25, %v2956_v6  ;;  %v4042_v2 = vpop.f32.mrb[36].mxu1  ;;  %v5724_v63 = vpop.f32.mrb[44].mxu0 }
 0x1d4   : > { %3340 = vst.msk [vmem:[%s5564_s28 + $0x80] sm:$0xf] %vm3307_vm7, %v3772_v59  ;;  %v3773_v13 = vpack.c.bf16 %v3020_v3, %v3020_v3  ;;  %v4236_v7 = vadd.f32 %v5684_v27, %v4042_v2  ;;  %v1982_v24 = vpop.f32.mrb[37].mxu1  ;;  %v5729_v14 = vpop.f32.mrb[45].mxu0 }
 0x1d5   : > { %3343 = vst.msk [vmem:[%s5564_s28 + $0x8c] sm:$0xf] %vm3307_vm7, %v3775_v52  ;;  %v4237_v30 = vadd.f32 %v5689_v4, %v1982_v24  ;;  %v4043_v42 = vpop.f32.mrb[38].mxu1  ;;  %v5734_v53 = vpop.f32.mrb[46].mxu0 }
 0x1d6   : > { %3341 = vst.msk [vmem:[%s5564_s28 + $0x84] sm:$0xf] %vm3307_vm7, %v3773_v13  ;;  %vm2897_vm12 = vcmp.gt.f32.partialorder %v4236_v7, 0.0  ;;  %v2961_v8 = vmul.f32 0.2, %v4236_v7  ;;  %v4238_v23 = vadd.f32 %v5694_v34, %v4043_v42  ;;  %v1985_v56 = vpop.f32.mrb[39].mxu1 }
 0x1d7   : > { %v5739_v45 = vpop.f32.mrb[47].mxu0  ;;  %vm2895_vm13 = vcmp.gt.f32.partialorder %v4237_v30, 0.0  ;;  %v2959_v31 = vmul.f32 0.2, %v4237_v30  ;;  %v4239_v50 = vadd.f32 %v5699_v36, %v1985_v56 }
 0x1d8   : > { %v3025_v1 = vsel %vm2897_vm12, %v4236_v7, %v2961_v8  ;;  %vm2898_vm14 = vcmp.gt.f32.partialorder %v4238_v23, 0.0  ;;  %v2962_v10 = vmul.f32 0.2, %v4238_v23 }
 0x1d9   : > { %v3778_v27 = vpack.c.bf16 %v3025_v1, %v3025_v1  ;;  %v3023_v47 = vsel %vm2895_vm13, %v4237_v30, %v2959_v31  ;;  %vm2896_vm15 = vcmp.gt.f32.partialorder %v4239_v50, 0.0  ;;  %v2960_v57 = vmul.f32 0.2, %v4239_v50 }
 0x1da   : > { %v3776_v9 = vpack.c.bf16 %v3023_v47, %v3023_v47  ;;  %v3026_v4 = vsel %vm2898_vm14, %v4238_v23, %v2962_v10 }
 0x1db   : > { %3346 = vst.msk [vmem:[%s5564_s28 + $0x98] sm:$0xf] %vm3307_vm7, %v3778_v27  ;;  %v3779_v11 = vpack.c.bf16 %v3026_v4, %v3026_v4  ;;  %v3024_v49 = vsel %vm2896_vm15, %v4239_v50, %v2960_v57  ;;  %v4046_v34 = vpop.f32.mrb[40].mxu1  ;;  %v5744_v39 = vpop.f32.mrb[48].mxu0 }
 0x1dc   : > { %3344 = vst.msk [vmem:[%s5564_s28 + $0x90] sm:$0xf] %vm3307_vm7, %v3776_v9  ;;  %v3777_v51 = vpack.c.bf16 %v3024_v49, %v3024_v49  ;;  %v4240_v40 = vadd.f32 %v5704_v28, %v4046_v34  ;;  %v1998_v36 = vpop.f32.mrb[41].mxu1  ;;  %v5749_v61 = vpop.f32.mrb[49].mxu0 }
 0x1dd   : > { %3347 = vst.msk [vmem:[%s5564_s28 + $0x9c] sm:$0xf] %vm3307_vm7, %v3779_v11  ;;  %v4241_v21 = vadd.f32 %v5709_v44, %v1998_v36  ;;  %v4047_v22 = vpop.f32.mrb[42].mxu1  ;;  %v5754_v29 = vpop.f32.mrb[50].mxu0 }
 0x1de   : > { %3345 = vst.msk [vmem:[%s5564_s28 + $0x94] sm:$0xf] %vm3307_vm7, %v3777_v51  ;;  %vm2901_vm0 = vcmp.gt.f32.partialorder %v4240_v40, 0.0  ;;  %v2965_v5 = vmul.f32 0.2, %v4240_v40  ;;  %v4242_v37 = vadd.f32 %v5714_v15, %v4047_v22  ;;  %v2001_v20 = vpop.f32.mrb[43].mxu1 }
 0x1df   : > { %v5759_v18 = vpop.f32.mrb[51].mxu0  ;;  %vm2899_vm1 = vcmp.gt.f32.partialorder %v4241_v21, 0.0  ;;  %v2963_v33 = vmul.f32 0.2, %v4241_v21  ;;  %v4243_v60 = vadd.f32 %v5719_v58, %v2001_v20 }
 0x1e0   : > { %v3029_v38 = vsel %vm2901_vm0, %v4240_v40, %v2965_v5  ;;  %vm2902_vm2 = vcmp.gt.f32.partialorder %v4242_v37, 0.0  ;;  %v2966_v55 = vmul.f32 0.2, %v4242_v37 }
 0x1e1   : > { %v3782_v28 = vpack.c.bf16 %v3029_v38, %v3029_v38  ;;  %v3027_v17 = vsel %vm2899_vm1, %v4241_v21, %v2963_v33  ;;  %vm2900_vm3 = vcmp.gt.f32.partialorder %v4243_v60, 0.0  ;;  %v2964_v62 = vmul.f32 0.2, %v4243_v60 }
 0x1e2   : > { %v3780_v46 = vpack.c.bf16 %v3027_v17, %v3027_v17  ;;  %v3030_v44 = vsel %vm2902_vm2, %v4242_v37, %v2966_v55 }
 0x1e3   : > { %3350 = vst.msk [vmem:[%s5564_s28 + $0xa8] sm:$0xf] %vm3307_vm7, %v3782_v28  ;;  %v3783_v12 = vpack.c.bf16 %v3030_v44, %v3030_v44  ;;  %v3028_v19 = vsel %vm2900_vm3, %v4243_v60, %v2964_v62  ;;  %v4050_v15 = vpop.f32.mrb[44].mxu1  ;;  %v5764_v54 = vpop.f32.mrb[52].mxu0 }
 0x1e4   : > { %3348 = vst.msk [vmem:[%s5564_s28 + $0xa0] sm:$0xf] %vm3307_vm7, %v3780_v46  ;;  %v3781_v32 = vpack.c.bf16 %v3028_v19, %v3028_v19  ;;  %v4244_v0 = vadd.f32 %v5724_v63, %v4050_v15  ;;  %v2014_v58 = vpop.f32.mrb[45].mxu1  ;;  %v5769_v48 = vpop.f32.mrb[53].mxu0 }
 0x1e5   : > { %3351 = vst.msk [vmem:[%s5564_s28 + $0xac] sm:$0xf] %vm3307_vm7, %v3783_v12  ;;  %v4245_v25 = vadd.f32 %v5729_v14, %v2014_v58  ;;  %v4051_v41 = vpop.f32.mrb[46].mxu1  ;;  %v5774_v43 = vpop.f32.mrb[54].mxu0 }
 0x1e6   : > { %3349 = vst.msk [vmem:[%s5564_s28 + $0xa4] sm:$0xf] %vm3307_vm7, %v3781_v32  ;;  %vm2905_vm4 = vcmp.gt.f32.partialorder %v4244_v0, 0.0  ;;  %v2969_v16 = vmul.f32 0.2, %v4244_v0  ;;  %v4246_v26 = vadd.f32 %v5734_v53, %v4051_v41  ;;  %v2017_v6 = vpop.f32.mrb[47].mxu1 }
 0x1e7   : > { %v5779_v59 = vpop.f32.mrb[55].mxu0  ;;  %vm2903_vm5 = vcmp.gt.f32.partialorder %v4245_v25, 0.0  ;;  %v2967_v35 = vmul.f32 0.2, %v4245_v25  ;;  %v4247_v52 = vadd.f32 %v5739_v45, %v2017_v6 }
 0x1e8   : > { %v3033_v3 = vsel %vm2905_vm4, %v4244_v0, %v2969_v16  ;;  %vm2906_vm6 = vcmp.gt.f32.partialorder %v4246_v26, 0.0  ;;  %v2970_v2 = vmul.f32 0.2, %v4246_v26 }
 0x1e9   : > { %v3786_v63 = vpack.c.bf16 %v3033_v3, %v3033_v3  ;;  %v3031_v13 = vsel %vm2903_vm5, %v4245_v25, %v2967_v35  ;;  %vm2904_vm8 = vcmp.gt.f32.partialorder %v4247_v52, 0.0  ;;  %v2968_v7 = vmul.f32 0.2, %v4247_v52 }
 0x1ea   : > { %v3784_v24 = vpack.c.bf16 %v3031_v13, %v3031_v13  ;;  %v3034_v14 = vsel %vm2906_vm6, %v4246_v26, %v2970_v2 }
 0x1eb   : > { %3354 = vst.msk [vmem:[%s5564_s28 + $0xb8] sm:$0xf] %vm3307_vm7, %v3786_v63  ;;  %v3787_v30 = vpack.c.bf16 %v3034_v14, %v3034_v14  ;;  %v3032_v42 = vsel %vm2904_vm8, %v4247_v52, %v2968_v7  ;;  %v4054_v53 = vpop.f32.mrb[48].mxu1  ;;  %v5784_v8 = vpop.f32.mrb[56].mxu0 }
 0x1ec   : > { %3352 = vst.msk [vmem:[%s5564_s28 + $0xb0] sm:$0xf] %vm3307_vm7, %v3784_v24  ;;  %v3785_v23 = vpack.c.bf16 %v3032_v42, %v3032_v42  ;;  %v4248_v56 = vadd.f32 %v5744_v39, %v4054_v53  ;;  %v2030_v45 = vpop.f32.mrb[49].mxu1  ;;  %v5789_v31 = vpop.f32.mrb[57].mxu0 }
 0x1ed   : > { %3355 = vst.msk [vmem:[%s5564_s28 + $0xbc] sm:$0xf] %vm3307_vm7, %v3787_v30  ;;  %v4249_v50 = vadd.f32 %v5749_v61, %v2030_v45  ;;  %v4055_v1 = vpop.f32.mrb[50].mxu1  ;;  %v5794_v10 = vpop.f32.mrb[58].mxu0 }
 0x1ee   : > { %3353 = vst.msk [vmem:[%s5564_s28 + $0xb4] sm:$0xf] %vm3307_vm7, %v3785_v23  ;;  %vm2909_vm9 = vcmp.gt.f32.partialorder %v4248_v56, 0.0  ;;  %v2973_v27 = vmul.f32 0.2, %v4248_v56  ;;  %v4250_v47 = vadd.f32 %v5754_v29, %v4055_v1  ;;  %v2033_v57 = vpop.f32.mrb[51].mxu1 }
 0x1ef   : > { %v5799_v9 = vpop.f32.mrb[59].mxu0  ;;  %vm2907_vm10 = vcmp.gt.f32.partialorder %v4249_v50, 0.0  ;;  %v2971_v4 = vmul.f32 0.2, %v4249_v50  ;;  %v4251_v11 = vadd.f32 %v5759_v18, %v2033_v57 }
 0x1f0   : > { %v3037_v49 = vsel %vm2909_vm9, %v4248_v56, %v2973_v27  ;;  %vm2910_vm11 = vcmp.gt.f32.partialorder %v4250_v47, 0.0  ;;  %v2974_v34 = vmul.f32 0.2, %v4250_v47 }
 0x1f1   : > { %v3790_v39 = vpack.c.bf16 %v3037_v49, %v3037_v49  ;;  %v3035_v51 = vsel %vm2907_vm10, %v4249_v50, %v2971_v4  ;;  %vm2908_vm12 = vcmp.gt.f32.partialorder %v4251_v11, 0.0  ;;  %v2972_v40 = vmul.f32 0.2, %v4251_v11 }
 0x1f2   : > { %v3788_v36 = vpack.c.bf16 %v3035_v51, %v3035_v51  ;;  %v3038_v61 = vsel %vm2910_vm11, %v4250_v47, %v2974_v34 }
 0x1f3   : > { %3358 = vst.msk [vmem:[%s5564_s28 + $0xc8] sm:$0xf] %vm3307_vm7, %v3790_v39  ;;  %v3791_v21 = vpack.c.bf16 %v3038_v61, %v3038_v61  ;;  %v3036_v22 = vsel %vm2908_vm12, %v4251_v11, %v2972_v40  ;;  %v4058_v29 = vpop.f32.mrb[52].mxu1  ;;  %v4198_v5 = vpop.f32.mrb[60].mxu0 }
 0x1f4   : > { %3356 = vst.msk [vmem:[%s5564_s28 + $0xc0] sm:$0xf] %vm3307_vm7, %v3788_v36  ;;  %v3789_v37 = vpack.c.bf16 %v3036_v22, %v3036_v22  ;;  %v4252_v20 = vadd.f32 %v5764_v54, %v4058_v29  ;;  %v2046_v18 = vpop.f32.mrb[53].mxu1  ;;  %v2780_v33 = vpop.f32.mrb[61].mxu0 }
 0x1f5   : > { %3359 = vst.msk [vmem:[%s5564_s28 + $0xcc] sm:$0xf] %vm3307_vm7, %v3791_v21  ;;  %v4253_v60 = vadd.f32 %v5769_v48, %v2046_v18  ;;  %v4059_v38 = vpop.f32.mrb[54].mxu1  ;;  %v4199_v55 = vpop.f32.mrb[62].mxu0 }
 0x1f6   : > { %3357 = vst.msk [vmem:[%s5564_s28 + $0xc4] sm:$0xf] %vm3307_vm7, %v3789_v37  ;;  %vm2913_vm13 = vcmp.gt.f32.partialorder %v4252_v20, 0.0  ;;  %v2977_v28 = vmul.f32 0.2, %v4252_v20  ;;  %v4254_v17 = vadd.f32 %v5774_v43, %v4059_v38  ;;  %v2049_v62 = vpop.f32.mrb[55].mxu1 }
 0x1f7   : > { %v2783_v46 = vpop.f32.mrb[63].mxu0  ;;  %vm2911_vm14 = vcmp.gt.f32.partialorder %v4253_v60, 0.0  ;;  %v2975_v44 = vmul.f32 0.2, %v4253_v60  ;;  %v4255_v12 = vadd.f32 %v5779_v59, %v2049_v62 }
 0x1f8   : > { %v3041_v19 = vsel %vm2913_vm13, %v4252_v20, %v2977_v28  ;;  %vm2914_vm15 = vcmp.gt.f32.partialorder %v4254_v17, 0.0  ;;  %v2978_v15 = vmul.f32 0.2, %v4254_v17 }
 0x1f9   : > { %v3794_v54 = vpack.c.bf16 %v3041_v19, %v3041_v19  ;;  %v3039_v32 = vsel %vm2911_vm14, %v4253_v60, %v2975_v44  ;;  %vm2912_vm0 = vcmp.gt.f32.partialorder %v4255_v12, 0.0  ;;  %v2976_v0 = vmul.f32 0.2, %v4255_v12 }
 0x1fa   : > { %v3792_v58 = vpack.c.bf16 %v3039_v32, %v3039_v32  ;;  %v3042_v48 = vsel %vm2914_vm15, %v4254_v17, %v2978_v15 }
 0x1fb   : > { %3362 = vst.msk [vmem:[%s5564_s28 + $0xd8] sm:$0xf] %vm3307_vm7, %v3794_v54  ;;  %v3795_v25 = vpack.c.bf16 %v3042_v48, %v3042_v48  ;;  %v3040_v41 = vsel %vm2912_vm0, %v4255_v12, %v2976_v0  ;;  %v4062_v43 = vpop.f32.mrb[56].mxu1 }
 0x1fc   : > { %3360 = vst.msk [vmem:[%s5564_s28 + $0xd0] sm:$0xf] %vm3307_vm7, %v3792_v58  ;;  %v3793_v16 = vpack.c.bf16 %v3040_v41, %v3040_v41  ;;  %v4256_v26 = vadd.f32 %v5784_v8, %v4062_v43  ;;  %v2062_v6 = vpop.f32.mrb[57].mxu1 }
 0x1fd   : > { %3363 = vst.msk [vmem:[%s5564_s28 + $0xdc] sm:$0xf] %vm3307_vm7, %v3795_v25  ;;  %v4257_v59 = vadd.f32 %v5789_v31, %v2062_v6  ;;  %v4063_v35 = vpop.f32.mrb[58].mxu1 }
 0x1fe   : > { %3361 = vst.msk [vmem:[%s5564_s28 + $0xd4] sm:$0xf] %vm3307_vm7, %v3793_v16  ;;  %vm2917_vm1 = vcmp.gt.f32.partialorder %v4256_v26, 0.0  ;;  %v2981_v52 = vmul.f32 0.2, %v4256_v26  ;;  %v4258_v3 = vadd.f32 %v5794_v10, %v4063_v35  ;;  %v2065_v2 = vpop.f32.mrb[59].mxu1 }
 0x1ff   : > { %vm2915_vm2 = vcmp.gt.f32.partialorder %v4257_v59, 0.0  ;;  %v2979_v63 = vmul.f32 0.2, %v4257_v59  ;;  %v4259_v13 = vadd.f32 %v5799_v9, %v2065_v2 }
 0x200   : > { %v3045_v7 = vsel %vm2917_vm1, %v4256_v26, %v2981_v52  ;;  %vm2918_vm3 = vcmp.gt.f32.partialorder %v4258_v3, 0.0  ;;  %v2982_v24 = vmul.f32 0.2, %v4258_v3 }
 0x201   : > { %v3798_v14 = vpack.c.bf16 %v3045_v7, %v3045_v7  ;;  %v3043_v30 = vsel %vm2915_vm2, %v4257_v59, %v2979_v63  ;;  %vm2916_vm4 = vcmp.gt.f32.partialorder %v4259_v13, 0.0  ;;  %v2980_v42 = vmul.f32 0.2, %v4259_v13 }
 0x202   : > { %v3796_v53 = vpack.c.bf16 %v3043_v30, %v3043_v30  ;;  %v3046_v8 = vsel %vm2918_vm3, %v4258_v3, %v2982_v24 }
 0x203   : > { %3366 = vst.msk [vmem:[%s5564_s28 + $0xe8] sm:$0xf] %vm3307_vm7, %v3798_v14  ;;  %v3799_v23 = vpack.c.bf16 %v3046_v8, %v3046_v8  ;;  %v3044_v56 = vsel %vm2916_vm4, %v4259_v13, %v2980_v42  ;;  %v4066_v45 = vpop.f32.mrb[60].mxu1 }
 0x204   : > { %3364 = vst.msk [vmem:[%s5564_s28 + $0xe0] sm:$0xf] %vm3307_vm7, %v3796_v53  ;;  %v3797_v31 = vpack.c.bf16 %v3044_v56, %v3044_v56  ;;  %v4260_v50 = vadd.f32 %v4198_v5, %v4066_v45  ;;  %v2078_v1 = vpop.f32.mrb[61].mxu1 }
 0x205   : > { %3367 = vst.msk [vmem:[%s5564_s28 + $0xec] sm:$0xf] %vm3307_vm7, %v3799_v23  ;;  %v4261_v10 = vadd.f32 %v2780_v33, %v2078_v1  ;;  %v4067_v27 = vpop.f32.mrb[62].mxu1 }
 0x206   : > { %3365 = vst.msk [vmem:[%s5564_s28 + $0xe4] sm:$0xf] %vm3307_vm7, %v3797_v31  ;;  %vm2921_vm5 = vcmp.gt.f32.partialorder %v4260_v50, 0.0  ;;  %v2985_v47 = vmul.f32 0.2, %v4260_v50  ;;  %v4262_v57 = vadd.f32 %v4199_v55, %v4067_v27  ;;  %v2081_v9 = vpop.f32.mrb[63].mxu1 }
 0x207   : > { %vm2919_vm6 = vcmp.gt.f32.partialorder %v4261_v10, 0.0  ;;  %v2983_v4 = vmul.f32 0.2, %v4261_v10  ;;  %v4263_v11 = vadd.f32 %v2783_v46, %v2081_v9 }
 0x208   : > { %v3049_v49 = vsel %vm2921_vm5, %v4260_v50, %v2985_v47  ;;  %vm2922_vm8 = vcmp.gt.f32.partialorder %v4262_v57, 0.0  ;;  %v2986_v34 = vmul.f32 0.2, %v4262_v57 }
 0x209   : > { %v3802_v39 = vpack.c.bf16 %v3049_v49, %v3049_v49  ;;  %v3047_v51 = vsel %vm2919_vm6, %v4261_v10, %v2983_v4  ;;  %vm2920_vm9 = vcmp.gt.f32.partialorder %v4263_v11, 0.0  ;;  %v2984_v40 = vmul.f32 0.2, %v4263_v11 }
 0x20a   : > { %v3800_v36 = vpack.c.bf16 %v3047_v51, %v3047_v51  ;;  %v3050_v61 = vsel %vm2922_vm8, %v4262_v57, %v2986_v34 }
 0x20b   : > { %3370 = vst.msk [vmem:[%s5564_s28 + $0xf8] sm:$0xf] %vm3307_vm7, %v3802_v39  ;;  %v3803_v21 = vpack.c.bf16 %v3050_v61, %v3050_v61  ;;  %v3048_v22 = vsel %vm2920_vm9, %v4263_v11, %v2984_v40 }
 0x20c   : > { %3368 = vst.msk [vmem:[%s5564_s28 + $0xf0] sm:$0xf] %vm3307_vm7, %v3800_v36  ;;  %v3801_v29 = vpack.c.bf16 %v3048_v22, %v3048_v22 }
 0x20d   : > { %3371 = vst.msk [vmem:[%s5564_s28 + $0xfc] sm:$0xf] %vm3307_vm7, %v3803_v21 }
 0x20e   : > { %3369 = vst.msk [vmem:[%s5564_s28 + $0xf4] sm:$0xf] %vm3307_vm7, %v3801_v29 }
 0x20f PF: > { %s12_s11 = sadd.s32 1, %s4482_s11   ;;  %s5940_s9 = smov %s4478_s10 }
 0x210   : > { %p9_p5 = scmp.ge.s32.totalorder %s12_s11, 6   ;;  %s5941_s10 = smov %s5943_s12 }
 0x212   :  { %11 = sbr.rel (!%p9_p5) target bundleno = 2 (0x2), region = 62 }

// kernel: d_sty_forward.6
= control target key start
LH: loop header
LB: loop body
LE: loop exit
PB: predicated region body
PF: predicated region fallthrough
CT: control target
= control target key end

     0   :  { %s2391_s12 = smov 0   ;;  %s2393_s13 = smov 0   ;;  %s3029_s0 = inlined_call_operand.vmem [shape: bf16[4,17,17,32], index: 0, kind: input, shape index: {}]   ;;  %s3030_s1 = inlined_call_operand.vmem [shape: bf16[4,32,16], index: 1, kind: input, shape index: {}]   ;;  %s3031_s2 = inlined_call_operand.vmem [shape: bf16[4,16,8,16], index: 2, kind: output, shape index: {0}]   ;;  %s3032_s3 = inlined_call_operand.vmem [shape: f32[4,8,16], index: 3, kind: output, shape index: {1}]  }
   0x1   :  { %s2395_s14 = smov 0  }
   0x2 LB: > { %s26_s15 = sadd.s32 1, %s2364_s13  ;;  %p1873_p0 = scmp.ge.s32.totalorder %s2368_s14, 1  ;;  %s2368_s14 = sphi %s2395_s14, %s14_s14   ;;  %s2364_s13 = sphi %s2393_s13, %s3036_s13   ;;  %s2360_s12 = sphi %s2391_s12, %s3035_s12  }
   0x3   : > { %p28_p1 = scmp.ge.s32.totalorder %s26_s15, 4  ;;  %p156_p2 = scmp.lt.s32.totalorder %s2368_s14, 5 }
   0x5   : > { %s3038_s15 = smov (%p28_p1, %s26_s15), 0  ;;  %p157_p3 = pnand %p1873_p0, %p156_p2 }
   0x6   : > { %v2321_v0 = vld [vmem:[%s3030_s1 + $0x20] sm:$0xff] (!%p157_p3)   ;;  %p191_p4 = scmp.lt.s32.totalorder (!%p157_p3), %s2360_s12, 3  ;;  %v2322_v1 = vld [vmem:[%s3030_s1 + $0x28] sm:$0xff] (!%p157_p3)   ;;  %v2324_v2 = vld [vmem:[%s3030_s1 + $0x10] sm:$0xff] (!%p157_p3)   ;;  %vm725_vm0 = vcmask (!%p157_p3), 261120   ;;  %vm1728_vm4 = vcmask (!%p157_p3), 125952  }
   0x7   : > { %160 = sbr.rel (%p157_p3) target bundleno = 447 (0x1bf), region = 28  ;;  %2143 = vmatprep.subr.bf16.mxu0 (!%p157_p3), %v2321_v0  ;;  %v2326_v3 = vld [vmem:[%s3030_s1 + $0x18] sm:$0xff] (!%p157_p3)   ;;  %2071 = vmatprep.subr.bf16.mxu1 (!%p157_p3), %v2324_v2  ;;  %v2427_v4 = vld [vmem:[%s3030_s1] sm:$0xff] (!%p157_p3)   ;;  %v2330_v5 = vld [vmem:[%s3030_s1 + $0x30] sm:$0xff] (!%p157_p3)   ;;  %vm273_vm1 = vsmask.f32 (!%p157_p3), 3328 }
   0x8   : > { %2144 = vmatpush3.bf16.msra.mxu0 (!%p157_p3), %v2321_v0  ;;  %2072 = vmatpush3.bf16.msra.mxu1 (!%p157_p3), %v2324_v2  ;;  %vm274_vm2 = vsmask.f32 (!%p157_p3), 7440  ;;  %v2340_v27 = vld [vmem:[%s3030_s1 + $0x38] sm:$0xff] (!%p157_p3)   ;;  %vm1710_vm5 = vcmask (!%p157_p3), 128000   ;;  %vm1598_vm6 = vcmask (!%p157_p3), 130048   ;;  %vm1707_vm7 = vcmask (!%p157_p3), 122880  }
   0x9   : > { %2145 = vmatprep.subr.bf16.mxu0 (!%p157_p3), %v2322_v1  ;;  %2073 = vmatprep.subr.bf16.mxu1 (!%p157_p3), %v2326_v3  ;;  %vm2492_vm3 = vmor (!%p157_p3), %vm273_vm1, %vm274_vm2 }
   0xc   : > { %2146 = vmatpush3.bf16.msra.mxu0 (!%p157_p3), %v2322_v1  ;;  %2074 = vmatpush3.bf16.msra.mxu1 (!%p157_p3), %v2326_v3 }
   0xd   : > { %2179 = vmatprep.subr.bf16.mxu0 (!%p157_p3), %v2330_v5  ;;  %2107 = vmatprep.subr.bf16.mxu1 (!%p157_p3), %v2427_v4 }
   0xe   : > { %s3040_s12 = smov (!%p191_p4, %s2360_s12), 3 }
   0xf   : > { %s2295_s24 = smul.u32 204, %s3040_s12  ;;  %s1998_s9 = sshll.u32 %s3040_s12, 6 }
  0x10   : > { %s1877_s10 = sshll.u32 %s3040_s12, 3  ;;  %s2880_s17 = scalar_lea.vmem %s3031_s2, %s1998_s9 }
  0x11   : > { %s2432_s29 = scalar_lea.vmem %s3029_s0, %s2295_s24  ;;  %s2887_s19 = scalar_lea.vmem %s3032_s3, %s1877_s10 }
  0x12   : > { %v221_v6 = vld [vmem:[%s2432_s29 + $0xc] sm:$0xf]  ;;  %v222_v7 = vld [vmem:[%s2432_s29 + $0x10] sm:$0xf]  ;;  %v224_v8 = vld [vmem:[%s2432_s29 + $0x18] sm:$0xf] }
  0x13   : > { %v301_v9 = vshrl.u32 %v221_v6, 16  ;;  %v304_v10 = vshll.u32 %v221_v6, 16  ;;  %v310_v11 = vshll.u32 %v222_v7, 16  ;;  %v314_v12 = vshrl.u32 %v222_v7, 16  ;;  %v225_v13 = vld [vmem:[%s2432_s29 + $0x1c] sm:$0xf] }
  0x14   : > { %v2441_v14 = vcombine.low %v221_v6, %v222_v7  ;;  %v325_v15 = vshrl.u32 %v224_v8, 16  ;;  %v328_v16 = vshll.u32 %v224_v8, 16  ;;  %v334_v17 = vshll.u32 %v225_v13, 16  ;;  %v227_v22 = vld [vmem:[%s2432_s29 + $0x24] sm:$0xf] }
  0x15   : > { %v303_v18 = vrot.slane %v301_v9, 4  ;;  %v306_v19 = vrot.slane %v304_v10, 5  ;;  %v2443_v20 = vrot.slane %v310_v11, 5  ;;  %v316_v21 = vrot.slane %v314_v12, 4  ;;  %v228_v23 = vld [vmem:[%s2432_s29 + $0x28] sm:$0xf] }
  0x16   : > { %2147 = vmatprep.mubr.msk.bf16.mxu0 %vm725_vm0, %v2441_v14  ;;  %v2450_v24 = vrot.slane %v325_v15, 4  ;;  %v2452_v25 = vcombine.low %v224_v8, %v225_v13  ;;  %v2455_v26 = vld [vmem:[%s2432_s29] sm:$0xf]  ;;  %v2460_v29 = vrot.slane %v328_v16, 5  ;;  %v338_v30 = vshrl.u32 %v225_v13, 16 }
  0x17   : > { %v307_v28 = vor.u32 %v306_v19, %v303_v18  ;;  %v2463_v31 = vld [vmem:[%s2432_s29 + $0x4] sm:$0xf]  ;;  %v220_v32 = vld [vmem:[%s2432_s29 + $0x8] sm:$0x1]  ;;  %v317_v33 = vor.u32 %v316_v21, %v2443_v20  ;;  %v2467_v34 = vrot.slane %v334_v17, 5  ;;  %v349_v35 = vshrl.u32 %v227_v22, 16 }
  0x18   : > { %2148 = vmatmul.mubr.msk.bf16.vlgmr.msra.gmra.mrb[0].mxu0 %vm725_vm0, %v2452_v25  ;;  %v2471_v36 = vcombine.low %v227_v22, %v228_v23  ;;  %v352_v37 = vshll.u32 %v227_v22, 16  ;;  %v358_v38 = vshll.u32 %v228_v23, 16  ;;  %v362_v39 = vshrl.u32 %v228_v23, 16  ;;  %v230_v45 = vld [vmem:[%s2432_s29 + $0x30] sm:$0xf] }
  0x19   : > { %v277_v40 = vshrl.u32 %v2455_v26, 16  ;;  %2180 = vmatpush3.bf16.msra.mxu0 %v2330_v5  ;;  %v280_v41 = vshll.u32 %v2455_v26, 16  ;;  %v286_v42 = vshll.u32 %v2463_v31, 16  ;;  %v290_v43 = vshrl.u32 %v2463_v31, 16  ;;  %v231_v49 = vld [vmem:[%s2432_s29 + $0x34] sm:$0xf] }
  0x1a   : > { %2151 = vmatprep.mubr.msk.bf16.mxu0 %vm725_vm0, %v2471_v36  ;;  %v296_v44 = vshll.u32 %v220_v32, 16  ;;  %2181 = vmatprep.subr.bf16.mxu0 %v2340_v27  ;;  %v308_v46 = vrot.slane %v307_v28, 4  ;;  %v340_v47 = vrot.slane %v338_v30, 4  ;;  %v373_v50 = vshrl.u32 %v230_v45, 16  ;;  %v223_v55 = vld [vmem:[%s2432_s29 + $0x14] sm:$0x1] }
  0x1b   : > { %v279_v48 = vrot.slane %v277_v40, 4  ;;  %v318_v51 = vrot.slane %v317_v33, 4  ;;  %v282_v52 = vrot.slane %v280_v41, 5  ;;  %v288_v53 = vrot.slane %v286_v42, 5  ;;  %v233_v1 = vld [vmem:[%s2432_s29 + $0x3c] sm:$0xf] }
  0x1c   : > { %v292_v54 = vrot.slane %v290_v43, 4  ;;  %v2482_v56 = vrot.slane %v349_v35, 4  ;;  %v2484_v57 = vrot.slane %v352_v37, 5  ;;  %v2486_v58 = vrot.slane %v358_v38, 5  ;;  %v234_v2 = vld [vmem:[%s2432_s29 + $0x40] sm:$0xf] }
  0x1d   : > { %v2488_v59 = vrot.slane %v362_v39, 4  ;;  %2182 = vmatpush3.bf16.msra.mxu0 %v2340_v27  ;;  %v283_v61 = vor.u32 %v282_v52, %v279_v48  ;;  %v298_v63 = vrot.slane %v296_v44, 5  ;;  %v2496_v0 = vcombine.low %v230_v45, %v231_v49  ;;  %v226_v17 = vld [vmem:[%s2432_s29 + $0x20] sm:$0x1]  ;;  %v236_v30 = vld [vmem:[%s2432_s29 + $0x48] sm:$0xf] }
  0x1e   : > { %v293_v62 = vor.u32 %v292_v54, %v288_v53  ;;  %v2500_v3 = vrot.slane %v373_v50, 4  ;;  %v376_v5 = vshll.u32 %v230_v45, 16  ;;  %v382_v6 = vshll.u32 %v231_v49, 16  ;;  %v237_v32 = vld [vmem:[%s2432_s29 + $0x4c] sm:$0xf] }
  0x1f   : > { %v320_v7 = vshll.u32 %v223_v55, 16  ;;  %v284_v8 = vrot.slane %v283_v61, 4  ;;  %v386_v10 = vshrl.u32 %v231_v49, 16  ;;  %v313_v11 = vsel %vm2492_vm3, %v308_v46, %v2443_v20  ;;  %v2338_v39 = vld [vmem:[%s3030_s1 + $0x8] sm:$0xff]   ;;  %v240_v55 = vld [vmem:[%s2432_s29 + $0x58] sm:$0xf] }
  0x20   : > { %v294_v9 = vrot.slane %v293_v62, 4  ;;  %2152 = vmatmul.mubr.msk.bf16.gmra.mrb[4].mxu0 %vm725_vm0, %v2496_v0  ;;  %v397_v13 = vshrl.u32 %v233_v1, 16  ;;  %v400_v15 = vshll.u32 %v233_v1, 16  ;;  %v2507_v16 = vcombine.low %v233_v1, %v234_v2  ;;  %v229_v42 = vld [vmem:[%s2432_s29 + $0x2c] sm:$0x1] }
  0x21   : > { %v322_v12 = vrot.slane %v320_v7, 5  ;;  %v289_v18 = vsel %vm2492_vm3, %v284_v8, %v288_v53  ;;  %v406_v21 = vshll.u32 %v234_v2, 16  ;;  %v410_v22 = vshrl.u32 %v234_v2, 16 }
  0x22   : > { %v299_v19 = vsel %vm2492_vm3, %v294_v9, %v298_v63  ;;  %2155 = vmatprep.mubr.msk.bf16.mxu0 %vm725_vm0, %v2507_v16  ;;  %v331_v20 = vor.u32 %v2460_v29, %v2450_v24  ;;  %v341_v28 = vor.u32 %v340_v47, %v2467_v34  ;;  %v378_v33 = vrot.slane %v376_v5, 5  ;;  %v232_v5 = vld [vmem:[%s2432_s29 + $0x38] sm:$0x1]  ;;  %v242_v9 = vld [vmem:[%s2432_s29 + $0x60] sm:$0xf] }
  0x23   : > { %v1882_v23 = vcombine.low %v289_v18, %v299_v19  ;;  %v323_v27 = vsel %vm2492_vm3, %v318_v51, %v322_v12  ;;  %v2523_v35 = vrot.slane %v382_v6, 5  ;;  %v344_v38 = vshll.u32 %v226_v17, 16  ;;  %v239_v51 = vld [vmem:[%s2432_s29 + $0x54] sm:$0xf] }
  0x24   : > { %v2525_v37 = vcombine.low %v313_v11, %v323_v27  ;;  %v388_v40 = vrot.slane %v386_v10, 4  ;;  %v2531_v41 = vrot.slane %v397_v13, 4  ;;  %v332_v24 = vrot.slane %v331_v20, 4  ;;  %v235_v20 = vld [vmem:[%s2432_s29 + $0x44] sm:$0x1] }
  0x25   : > { %2075 = vmatprep.mubr.msk.bf16.mxu1 %vm725_vm0, %v1882_v23  ;;  %v342_v29 = vrot.slane %v341_v28, 4  ;;  %v2536_v43 = vrot.slane %v400_v15, 5  ;;  %v346_v44 = vrot.slane %v344_v38, 5  ;;  %v421_v45 = vshrl.u32 %v236_v30, 16  ;;  %v243_v15 = vld [vmem:[%s2432_s29 + $0x64] sm:$0xf] }
  0x26   : > { %2076 = vmatmul.mubr.msk.bf16.vlgmr.msra.gmra.mrb[0].mxu1 %vm725_vm0, %v2525_v37  ;;  %v2538_v46 = vcombine.low %v236_v30, %v237_v32  ;;  %v2541_v47 = vrot.slane %v406_v21, 5  ;;  %v2543_v48 = vrot.slane %v410_v22, 4  ;;  %v337_v49 = vsel %vm2492_vm3, %v332_v24, %v2467_v34  ;;  %v245_v24 = vld [vmem:[%s2432_s29 + $0x6c] sm:$0xf] }
  0x27   : > { %2108 = vmatpush3.bf16.msra.mxu1 %v2427_v4  ;;  %v355_v50 = vor.u32 %v2484_v57, %v2482_v56  ;;  %v347_v52 = vsel %vm2492_vm3, %v342_v29, %v346_v44  ;;  %v424_v53 = vshll.u32 %v236_v30, 16  ;;  %v365_v4 = vor.u32 %v2488_v59, %v2486_v58 }
  0x28   : > { %2156 = vmatmul.mubr.msk.bf16.gmra.mrb[8].mxu0 %vm725_vm0, %v2538_v46  ;;  %v368_v54 = vshll.u32 %v229_v42, 16  ;;  %2109 = vmatprep.subr.bf16.mxu1 %v2338_v39  ;;  %v2558_v34 = vcombine.low %v337_v49, %v347_v52  ;;  %v430_v61 = vshll.u32 %v237_v32, 16  ;;  %v434_v56 = vshrl.u32 %v237_v32, 16  ;;  %v246_v49 = vld [vmem:[%s2432_s29 + $0x70] sm:$0xf] }
  0x29   : > { %v356_v57 = vrot.slane %v355_v50, 4  ;;  %v2560_v62 = vrot.slane %v421_v45, 4  ;;  %v366_v63 = vrot.slane %v365_v4, 4  ;;  %v445_v2 = vshrl.u32 %v239_v51, 16 }
  0x2a   : > { %v370_v1 = vrot.slane %v368_v54, 5  ;;  %2079 = vmatprep.mubr.msk.bf16.mxu1 %vm725_vm0, %v2558_v34  ;;  %v448_v6 = vshll.u32 %v239_v51, 16  ;;  %v454_v7 = vshll.u32 %v240_v55, 16  ;;  %v2568_v8 = vcombine.low %v239_v51, %v240_v55  ;;  %v238_v54 = vld [vmem:[%s2432_s29 + $0x50] sm:$0x1] }
  0x2b   : > { %v361_v59 = vsel %vm2492_vm3, %v356_v57, %v2486_v58  ;;  %2110 = vmatpush3.bf16.msra.mxu1 %v2338_v39  ;;  %v458_v11 = vshrl.u32 %v240_v55, 16  ;;  %v379_v12 = vor.u32 %v378_v33, %v2500_v3  ;;  %v389_v13 = vor.u32 %v388_v40, %v2523_v35 }
  0x2c   : > { %v371_v10 = vsel %vm2492_vm3, %v366_v63, %v370_v1  ;;  %v426_v17 = vrot.slane %v424_v53, 5  ;;  %v2576_v18 = vrot.slane %v430_v61, 5  ;;  %2159 = vmatprep.mubr.msk.bf16.mxu0 %vm725_vm0, %v2568_v8  ;;  %v392_v19 = vshll.u32 %v232_v5, 16  ;;  %v248_v5 = vld [vmem:[%s2432_s29 + $0x78] sm:$0xf] }
  0x2d   : > { %v2578_v58 = vcombine.low %v361_v59, %v371_v10  ;;  %v436_v21 = vrot.slane %v434_v56, 4  ;;  %v2582_v22 = vrot.slane %v445_v2, 4  ;;  %v380_v23 = vrot.slane %v379_v12, 4  ;;  %v249_v59 = vld [vmem:[%s2432_s29 + $0x7c] sm:$0xf] }
  0x2e   : > { %v390_v27 = vrot.slane %v389_v13, 4  ;;  %v2587_v3 = vrot.slane %v448_v6, 5  ;;  %v394_v28 = vrot.slane %v392_v19, 5  ;;  %v469_v30 = vshrl.u32 %v242_v9, 16 }
  0x2f   : > { %2080 = vmatmul.mubr.msk.bf16.gmra.mrb[4].mxu1 %vm725_vm0, %v2578_v58  ;;  %v2589_v32 = vcombine.low %v242_v9, %v243_v15  ;;  %v2591_v33 = vrot.slane %v454_v7, 5  ;;  %v460_v38 = vrot.slane %v458_v11, 4  ;;  %v385_v39 = vsel %vm2492_vm3, %v380_v23, %v2523_v35 }
  0x30   : > { %v403_v40 = vor.u32 %v2536_v43, %v2531_v41  ;;  %v395_v29 = vsel %vm2492_vm3, %v390_v27, %v394_v28  ;;  %v472_v42 = vshll.u32 %v242_v9, 16  ;;  %v413_v44 = vor.u32 %v2543_v48, %v2541_v47 }
  0x31   : > { %2160 = vmatmul.mubr.msk.bf16.gmra.mrb[12].mxu0 %vm725_vm0, %v2589_v32  ;;  %v416_v45 = vshll.u32 %v235_v20, 16  ;;  %v2606_v50 = vcombine.low %v385_v39, %v395_v29  ;;  %v478_v35 = vshll.u32 %v243_v15, 16  ;;  %v482_v51 = vshrl.u32 %v243_v15, 16 }
  0x32   : > { %v404_v41 = vrot.slane %v403_v40, 4  ;;  %v2608_v43 = vrot.slane %v469_v30, 4  ;;  %v414_v52 = vrot.slane %v413_v44, 4  ;;  %v493_v4 = vshrl.u32 %v245_v24, 16  ;;  %v251_v30 = vld [vmem:[%s2432_s29 + $0x84] sm:$0xf] }
  0x33   : > { %v418_v53 = vrot.slane %v416_v45, 5  ;;  %2083 = vmatprep.mubr.msk.bf16.mxu1 %vm725_vm0, %v2606_v50  ;;  %v496_v55 = vshll.u32 %v245_v24, 16  ;;  %v502_v61 = vshll.u32 %v246_v49, 16  ;;  %v2616_v56 = vcombine.low %v245_v24, %v246_v49 }
  0x34   : > { %v409_v48 = vsel %vm2492_vm3, %v404_v41, %v2541_v47  ;;  %v506_v63 = vshrl.u32 %v246_v49, 16  ;;  %v427_v1 = vor.u32 %v426_v17, %v2560_v62  ;;  %v437_v2 = vor.u32 %v436_v21, %v2576_v18  ;;  %v241_v62 = vld [vmem:[%s2432_s29 + $0x5c] sm:$0x1]  ;;  %v244_v41 = vld [vmem:[%s2432_s29 + $0x68] sm:$0x1] }
  0x35   : > { %v419_v57 = vsel %vm2492_vm3, %v414_v52, %v418_v53  ;;  %v474_v6 = vrot.slane %v472_v42, 5  ;;  %v2624_v7 = vrot.slane %v478_v35, 5  ;;  %2163 = vmatprep.mubr.msk.bf16.mxu0 %vm725_vm0, %v2616_v56  ;;  %v440_v47 = vshll.u32 %v238_v54, 16  ;;  %v252_v42 = vld [vmem:[%s2432_s29 + $0x88] sm:$0xf] }
  0x36   : > { %v2626_v9 = vcombine.low %v409_v48, %v419_v57  ;;  %v484_v10 = vrot.slane %v482_v51, 4  ;;  %v2630_v11 = vrot.slane %v493_v4, 4  ;;  %v428_v12 = vrot.slane %v427_v1, 4  ;;  %v254_v57 = vld [vmem:[%s2432_s29 + $0x90] sm:$0xf] }
  0x37   : > { %v438_v13 = vrot.slane %v437_v2, 4  ;;  %v2635_v15 = vrot.slane %v496_v55, 5  ;;  %v442_v17 = vrot.slane %v440_v47, 5  ;;  %v517_v19 = vshrl.u32 %v248_v5, 16 }
  0x38   : > { %2084 = vmatmul.mubr.msk.bf16.gmra.mrb[8].mxu1 %vm725_vm0, %v2626_v9  ;;  %v2637_v21 = vcombine.low %v248_v5, %v249_v59  ;;  %v2639_v23 = vrot.slane %v502_v61, 5  ;;  %v508_v27 = vrot.slane %v506_v63, 4  ;;  %v433_v20 = vsel %vm2492_vm3, %v428_v12, %v2576_v18  ;;  %v255_v63 = vld [vmem:[%s2432_s29 + $0x94] sm:$0xf] }
  0x39   : > { %v451_v28 = vor.u32 %v2587_v3, %v2582_v22  ;;  %v443_v39 = vsel %vm2492_vm3, %v438_v13, %v442_v17  ;;  %v520_v40 = vshll.u32 %v248_v5, 16  ;;  %v461_v24 = vor.u32 %v460_v38, %v2591_v33 }
  0x3a   : > { %2164 = vmatmul.mubr.msk.bf16.gmra.mrb[16].mxu0 %vm725_vm0, %v2637_v21  ;;  %v464_v29 = vshll.u32 %v241_v62, 16  ;;  %v2653_v44 = vcombine.low %v433_v20, %v443_v39  ;;  %v526_v45 = vshll.u32 %v249_v59, 16  ;;  %v530_v18 = vshrl.u32 %v249_v59, 16  ;;  %v257_v39 = vld [vmem:[%s2432_s29 + $0x9c] sm:$0xf] }
  0x3b   : > { %v452_v49 = vrot.slane %v451_v28, 4  ;;  %v2655_v22 = vrot.slane %v517_v19, 4  ;;  %v462_v3 = vrot.slane %v461_v24, 4  ;;  %v541_v51 = vshrl.u32 %v251_v30, 16 }
  0x3c   : > { %v466_v35 = vrot.slane %v464_v29, 5  ;;  %2087 = vmatprep.mubr.msk.bf16.mxu1 %vm725_vm0, %v2653_v44  ;;  %v544_v52 = vshll.u32 %v251_v30, 16  ;;  %v550_v53 = vshll.u32 %v252_v42, 16  ;;  %v2663_v4 = vcombine.low %v251_v30, %v252_v42 }
  0x3d   : > { %v457_v38 = vsel %vm2492_vm3, %v452_v49, %v2591_v33  ;;  %v554_v48 = vshrl.u32 %v252_v42, 16  ;;  %v475_v55 = vor.u32 %v474_v6, %v2608_v43  ;;  %v485_v61 = vor.u32 %v484_v10, %v2624_v7  ;;  %v247_v43 = vld [vmem:[%s2432_s29 + $0x74] sm:$0x1] }
  0x3e   : > { %v467_v54 = vsel %vm2492_vm3, %v462_v3, %v466_v35  ;;  %v522_v1 = vrot.slane %v520_v40, 5  ;;  %v2671_v2 = vrot.slane %v526_v45, 5  ;;  %2167 = vmatprep.mubr.msk.bf16.mxu0 %vm725_vm0, %v2663_v4  ;;  %v488_v33 = vshll.u32 %v244_v41, 16  ;;  %v258_v45 = vld [vmem:[%s2432_s29 + $0xa0] sm:$0xf] }
  0x3f   : > { %v2673_v5 = vcombine.low %v457_v38, %v467_v54  ;;  %v532_v59 = vrot.slane %v530_v18, 4  ;;  %v2677_v47 = vrot.slane %v541_v51, 4  ;;  %v476_v12 = vrot.slane %v475_v55, 4  ;;  %v250_v41 = vld [vmem:[%s2432_s29 + $0x80] sm:$0x1] }
  0x40   : > { %v486_v13 = vrot.slane %v485_v61, 4  ;;  %v2682_v6 = vrot.slane %v544_v52, 5  ;;  %v490_v10 = vrot.slane %v488_v33, 5  ;;  %v565_v62 = vshrl.u32 %v254_v57, 16 }
  0x41   : > { %2088 = vmatmul.mubr.msk.bf16.gmra.mrb[12].mxu1 %vm725_vm0, %v2673_v5  ;;  %v2684_v17 = vcombine.low %v254_v57, %v255_v63  ;;  %v2686_v19 = vrot.slane %v550_v53, 5  ;;  %v2688_v20 = vrot.slane %v554_v48, 4  ;;  %v481_v28 = vsel %vm2492_vm3, %v476_v12, %v2624_v7 }
  0x42   : > { %v499_v30 = vor.u32 %v2635_v15, %v2630_v11  ;;  %v491_v40 = vsel %vm2492_vm3, %v486_v13, %v490_v10  ;;  %v568_v24 = vshll.u32 %v254_v57, 16  ;;  %v509_v29 = vor.u32 %v508_v27, %v2639_v23  ;;  %v260_v57 = vld [vmem:[%s2432_s29 + $0xa8] sm:$0xf] }
  0x43   : > { %2168 = vmatmul.mubr.msk.bf16.gmra.mrb[20].mxu0 %vm725_vm0, %v2684_v17  ;;  %v512_v42 = vshll.u32 %v247_v43, 16  ;;  %v2702_v18 = vcombine.low %v481_v28, %v491_v40  ;;  %v574_v49 = vshll.u32 %v255_v63, 16  ;;  %v578_v7 = vshrl.u32 %v255_v63, 16  ;;  %v261_v63 = vld [vmem:[%s2432_s29 + $0xac] sm:$0xf] }
  0x44   : > { %v500_v3 = vrot.slane %v499_v30, 4  ;;  %v2704_v11 = vrot.slane %v565_v62, 4  ;;  %v510_v15 = vrot.slane %v509_v29, 4  ;;  %v589_v51 = vshrl.u32 %v257_v39, 16 }
  0x45   : > { %v514_v35 = vrot.slane %v512_v42, 5  ;;  %2091 = vmatprep.mubr.msk.bf16.mxu1 %vm725_vm0, %v2702_v18  ;;  %v592_v38 = vshll.u32 %v257_v39, 16  ;;  %v598_v52 = vshll.u32 %v258_v45, 16  ;;  %v2712_v53 = vcombine.low %v257_v39, %v258_v45 }
  0x46   : > { %v505_v27 = vsel %vm2492_vm3, %v500_v3, %v2639_v23  ;;  %v602_v48 = vshrl.u32 %v258_v45, 16  ;;  %v523_v55 = vor.u32 %v522_v1, %v2655_v22  ;;  %v533_v61 = vor.u32 %v532_v59, %v2671_v2  ;;  %v253_v22 = vld [vmem:[%s2432_s29 + $0x8c] sm:$0x1]  ;;  %v263_v45 = vld [vmem:[%s2432_s29 + $0xb4] sm:$0xf] }
  0x47   : > { %v515_v54 = vsel %vm2492_vm3, %v510_v15, %v514_v35  ;;  %v570_v33 = vrot.slane %v568_v24, 5  ;;  %v2720_v12 = vrot.slane %v574_v49, 5  ;;  %2171 = vmatprep.mubr.msk.bf16.mxu0 %vm725_vm0, %v2712_v53  ;;  %v536_v23 = vshll.u32 %v250_v41, 16  ;;  %v264_v35 = vld [vmem:[%s2432_s29 + $0xb8] sm:$0xf] }
  0x48   : > { %v2722_v13 = vcombine.low %v505_v27, %v515_v54  ;;  %v580_v43 = vrot.slane %v578_v7, 4  ;;  %v2726_v10 = vrot.slane %v589_v51, 4  ;;  %v524_v62 = vrot.slane %v523_v55, 4  ;;  %v256_v51 = vld [vmem:[%s2432_s29 + $0x98] sm:$0x1] }
  0x49   : > { %v534_v28 = vrot.slane %v533_v61, 4  ;;  %v594_v1 = vrot.slane %v592_v38, 5  ;;  %v538_v59 = vrot.slane %v536_v23, 5  ;;  %v613_v30 = vshrl.u32 %v260_v57, 16  ;;  %v2755_v55 = vld [vmem:[%s2432_s29 + $0xc4] sm:$0xf] }
  0x4a   : > { %2092 = vmatmul.mubr.msk.bf16.gmra.mrb[16].mxu1 %vm725_vm0, %v2722_v13  ;;  %v2731_v39 = vcombine.low %v260_v57, %v261_v63  ;;  %v2733_v40 = vrot.slane %v598_v52, 5  ;;  %v604_v24 = vrot.slane %v602_v48, 4  ;;  %v529_v29 = vsel %vm2492_vm3, %v524_v62, %v2671_v2 }
  0x4b   : > { %v547_v42 = vor.u32 %v2682_v6, %v2677_v47  ;;  %v539_v49 = vsel %vm2492_vm3, %v534_v28, %v538_v59  ;;  %v616_v7 = vshll.u32 %v260_v57, 16  ;;  %v557_v3 = vor.u32 %v2688_v20, %v2686_v19  ;;  %v2752_v6 = vld [vmem:[%s2432_s29 + $0xc0] sm:$0xf] }
  0x4c   : > { %2172 = vmatmul.mubr.msk.bf16.gmra.mrb[24].mxu0 %vm725_vm0, %v2731_v39  ;;  %v560_v15 = vshll.u32 %v253_v22, 16  ;;  %v2749_v41 = vcombine.low %v529_v29, %v539_v49  ;;  %v622_v2 = vshll.u32 %v261_v63, 16  ;;  %v626_v27 = vshrl.u32 %v261_v63, 16 }
  0x4d   : > { %v548_v47 = vrot.slane %v547_v42, 4  ;;  %v615_v38 = vrot.slane %v613_v30, 4  ;;  %v558_v52 = vrot.slane %v557_v3, 4  ;;  %v637_v48 = vshrl.u32 %v263_v45, 16 }
  0x4e   : > { %v562_v54 = vrot.slane %v560_v15, 5  ;;  %2095 = vmatprep.mubr.msk.bf16.mxu1 %vm725_vm0, %v2749_v41  ;;  %v640_v61 = vshll.u32 %v263_v45, 16  ;;  %v646_v57 = vshll.u32 %v264_v35, 16  ;;  %v2762_v63 = vcombine.low %v263_v45, %v264_v35  ;;  %v259_v15 = vld [vmem:[%s2432_s29 + $0xa4] sm:$0x1] }
  0x4f   : > { %v553_v20 = vsel %vm2492_vm3, %v548_v47, %v2686_v19  ;;  %v650_v62 = vshrl.u32 %v264_v35, 16  ;;  %v571_v28 = vor.u32 %v570_v33, %v2704_v11  ;;  %v581_v22 = vor.u32 %v580_v43, %v2720_v12 }
  0x50   : > { %v563_v23 = vsel %vm2492_vm3, %v558_v52, %v562_v54  ;;  %v618_v59 = vrot.slane %v616_v7, 5  ;;  %2175 = vmatprep.mubr.msk.bf16.mxu0 %vm725_vm0, %v2762_v63  ;;  %v584_v19 = vshll.u32 %v256_v51, 16  ;;  %v1954_v29 = vcombine.low %v2752_v6, %v2755_v55 }
  0x51   : > { %v2768_v30 = vcombine.low %v553_v20, %v563_v23  ;;  %v624_v42 = vrot.slane %v622_v2, 5  ;;  %v628_v45 = vrot.slane %v626_v27, 4  ;;  %v572_v49 = vrot.slane %v571_v28, 4  ;;  %v262_v27 = vld [vmem:[%s2432_s29 + $0xb0] sm:$0x1] }
  0x52   : > { %v582_v3 = vrot.slane %v581_v22, 4  ;;  %v639_v11 = vrot.slane %v637_v48, 4  ;;  %v642_v33 = vrot.slane %v640_v61, 5  ;;  %v586_v43 = vrot.slane %v584_v19, 5 }
  0x53   : > { %2096 = vmatmul.mubr.msk.bf16.gmra.mrb[20].mxu1 %vm725_vm0, %v2768_v30  ;;  %v595_v7 = vor.u32 %v594_v1, %v2726_v10  ;;  %v648_v35 = vrot.slane %v646_v57, 5  ;;  %v652_v51 = vrot.slane %v650_v62, 4  ;;  %v577_v47 = vsel %vm2492_vm3, %v572_v49, %v2720_v12  ;;  %v265_v10 = vld [vmem:[%s2432_s29 + $0xbc] sm:$0x1] }
  0x54   : > { %2176 = vmatmul.mubr.msk.bf16.gmra.mrb[28].mxu0 %vm725_vm0, %v1954_v29  ;;  %v605_v2 = vor.u32 %v604_v24, %v2733_v40  ;;  %v587_v52 = vsel %vm2492_vm3, %v582_v3, %v586_v43  ;;  %v608_v48 = vshll.u32 %v259_v15, 16  ;;  %v619_v61 = vor.u32 %v618_v59, %v615_v38 }
  0x55   : > { %v596_v54 = vrot.slane %v595_v7, 4  ;;  %2183 = vmatprep.mubr.msk.bf16.mxu0 %vm725_vm0, %v2525_v37  ;;  %v1894_v1 = vcombine.low %v577_v47, %v587_v52  ;;  %v629_v57 = vor.u32 %v628_v45, %v624_v42  ;;  %v632_v24 = vshll.u32 %v262_v27, 16 }
  0x56   : > { %v606_v20 = vrot.slane %v605_v2, 4  ;;  %v610_v23 = vrot.slane %v608_v48, 5  ;;  %v643_v62 = vor.u32 %v642_v33, %v639_v11  ;;  %v620_v28 = vrot.slane %v619_v61, 4 }
  0x57   : > { %v601_v12 = vsel %vm2492_vm3, %v596_v54, %v2733_v40  ;;  %2099 = vmatprep.mubr.msk.bf16.mxu1 %vm725_vm0, %v1894_v1  ;;  %v630_v22 = vrot.slane %v629_v57, 4  ;;  %v653_v19 = vor.u32 %v652_v51, %v648_v35  ;;  %v656_v29 = vshll.u32 %v265_v10, 16 }
  0x58   : > { %v611_v37 = vsel %vm2492_vm3, %v606_v20, %v610_v23  ;;  %v634_v49 = vrot.slane %v632_v24, 5  ;;  %v644_v3 = vrot.slane %v643_v62, 4  ;;  %v1916_v38 = vcombine.low %v2455_v26, %v2463_v31 }
  0x59   : > { %v1895_v59 = vcombine.low %v601_v12, %v611_v37  ;;  %v625_v40 = vsel %vm2492_vm3, %v620_v28, %v624_v42  ;;  %v654_v45 = vrot.slane %v653_v19, 4  ;;  %v658_v15 = vrot.slane %v656_v29, 5 }
  0x5a   : > { %v635_v11 = vsel %vm2492_vm3, %v630_v22, %v634_v49  ;;  %v649_v43 = vsel %vm2492_vm3, %v644_v3, %v648_v35  ;;  %v2370_v48 = vmov 0.0  }
  0x5b   : > { %2100 = vmatmul.mubr.msk.bf16.gmra.mrb[24].mxu1 %vm725_vm0, %v1895_v59  ;;  %v1896_v33 = vcombine.low %v625_v40, %v635_v11  ;;  %v659_v26 = vsel %vm2492_vm3, %v654_v45, %v658_v15  ;;  %1711 = vst.msk [vmem:[%s2887_s19 + $0x2] sm:$0x3f] %vm1710_vm5, %v2370_v48 }
  0x5c   : > { %2184 = vmatmul.mubr.msk.bf16.vlgmr.msra.gmra.mrb[0].mxu0 %vm725_vm0, %v2558_v34  ;;  %v1897_v31 = vcombine.low %v649_v43, %v659_v26  ;;  %v1404_v34 = vshrl.u32 %v2755_v55, 16 }
  0x5d   : > { %2187 = vmatprep.mubr.msk.bf16.mxu0 %vm725_vm0, %v2578_v58  ;;  %2103 = vmatprep.mubr.msk.bf16.mxu1 %vm725_vm0, %v1896_v33 }
  0x63   : > { %2104 = vmatmul.mubr.msk.bf16.gmra.mrb[28].mxu1 %vm725_vm0, %v1897_v31 }
  0x64   : > { %2188 = vmatmul.mubr.msk.bf16.gmra.mrb[4].mxu0 %vm725_vm0, %v2606_v50  ;;  %2111 = vmatprep.mubr.msk.bf16.mxu1 %vm725_vm0, %v1916_v38  ;;  %v1406_v50 = vrot.slane %v1404_v34, 4 }
  0x65   : > { %2191 = vmatprep.mubr.msk.bf16.mxu0 %vm725_vm0, %v2626_v9  ;;  %v268_v9 = vld [vmem:[%s2432_s29 + $0xc8] sm:$0x1] }
  0x6b   : > { %2112 = vmatmul.mubr.msk.bf16.vlgmr.msra.gmra.mrb[0].mxu1 %vm725_vm0, %v2441_v14  ;;  %v1391_v14 = vshrl.u32 %v2752_v6, 16 }
  0x6c   : > { %2192 = vmatmul.mubr.msk.bf16.gmra.mrb[8].mxu0 %vm725_vm0, %v2653_v44  ;;  %2115 = vmatprep.mubr.msk.bf16.mxu1 %vm725_vm0, %v2452_v25  ;;  %v1394_v25 = vshll.u32 %v2752_v6, 16 }
  0x6d   : > { %2195 = vmatprep.mubr.msk.bf16.mxu0 %vm725_vm0, %v2673_v5  ;;  %v1410_v5 = vshll.u32 %v268_v9, 16 }
  0x6e   : > { %v1396_v58 = vrot.slane %v1394_v25, 5 }
  0x73   : > { %2116 = vmatmul.mubr.msk.bf16.gmra.mrb[4].mxu1 %vm725_vm0, %v2471_v36  ;;  %v1400_v36 = vshll.u32 %v2755_v55, 16 }
  0x74   : > { %2196 = vmatmul.mubr.msk.bf16.gmra.mrb[12].mxu0 %vm725_vm0, %v2702_v18  ;;  %2119 = vmatprep.mubr.msk.bf16.mxu1 %vm725_vm0, %v2496_v0  ;;  %v1393_v0 = vrot.slane %v1391_v14, 4 }
  0x75   : > { %2199 = vmatprep.mubr.msk.bf16.mxu0 %vm725_vm0, %v2722_v13 }
  0x76   : > { %v1397_v44 = vor.u32 %v1396_v58, %v1393_v0 }
  0x78   : > { %v1398_v18 = vrot.slane %v1397_v44, 4 }
  0x7b   : > { %2120 = vmatmul.mubr.msk.bf16.gmra.mrb[8].mxu1 %vm725_vm0, %v2507_v16  ;;  %v1402_v16 = vrot.slane %v1400_v36, 5 }
  0x7c   : > { %2200 = vmatmul.mubr.msk.bf16.gmra.mrb[16].mxu0 %vm725_vm0, %v2749_v41  ;;  %2123 = vmatprep.mubr.msk.bf16.mxu1 %vm725_vm0, %v2538_v46  ;;  %v1412_v41 = vrot.slane %v1410_v5, 5 }
  0x7d   : > { %2203 = vmatprep.mubr.msk.bf16.mxu0 %vm725_vm0, %v2768_v30  ;;  %v1407_v46 = vor.u32 %v1406_v50, %v1402_v16 }
  0x7f   : > { %v1408_v13 = vrot.slane %v1407_v46, 4 }
  0x83   : > { %2124 = vmatmul.mubr.msk.bf16.gmra.mrb[12].mxu1 %vm725_vm0, %v2568_v8  ;;  %v1403_v8 = vsel %vm2492_vm3, %v1398_v18, %v1402_v16 }
  0x84   : > { %2204 = vmatmul.mubr.msk.bf16.gmra.mrb[20].mxu0 %vm725_vm0, %v1894_v1  ;;  %2127 = vmatprep.mubr.msk.bf16.mxu1 %vm725_vm0, %v2589_v32  ;;  %v1413_v32 = vsel %vm2492_vm3, %v1408_v13, %v1412_v41 }
  0x85   : > { %2207 = vmatprep.mubr.msk.bf16.mxu0 %vm725_vm0, %v1895_v59  ;;  %v1977_v6 = vcombine.low %v1403_v8, %v1413_v32 }
  0x8b   : > { %2128 = vmatmul.mubr.msk.bf16.gmra.mrb[16].mxu1 %vm725_vm0, %v2616_v56 }
  0x8c   : > { %2208 = vmatmul.mubr.msk.bf16.gmra.mrb[24].mxu0 %vm725_vm0, %v1896_v33  ;;  %2131 = vmatprep.mubr.msk.bf16.mxu1 %vm725_vm0, %v2637_v21 }
  0x8d   : > { %2211 = vmatprep.mubr.msk.bf16.mxu0 %vm725_vm0, %v1897_v31 }
  0x93   : > { %2132 = vmatmul.mubr.msk.bf16.gmra.mrb[20].mxu1 %vm725_vm0, %v2663_v4 }
  0x94   : > { %2212 = vmatmul.mubr.msk.bf16.gmra.mrb[28].mxu0 %vm725_vm0, %v1977_v6  ;;  %2135 = vmatprep.mubr.msk.bf16.mxu1 %vm725_vm0, %v2684_v17 }
  0x9b   : > { %2136 = vmatmul.mubr.msk.bf16.gmra.mrb[24].mxu1 %vm725_vm0, %v2712_v53 }
  0x9c   : > { %2139 = vmatprep.mubr.msk.bf16.mxu1 %vm725_vm0, %v2731_v39 }
  0xa3   : > { %2140 = vmatmul.mubr.msk.bf16.gmra.mrb[28].mxu1 %vm725_vm0, %v2762_v63 }
 0x12f   : > { %v2185_v60 = vpop.f32.mrb[0].mxu0 }
 0x130   : > { %v1471_v56 = vpop.f32.mrb[1].mxu0 }
 0x131   : > { %v2186_v21 = vpop.f32.mrb[2].mxu0 }
 0x132   : > { %v1474_v55 = vpop.f32.mrb[3].mxu0 }
 0x137   : > { %v2189_v30 = vpop.f32.mrb[4].mxu0 }
 0x138   : > { %v1485_v4 = vpop.f32.mrb[5].mxu0 }
 0x139   : > { %v2190_v42 = vpop.f32.mrb[6].mxu0 }
 0x13a   : > { %v1488_v7 = vpop.f32.mrb[7].mxu0 }
 0x13e   : > { %v2113_v17 = vpop.f32.mrb[0].mxu1 }
 0x13f   : > { %v2193_v35 = vpop.f32.mrb[8].mxu0  ;;  %v2875_v51 = vadd.f32 %v2185_v60, %v2113_v17  ;;  %v1093_v53 = vpop.f32.mrb[1].mxu1 }
 0x140   : > { %v1499_v47 = vpop.f32.mrb[9].mxu0  ;;  %v2882_v39 = vadd.f32 %v1471_v56, %v1093_v53  ;;  %v2114_v63 = vpop.f32.mrb[2].mxu1 }
 0x141   : > { %v2194_v2 = vpop.f32.mrb[10].mxu0  ;;  %v1713_v27 = vpack.c.bf16 %v2875_v51, %v2875_v51  ;;  %v1096_v52 = vpop.f32.mrb[3].mxu1  ;;  %v1600_v23 = vsel %vm1598_vm6, %v2875_v51, 0.0 }
 0x142   : > { %v1502_v54 = vpop.f32.mrb[11].mxu0  ;;  %v1712_v10 = vpack.c.bf16 %v2882_v39, %v2882_v39  ;;  %v1599_v24 = vsel %vm1598_vm6, %v2882_v39, 0.0 }
 0x143   : > { %1730 = vst.msk [vmem:[%s2880_s17 + $0x4] sm:$0xf] %vm1728_vm4, %v1713_v27  ;;  %v1601_v38 = vadd.f32 %v1600_v23, %v1599_v24 }
 0x144   : > { %1729 = vst.msk [vmem:[%s2880_s17] sm:$0xf] %vm1728_vm4, %v1712_v10 }
 0x146   : > { %v2117_v1 = vpop.f32.mrb[4].mxu1 }
 0x147   : > { %v2197_v20 = vpop.f32.mrb[12].mxu0  ;;  %v2898_v61 = vadd.f32 %v2189_v30, %v2117_v1  ;;  %v1107_v57 = vpop.f32.mrb[5].mxu1 }
 0x148   : > { %v1513_v12 = vpop.f32.mrb[13].mxu0  ;;  %v2904_v62 = vadd.f32 %v1485_v4, %v1107_v57  ;;  %v2118_v28 = vpop.f32.mrb[6].mxu1 }
 0x149   : > { %v2198_v22 = vpop.f32.mrb[14].mxu0  ;;  %v1715_v19 = vpack.c.bf16 %v2898_v61, %v2898_v61  ;;  %v1110_v29 = vpop.f32.mrb[7].mxu1  ;;  %v1604_v43 = vsel %vm1598_vm6, %v2898_v61, 0.0 }
 0x14a   : > { %v1516_v37 = vpop.f32.mrb[15].mxu0  ;;  %v1602_v49 = vsel %vm1598_vm6, %v2904_v62, 0.0  ;;  %v1714_v3 = vpack.c.bf16 %v2904_v62, %v2904_v62 }
 0x14b   : > { %1732 = vst.msk [vmem:[%s2880_s17 + $0xc] sm:$0xf] %vm1728_vm4, %v1715_v19  ;;  %v1603_v59 = vadd.f32 %v1602_v49, %v1601_v38 }
 0x14c   : > { %1731 = vst.msk [vmem:[%s2880_s17 + $0x8] sm:$0xf] %vm1728_vm4, %v1714_v3 }
 0x14d   : > { %v1605_v36 = vadd.f32 %v1604_v43, %v1603_v59 }
 0x14e   : > { %v2121_v40 = vpop.f32.mrb[8].mxu1 }
 0x14f   : > { %v2201_v45 = vpop.f32.mrb[16].mxu0  ;;  %v2916_v15 = vadd.f32 %v2193_v35, %v2121_v40  ;;  %v1121_v11 = vpop.f32.mrb[9].mxu1 }
 0x150   : > { %v1527_v33 = vpop.f32.mrb[17].mxu0  ;;  %v2920_v26 = vadd.f32 %v1499_v47, %v1121_v11  ;;  %v2122_v31 = vpop.f32.mrb[10].mxu1 }
 0x151   : > { %v2202_v14 = vpop.f32.mrb[18].mxu0  ;;  %v1717_v25 = vpack.c.bf16 %v2916_v15, %v2916_v15  ;;  %v1124_v34 = vpop.f32.mrb[11].mxu1  ;;  %v1608_v9 = vsel %vm1598_vm6, %v2916_v15, 0.0 }
 0x152   : > { %v1530_v0 = vpop.f32.mrb[19].mxu0  ;;  %v1606_v58 = vsel %vm1598_vm6, %v2920_v26, 0.0  ;;  %v1716_v16 = vpack.c.bf16 %v2920_v26, %v2920_v26 }
 0x153   : > { %1734 = vst.msk [vmem:[%s2880_s17 + $0x14] sm:$0xf] %vm1728_vm4, %v1717_v25  ;;  %v1607_v50 = vadd.f32 %v1606_v58, %v1605_v36 }
 0x154   : > { %1733 = vst.msk [vmem:[%s2880_s17 + $0x10] sm:$0xf] %vm1728_vm4, %v1716_v16 }
 0x155   : > { %v1609_v44 = vadd.f32 %v1608_v9, %v1607_v50 }
 0x156   : > { %v2125_v46 = vpop.f32.mrb[12].mxu1 }
 0x157   : > { %v2205_v5 = vpop.f32.mrb[20].mxu0  ;;  %v2934_v18 = vadd.f32 %v2197_v20, %v2125_v46  ;;  %v1135_v13 = vpop.f32.mrb[13].mxu1 }
 0x158   : > { %v1541_v41 = vpop.f32.mrb[21].mxu0  ;;  %v2936_v8 = vadd.f32 %v1513_v12, %v1135_v13  ;;  %v2126_v32 = vpop.f32.mrb[14].mxu1 }
 0x159   : > { %v2206_v6 = vpop.f32.mrb[22].mxu0  ;;  %v1719_v60 = vpack.c.bf16 %v2934_v18, %v2934_v18  ;;  %v1138_v56 = vpop.f32.mrb[15].mxu1  ;;  %v1612_v42 = vsel %vm1598_vm6, %v2934_v18, 0.0 }
 0x15a   : > { %v1544_v21 = vpop.f32.mrb[23].mxu0  ;;  %v1610_v55 = vsel %vm1598_vm6, %v2936_v8, 0.0  ;;  %v1718_v30 = vpack.c.bf16 %v2936_v8, %v2936_v8 }
 0x15b   : > { %1736 = vst.msk [vmem:[%s2880_s17 + $0x1c] sm:$0xf] %vm1728_vm4, %v1719_v60  ;;  %v1611_v4 = vadd.f32 %v1610_v55, %v1609_v44 }
 0x15c   : > { %1735 = vst.msk [vmem:[%s2880_s17 + $0x18] sm:$0xf] %vm1728_vm4, %v1718_v30 }
 0x15d   : > { %v1613_v7 = vadd.f32 %v1612_v42, %v1611_v4 }
 0x15e   : > { %v2129_v17 = vpop.f32.mrb[16].mxu1 }
 0x15f   : > { %v2209_v35 = vpop.f32.mrb[24].mxu0  ;;  %v2950_v53 = vadd.f32 %v2201_v45, %v2129_v17  ;;  %v1149_v47 = vpop.f32.mrb[17].mxu1 }
 0x160   : > { %v1555_v63 = vpop.f32.mrb[25].mxu0  ;;  %v2952_v2 = vadd.f32 %v1527_v33, %v1149_v47  ;;  %v2130_v27 = vpop.f32.mrb[18].mxu1 }
 0x161   : > { %v2210_v52 = vpop.f32.mrb[26].mxu0  ;;  %v1721_v54 = vpack.c.bf16 %v2950_v53, %v2950_v53  ;;  %v1152_v48 = vpop.f32.mrb[19].mxu1  ;;  %v1616_v12 = vsel %vm1598_vm6, %v2950_v53, 0.0 }
 0x162   : > { %v1558_v10 = vpop.f32.mrb[27].mxu0  ;;  %v1614_v1 = vsel %vm1598_vm6, %v2952_v2, 0.0  ;;  %v1720_v20 = vpack.c.bf16 %v2952_v2, %v2952_v2 }
 0x163   : > { %1738 = vst.msk [vmem:[%s2880_s17 + $0x24] sm:$0xf] %vm1728_vm4, %v1721_v54  ;;  %v1615_v57 = vadd.f32 %v1614_v1, %v1613_v7 }
 0x164   : > { %1737 = vst.msk [vmem:[%s2880_s17 + $0x20] sm:$0xf] %vm1728_vm4, %v1720_v20 }
 0x165   : > { %v1617_v23 = vadd.f32 %v1616_v12, %v1615_v57 }
 0x166   : > { %v2133_v24 = vpop.f32.mrb[20].mxu1 }
 0x167   : > { %v2213_v28 = vpop.f32.mrb[28].mxu0  ;;  %v2966_v22 = vadd.f32 %v2205_v5, %v2133_v24  ;;  %v1163_v19 = vpop.f32.mrb[21].mxu1 }
 0x168   : > { %v1569_v29 = vpop.f32.mrb[29].mxu0  ;;  %v2226_v37 = vadd.f32 %v1541_v41, %v1163_v19  ;;  %v2134_v49 = vpop.f32.mrb[22].mxu1 }
 0x169   : > { %v2214_v3 = vpop.f32.mrb[30].mxu0  ;;  %v1723_v38 = vpack.c.bf16 %v2966_v22, %v2966_v22  ;;  %v1166_v59 = vpop.f32.mrb[23].mxu1  ;;  %v1620_v43 = vsel %vm1598_vm6, %v2966_v22, 0.0 }
 0x16a   : > { %v1572_v40 = vpop.f32.mrb[31].mxu0  ;;  %v1618_v45 = vsel %vm1598_vm6, %v2226_v37, 0.0  ;;  %v1722_v11 = vpack.c.bf16 %v2226_v37, %v2226_v37 }
 0x16b   : > { %1740 = vst.msk [vmem:[%s2880_s17 + $0x2c] sm:$0xf] %vm1728_vm4, %v1723_v38  ;;  %v1619_v33 = vadd.f32 %v1618_v45, %v1617_v23 }
 0x16c   : > { %1739 = vst.msk [vmem:[%s2880_s17 + $0x28] sm:$0xf] %vm1728_vm4, %v1722_v11 }
 0x16d   : > { %v1621_v31 = vadd.f32 %v1620_v43, %v1619_v33 }
 0x16e   : > { %v2137_v14 = vpop.f32.mrb[24].mxu1 }
 0x16f   : > { %v2227_v25 = vadd.f32 %v2209_v35, %v2137_v14  ;;  %v1177_v36 = vpop.f32.mrb[25].mxu1 }
 0x170   : > { %v2228_v34 = vadd.f32 %v1555_v63, %v1177_v36  ;;  %v2138_v0 = vpop.f32.mrb[26].mxu1 }
 0x171   : > { %v1725_v58 = vpack.c.bf16 %v2227_v25, %v2227_v25  ;;  %v1180_v16 = vpop.f32.mrb[27].mxu1  ;;  %v1624_v46 = vsel %vm1598_vm6, %v2227_v25, 0.0 }
 0x172   : > { %v1622_v50 = vsel %vm1598_vm6, %v2228_v34, 0.0  ;;  %v1724_v9 = vpack.c.bf16 %v2228_v34, %v2228_v34 }
 0x173   : > { %1742 = vst.msk [vmem:[%s2880_s17 + $0x34] sm:$0xf] %vm1728_vm4, %v1725_v58  ;;  %v1623_v44 = vadd.f32 %v1622_v50, %v1621_v31 }
 0x174   : > { %1741 = vst.msk [vmem:[%s2880_s17 + $0x30] sm:$0xf] %vm1728_vm4, %v1724_v9 }
 0x175   : > { %v1625_v5 = vadd.f32 %v1624_v46, %v1623_v44 }
 0x176   : > { %v2141_v13 = vpop.f32.mrb[28].mxu1 }
 0x177   : > { %v2229_v41 = vadd.f32 %v2213_v28, %v2141_v13  ;;  %v1191_v32 = vpop.f32.mrb[29].mxu1 }
 0x178   : > { %v2230_v6 = vadd.f32 %v1569_v29, %v1191_v32  ;;  %v2142_v60 = vpop.f32.mrb[30].mxu1 }
 0x179   : > { %v1727_v56 = vpack.c.bf16 %v2229_v41, %v2229_v41  ;;  %v1194_v21 = vpop.f32.mrb[31].mxu1  ;;  %v1628_v42 = vsel %vm1598_vm6, %v2229_v41, 0.0 }
 0x17a   : > { %v1626_v55 = vsel %vm1598_vm6, %v2230_v6, 0.0  ;;  %v1726_v30 = vpack.c.bf16 %v2230_v6, %v2230_v6 }
 0x17b   : > { %1744 = vst.msk [vmem:[%s2880_s17 + $0x3c] sm:$0xf] %vm1728_vm4, %v1727_v56  ;;  %v1627_v4 = vadd.f32 %v1626_v55, %v1625_v5 }
 0x17c   : > { %1743 = vst.msk [vmem:[%s2880_s17 + $0x38] sm:$0xf] %vm1728_vm4, %v1726_v30 }
 0x17d   : > { %v1629_v7 = vadd.f32 %v1628_v42, %v1627_v4 }
 0x17f   : > { %v1630_v17 = vrot.slane %v1629_v7, 4 }
 0x181   : > { %v1631_v35 = vadd.f32 %v1630_v17, %v1629_v7 }
 0x183   : > { %v1632_v47 = vrot.slane %v1631_v35, 2 }
 0x185   : > { %v1633_v63 = vadd.f32 %v1632_v47, %v1631_v35 }
 0x187   : > { %v1634_v27 = vrot.slane %v1633_v63, 1 }
 0x189   : > { %v1635_v52 = vadd.f32 %v1634_v27, %v1633_v63 }
 0x18b   : > { %v1637_v54 = vmul.f32 0.0078125, %v1635_v52  ;;  %1708 = vst.msk [vmem:[%s2887_s19] sm:$0x1] %vm1707_vm7, %v1635_v52 }
 0x18d   : > { %v1638_v48 = vsub.f32 %v2882_v39, %v1637_v54  ;;  %v1639_v10 = vsub.f32 %v2875_v51, %v1637_v54  ;;  %v1640_v1 = vsub.f32 %v2904_v62, %v1637_v54  ;;  %v1642_v20 = vsub.f32 %v2920_v26, %v1637_v54 }
 0x18e   : > { %v1643_v57 = vsub.f32 %v2916_v15, %v1637_v54  ;;  %v1644_v12 = vsub.f32 %v2936_v8, %v1637_v54  ;;  %v1645_v23 = vsub.f32 %v2934_v18, %v1637_v54  ;;  %v1646_v24 = vsub.f32 %v2952_v2, %v1637_v54 }
 0x18f   : > { %v1647_v28 = vsub.f32 %v2950_v53, %v1637_v54  ;;  %v1648_v19 = vsub.f32 %v2226_v37, %v1637_v54  ;;  %v1649_v29 = vsub.f32 %v2966_v22, %v1637_v54  ;;  %v1650_v39 = vsub.f32 %v2228_v34, %v1637_v54 }
 0x190   : > { %v1651_v49 = vsub.f32 %v2227_v25, %v1637_v54  ;;  %v1652_v51 = vsub.f32 %v2230_v6, %v1637_v54  ;;  %v1653_v3 = vsub.f32 %v2229_v41, %v1637_v54  ;;  %v1641_v62 = vsub.f32 %v2898_v61, %v1637_v54 }
 0x191   : > { %v1654_v26 = vmul.f32 %v1638_v48, %v1638_v48  ;;  %v1655_v38 = vmul.f32 %v1639_v10, %v1639_v10  ;;  %v1656_v15 = vmul.f32 %v1640_v1, %v1640_v1  ;;  %v1658_v40 = vmul.f32 %v1642_v20, %v1642_v20 }
 0x192   : > { %v1657_v59 = vmul.f32 %v1641_v62, %v1641_v62  ;;  %v1659_v22 = vmul.f32 %v1643_v57, %v1643_v57  ;;  %v1660_v33 = vmul.f32 %v1644_v12, %v1644_v12  ;;  %v1661_v31 = vmul.f32 %v1645_v23, %v1645_v23 }
 0x193   : > { %v1670_v8 = vsel %vm1598_vm6, %v1654_v26, 0.0  ;;  %v1671_v18 = vsel %vm1598_vm6, %v1655_v38, 0.0  ;;  %v1673_v53 = vsel %vm1598_vm6, %v1656_v15, 0.0  ;;  %v1677_v61 = vsel %vm1598_vm6, %v1658_v40, 0.0 }
 0x194   : > { %v1672_v2 = vadd.f32 %v1671_v18, %v1670_v8  ;;  %v1675_v45 = vsel %vm1598_vm6, %v1657_v59, 0.0  ;;  %v1679_v14 = vsel %vm1598_vm6, %v1659_v22, 0.0  ;;  %v1662_v36 = vmul.f32 %v1646_v24, %v1646_v24 }
 0x195   : > { %v1681_v34 = vsel %vm1598_vm6, %v1660_v33, 0.0  ;;  %v1663_v58 = vmul.f32 %v1647_v28, %v1647_v28  ;;  %v1683_v16 = vsel %vm1598_vm6, %v1661_v31, 0.0  ;;  %v1664_v9 = vmul.f32 %v1648_v19, %v1648_v19 }
 0x196   : > { %v1674_v37 = vadd.f32 %v1673_v53, %v1672_v2  ;;  %v1685_v44 = vsel %vm1598_vm6, %v1662_v36, 0.0  ;;  %v1665_v5 = vmul.f32 %v1649_v29, %v1649_v29  ;;  %v1666_v32 = vmul.f32 %v1650_v39, %v1650_v39 }
 0x197   : > { %v1687_v13 = vsel %vm1598_vm6, %v1663_v58, 0.0  ;;  %v1689_v6 = vsel %vm1598_vm6, %v1664_v9, 0.0  ;;  %v1667_v56 = vmul.f32 %v1651_v49, %v1651_v49  ;;  %v1668_v30 = vmul.f32 %v1652_v51, %v1652_v51 }
 0x198   : > { %v1676_v11 = vadd.f32 %v1675_v45, %v1674_v37  ;;  %v1691_v21 = vsel %vm1598_vm6, %v1665_v5, 0.0  ;;  %v1693_v4 = vsel %vm1598_vm6, %v1666_v32, 0.0  ;;  %v1669_v7 = vmul.f32 %v1653_v3, %v1653_v3 }
 0x199   : > { %v1695_v17 = vsel %vm1598_vm6, %v1667_v56, 0.0  ;;  %v1697_v47 = vsel %vm1598_vm6, %v1668_v30, 0.0 }
 0x19a   : > { %v1678_v43 = vadd.f32 %v1677_v61, %v1676_v11  ;;  %v1699_v27 = vsel %vm1598_vm6, %v1669_v7, 0.0 }
 0x19c   : > { %v1680_v25 = vadd.f32 %v1679_v14, %v1678_v43 }
 0x19e   : > { %v1682_v0 = vadd.f32 %v1681_v34, %v1680_v25 }
 0x1a0   : > { %v1684_v50 = vadd.f32 %v1683_v16, %v1682_v0 }
 0x1a2   : > { %v1686_v46 = vadd.f32 %v1685_v44, %v1684_v50 }
 0x1a4   : > { %v1688_v41 = vadd.f32 %v1687_v13, %v1686_v46 }
 0x1a6   : > { %v1690_v60 = vadd.f32 %v1689_v6, %v1688_v41 }
 0x1a8   : > { %v1692_v55 = vadd.f32 %v1691_v21, %v1690_v60 }
 0x1aa   : > { %v1694_v42 = vadd.f32 %v1693_v4, %v1692_v55 }
 0x1ac   : > { %v1696_v35 = vadd.f32 %v1695_v17, %v1694_v42 }
 0x1ae   : > { %v1698_v63 = vadd.f32 %v1697_v47, %v1696_v35 }
 0x1b0   : > { %v1700_v52 = vadd.f32 %v1699_v27, %v1698_v63 }
 0x1b2   : > { %v1701_v54 = vrot.slane %v1700_v52, 4 }
 0x1b4   : > { %v1702_v48 = vadd.f32 %v1701_v54, %v1700_v52 }
 0x1b6   : > { %v1703_v10 = vrot.slane %v1702_v48, 2 }
 0x1b8   : > { %v1704_v1 = vadd.f32 %v1703_v10, %v1702_v48 }
 0x1ba   : > { %v1705_v20 = vrot.slane %v1704_v1, 1 }
 0x1bc   : > { %v1706_v57 = vadd.f32 %v1705_v20, %v1704_v1 }
 0x1be   : > { %1709 = vst.msk [vmem:[%s2887_s19 + $0x1] sm:$0x1] %vm1707_vm7, %v1706_v57 }
 0x1bf PF: > { %s14_s14 = sadd.s32 1, %s2368_s14   ;;  %s3035_s12 = smov %s2364_s13 }
 0x1c0   : > { %p11_p5 = scmp.ge.s32.totalorder %s14_s14, 6   ;;  %s3036_s13 = smov %s3038_s15 }
 0x1c2   :  { %13 = sbr.rel (!%p11_p5) target bundleno = 2 (0x2), region = 74 }

// kernel: tile.23
= control target key start
LH: loop header
LB: loop body
LE: loop exit
PB: predicated region body
PF: predicated region fallthrough
CT: control target
= control target key end

     0   :  { %s22_s0 = inlined_call_operand.vmem [shape: f32[16], index: 0, kind: input, shape index: {}]   ;;  %s23_s1 = inlined_call_operand.vmem [shape: f32[4,16], index: 1, kind: output, shape index: {}]  }
   0x1   :  { %v4_v0 = vld [vmem:[%s22_s0] ss:$0 sm:$0xff] }
   0x2   :  { %5 = vst [vmem:[%s23_s1] sm:$0xf] %v4_v0 }

// kernel: tile.24
= control target key start
LH: loop header
LB: loop body
LE: loop exit
PB: predicated region body
PF: predicated region fallthrough
CT: control target
= control target key end

     0   :  { %vm7_vm0 = vcmask 130048   ;;  %s37_s8 = smov 16   ;;  %s38_s9 = smov 32   ;;  %vm13_vm1 = vcmask 523648   ;;  %vm19_vm2 = vcmask 392448   ;;  %vm25_vm3 = vcmask 261248   ;;  %s55_s0 = inlined_call_operand.vmem [shape: f32[4,16], index: 0, kind: input, shape index: {}]   ;;  %s56_s1 = inlined_call_operand.vmem [shape: f32[1,64], index: 1, kind: output, shape index: {}]  }
   0x1   :  { %v4_v0 = vld [vmem:[%s55_s0] sm:$0xf]  ;;  %s36_s0 = smov 48  }
   0x2   :  { %5 = vst [vmem:[#allocation1] sm:$0xf] %v4_v0 }
   0x9   :  { %v10_v1 = vld [vmem:[#allocation1 + $0x3] sm:$0x1]   ;;  %v22_v2 = vld [vmem:[#allocation1 + $0x1] sm:$0x1]   ;;  %v6_v3 = vld [vmem:[#allocation1] sm:$0x1]  }
   0xa   :  { %11 = vrot.lane.b32.xlu0 %v10_v1, %s36_s0  ;;  %23 = vrot.lane.b32.xlu1 %v22_v2, %s37_s8  ;;  %v16_v4 = vld [vmem:[#allocation1 + $0x2] sm:$0x1]   ;;  %8 = vst.msk [vmem:[#allocation0] sm:$0x1] %vm7_vm0, %v6_v3  }
   0xe   :  { %17 = vrot.lane.b32.xlu0 %v16_v4, %s38_s9 }
  0x7c   :  { %v12_v5 = vpop.permute.xlu0 %11   ;;  %v24_v6 = vpop.permute.xlu1 %23  }
  0x7d   :  { %14 = vst.msk [vmem:[#allocation0] sm:$0x1] %vm13_vm1, %v12_v5  }
  0x80   :  { %v18_v7 = vpop.permute.xlu0 %17  }
  0x81   :  { %20 = vst.msk [vmem:[#allocation0] sm:$0x1] %vm19_vm2, %v18_v7  }
  0x82   :  { %26 = vst.msk [vmem:[#allocation0] sm:$0x1] %vm25_vm3, %v24_v6  }
  0x89   :  { %v30_v8 = vld [vmem:[#allocation0] sm:$0x1] }
  0x8a   :  { %32 = vst [vmem:[%s56_s1] sm:$0x1] %v30_v8 }

// kernel: d_sty_forward.7
= control target key start
LH: loop header
LB: loop body
LE: loop exit
PB: predicated region body
PF: predicated region fallthrough
CT: control target
= control target key end

     0   :  { %s1749_s18 = smov 0   ;;  %s1751_s19 = smov 0   ;;  %s2084_s0 = inlined_call_operand.vmem [shape: bf16[4,9,17,64], index: 0, kind: input, shape index: {}]   ;;  %s2085_s1 = inlined_call_operand.vmem [shape: bf16[4,64,32], index: 1, kind: input, shape index: {}]   ;;  %s2086_s2 = inlined_call_operand.vmem [shape: f32[1,64], index: 2, kind: input, shape index: {}]   ;;  %s2087_s3 = inlined_call_operand.vmem [shape: f32[1,64], index: 3, kind: input, shape index: {}]   ;;  %s2088_s4 = inlined_call_operand.vmem [shape: bf16[4,8,4,32], index: 4, kind: output, shape index: {0}]   ;;  %s2089_s5 = inlined_call_operand.vmem [shape: f32[4,8,32], index: 5, kind: output, shape index: {1}]  }
   0x1   :  { %s1753_s20 = smov 0  }
   0x2 LB: > { %s28_s21 = sadd.s32 1, %s1712_s19  ;;  %p1362_p0 = scmp.ge.s32.totalorder %s1716_s20, 1  ;;  %s1716_s20 = sphi %s1753_s20, %s16_s20   ;;  %s1712_s19 = sphi %s1751_s19, %s2091_s19   ;;  %s1708_s18 = sphi %s1749_s18, %s2090_s18  }
   0x3   : > { %p30_p1 = scmp.ge.s32.totalorder %s28_s21, 4  ;;  %p206_p2 = scmp.lt.s32.totalorder %s1716_s20, 5 }
   0x5   : > { %s2093_s21 = smov (%p30_p1, %s28_s21), 0  ;;  %p207_p3 = pnand %p1362_p0, %p206_p2 }
   0x6   : > { %v1678_v0 = vld [vmem:[%s2085_s1 + $0x40] sm:$0xff] (!%p207_p3)   ;;  %p245_p4 = scmp.lt.s32.totalorder (!%p207_p3), %s1708_s18, 3  ;;  %v1679_v1 = vld [vmem:[%s2085_s1 + $0x48] sm:$0xff] (!%p207_p3)   ;;  %v1681_v3 = vld [vmem:[%s2085_s1 + $0x50] sm:$0xff] (!%p207_p3)   ;;  %vm631_vm0 = vcmask (!%p207_p3), 523264  }
   0x7   : > { %210 = sbr.rel (%p207_p3) target bundleno = 384 (0x180), region = 36  ;;  %1564 = vmatprep.subr.bf16.mxu0 (!%p207_p3), %v1678_v0  ;;  %v1680_v2 = vld [vmem:[%s2085_s1 + $0x20] sm:$0xff] (!%p207_p3)   ;;  %v1682_v4 = vld [vmem:[%s2085_s1 + $0x28] sm:$0xff] (!%p207_p3)   ;;  %v1684_v5 = vld [vmem:[%s2085_s1 + $0x30] sm:$0xff] (!%p207_p3)   ;;  %vm501_vm8 = vsmask.f32 (!%p207_p3), 7424 }
   0x8   : > { %1565 = vmatpush3.bf16.msra.mxu0 (!%p207_p3), %v1678_v0  ;;  %1516 = vmatprep.subr.bf16.mxu1 (!%p207_p3), %v1680_v2  ;;  %v1683_v6 = vld [vmem:[%s2085_s1 + $0x58] sm:$0xff] (!%p207_p3)   ;;  %v1800_v8 = vld [vmem:[%s2086_s2] ss:$0 sm:$0xff] (!%p207_p3)  ;;  %v1689_v51 = vld [vmem:[%s2085_s1 + $0x68] sm:$0xff] (!%p207_p3)  }
   0x9   : > { %1566 = vmatprep.subr.bf16.mxu0 (!%p207_p3), %v1679_v1  ;;  %1517 = vmatpush3.bf16.msra.mxu1 (!%p207_p3), %v1680_v2  ;;  %v1806_v12 = vld [vmem:[%s2087_s3] ss:$0 sm:$0xff] (!%p207_p3)  ;;  %v1685_v19 = vld [vmem:[%s2085_s1 + $0x38] sm:$0xff] (!%p207_p3)  }
   0xa   : > { %1518 = vmatprep.subr.bf16.mxu1 (!%p207_p3), %v1682_v4  ;;  %v1687_v29 = vld [vmem:[%s2085_s1 + $0x60] sm:$0xff] (!%p207_p3)  }
   0xb   : > { %v1831_v34 = vld [vmem:[%s2085_s1] sm:$0xff] (!%p207_p3)  }
   0xc   : > { %1567 = vmatpush3.bf16.msra.mxu0 (!%p207_p3), %v1679_v1 }
   0xd   : > { %1568 = vmatprep.subr.bf16.mxu0 (!%p207_p3), %v1681_v3  ;;  %1519 = vmatpush3.bf16.msra.mxu1 (!%p207_p3), %v1682_v4  ;;  %v1691_v4 = vld [vmem:[%s2085_s1 + $0x70] sm:$0xff] (!%p207_p3)  }
   0xe   : > { %s2095_s18 = smov (!%p245_p4, %s1708_s18), 3  ;;  %1520 = vmatprep.subr.bf16.mxu1 %v1684_v5 }
   0xf   : > { %s1652_s7 = smul.u32 108, %s2095_s18  ;;  %s1443_s24 = sshll.u32 %s2095_s18, 4 }
  0x10   : > { %1569 = vmatpush3.bf16.msra.mxu0 %v1681_v3  ;;  %s2027_s27 = scalar_lea.vmem %s2088_s4, %s1443_s24 }
  0x11   : > { %s1791_s12 = scalar_lea.vmem %s2084_s0, %s1652_s7  ;;  %1570 = vmatprep.subr.bf16.mxu0 %v1683_v6  ;;  %1521 = vmatpush3.bf16.msra.mxu1 %v1684_v5 }
  0x12   : > { %v275_v7 = vld [vmem:[%s1791_s12 + $0xc] sm:$0xff]   ;;  %v1464_v11 = vld [vmem:[%s1791_s12 + $0x18] sm:$0xff]   ;;  %v1445_v15 = vld [vmem:[%s1791_s12] sm:$0xff]   ;;  %1522 = vmatprep.subr.bf16.mxu1 %v1685_v19 }
  0x13   : > { %v302_v9 = vunpack.c.l.bf16 %v275_v7  ;;  %v303_v10 = vunpack.c.h.bf16 %v275_v7  ;;  %v1450_v13 = vunpack.c.l.bf16 %v1464_v11  ;;  %v1451_v14 = vunpack.c.h.bf16 %v1464_v11  ;;  %v274_v16 = vld [vmem:[%s1791_s12 + $0x8] sm:$0x1]  ;;  %v277_v30 = vld [vmem:[%s1791_s12 + $0x14] sm:$0x1] }
  0x14   : > { %v1446_v20 = vunpack.c.l.bf16 %v1445_v15  ;;  %v1447_v21 = vunpack.c.h.bf16 %v1445_v15  ;;  %v301_v24 = vunpack.c.l.bf16 %v274_v16  ;;  %v304_v35 = vunpack.c.l.bf16 %v277_v30  ;;  %1571 = vmatpush3.bf16.msra.mxu0 %v1683_v6  ;;  %v281_v48 = vld [vmem:[%s1791_s12 + $0x24] sm:$0xff]   ;;  %v1465_v59 = vld [vmem:[%s1791_s12 + $0x30] sm:$0xff]  }
  0x15   : > { %v336_v17 = vmul.f32 %v1800_v8, %v302_v9  ;;  %v337_v18 = vmul.f32 %v1800_v8, %v303_v10  ;;  %v339_v22 = vmul.f32 %v1450_v13, %v1800_v8  ;;  %v340_v23 = vmul.f32 %v1451_v14, %v1800_v8  ;;  %1588 = vmatprep.subr.bf16.mxu0 %v1687_v29 }
  0x16   : > { %v333_v27 = vmul.f32 %v1446_v20, %v1800_v8  ;;  %v334_v28 = vmul.f32 %v1447_v21, %v1800_v8  ;;  %v335_v33 = vmul.f32 %v1800_v8, %v301_v24  ;;  %1523 = vmatpush3.bf16.msra.mxu1 %v1685_v19  ;;  %v338_v54 = vmul.f32 %v1800_v8, %v304_v35  ;;  %v283_v35 = vld [vmem:[%s1791_s12 + $0x2c] sm:$0x1] }
  0x17   : > { %v370_v25 = vadd.f32 %v1806_v12, %v336_v17  ;;  %v371_v26 = vadd.f32 %v1806_v12, %v337_v18  ;;  %v373_v31 = vadd.f32 %v1806_v12, %v339_v22  ;;  %v374_v32 = vadd.f32 %v1806_v12, %v340_v23  ;;  %1540 = vmatprep.subr.bf16.mxu1 %v1831_v34  ;;  %v280_v22 = vld [vmem:[%s1791_s12 + $0x20] sm:$0x1]  ;;  %v1692_v23 = vld [vmem:[%s2085_s1 + $0x78] sm:$0xff]  }
  0x18   : > { %v367_v42 = vadd.f32 %v1806_v12, %v333_v27  ;;  %v368_v43 = vadd.f32 %v1806_v12, %v334_v28  ;;  %v369_v47 = vadd.f32 %v1806_v12, %v335_v33  ;;  %v308_v58 = vunpack.c.l.bf16 %v281_v48 }
  0x19   : > { %vm397_vm1 = vcmp.gt.f32.partialorder %v370_v25, 0.0  ;;  %vm398_vm2 = vcmp.gt.f32.partialorder %v371_v26, 0.0  ;;  %v424_v36 = vmul.f32 0.2, %v370_v25  ;;  %v425_v37 = vmul.f32 0.2, %v371_v26 }
  0x1a   : > { %vm400_vm3 = vcmp.gt.f32.partialorder %v373_v31, 0.0  ;;  %vm401_vm4 = vcmp.gt.f32.partialorder %v374_v32, 0.0  ;;  %v427_v38 = vmul.f32 0.2, %v373_v31  ;;  %v428_v39 = vmul.f32 0.2, %v374_v32 }
  0x1b   : > { %v451_v40 = vsel %vm397_vm1, %v370_v25, %v424_v36  ;;  %v452_v41 = vsel %vm398_vm2, %v371_v26, %v425_v37  ;;  %vm394_vm5 = vcmp.gt.f32.partialorder %v367_v42, 0.0  ;;  %vm395_vm6 = vcmp.gt.f32.partialorder %v368_v43, 0.0 }
  0x1c   : > { %v1835_v44 = vpack.c.bf16 %v452_v41, %v451_v40  ;;  %v454_v45 = vsel %vm400_vm3, %v373_v31, %v427_v38  ;;  %v455_v46 = vsel %vm401_vm4, %v374_v32, %v428_v39  ;;  %v421_v50 = vmul.f32 0.2, %v367_v42 }
  0x1d   : > { %v1839_v49 = vpack.c.bf16 %v455_v46, %v454_v45  ;;  %vm396_vm7 = vcmp.gt.f32.partialorder %v369_v47, 0.0  ;;  %v422_v52 = vmul.f32 0.2, %v368_v43  ;;  %v423_v53 = vmul.f32 0.2, %v369_v47  ;;  %v287_v45 = vld [vmem:[%s1791_s12 + $0x3c] sm:$0xff]  }
  0x1e   : > { %1572 = vmatprep.mubr.msk.bf16.mxu0 %vm631_vm0, %v1835_v44  ;;  %v448_v55 = vsel %vm394_vm5, %v367_v42, %v421_v50  ;;  %v515_v56 = vshrl.u32 %v1835_v44, 16  ;;  %v517_v57 = vshll.u32 %v1835_v44, 16  ;;  %v372_v62 = vadd.f32 %v1806_v12, %v338_v54 }
  0x1f   : > { %1573 = vmatmul.mubr.msk.bf16.vlgmr.msra.gmra.mrb[0].mxu0 %vm631_vm0, %v1839_v49  ;;  %v449_v60 = vsel %vm395_vm6, %v368_v43, %v422_v52  ;;  %v450_v61 = vsel %vm396_vm7, %v369_v47, %v423_v53  ;;  %v309_v63 = vunpack.c.h.bf16 %v281_v48  ;;  %v342_v3 = vmul.f32 %v1800_v8, %v308_v58  ;;  %v1688_v43 = vld [vmem:[%s2085_s1 + $0x8] sm:$0xff]  }
  0x20   : > { %1589 = vmatpush3.bf16.msra.mxu0 %v1687_v29  ;;  %v1855_v0 = vpack.c.bf16 %v449_v60, %v448_v55  ;;  %v476_v1 = vpack.c.bf16 %v450_v61, %v450_v61  ;;  %v519_v2 = vrot.slane %v517_v57, 1  ;;  %vm399_vm9 = vcmp.gt.f32.partialorder %v372_v62, 0.0  ;;  %v1466_v58 = vld [vmem:[%s1791_s12 + $0x48] sm:$0xff]  }
  0x21   : > { %1590 = vmatprep.subr.bf16.mxu0 %v1689_v51  ;;  %v426_v5 = vmul.f32 0.2, %v372_v62  ;;  %v343_v6 = vmul.f32 %v1800_v8, %v309_v63  ;;  %v1454_v7 = vunpack.c.l.bf16 %v1465_v59  ;;  %v376_v15 = vadd.f32 %v1806_v12, %v342_v3  ;;  %v1690_v63 = vld [vmem:[%s2085_s1 + $0x10] sm:$0xff]  }
  0x22   : > { %v503_v9 = vshrl.u32 %v1855_v0, 16  ;;  %v505_v10 = vshll.u32 %v1855_v0, 16  ;;  %v510_v11 = vshll.u32 %v476_v1, 16  ;;  %v520_v13 = vor.u32 %v519_v2, %v515_v56 }
  0x23   : > { %v453_v14 = vsel %vm399_vm9, %v372_v62, %v426_v5  ;;  %v377_v16 = vadd.f32 %v1806_v12, %v343_v6  ;;  %v1455_v17 = vunpack.c.h.bf16 %v1465_v59  ;;  %v345_v21 = vmul.f32 %v1454_v7, %v1800_v8  ;;  %v286_v59 = vld [vmem:[%s1791_s12 + $0x38] sm:$0x1] }
  0x24   : > { %1591 = vmatpush3.bf16.msra.mxu0 %v1689_v51  ;;  %v507_v18 = vrot.slane %v505_v10, 1  ;;  %v512_v19 = vrot.slane %v510_v11, 1  ;;  %v478_v20 = vpack.c.bf16 %v453_v14, %v453_v14  ;;  %vm403_vm10 = vcmp.gt.f32.partialorder %v376_v15, 0.0 }
  0x25   : > { %1592 = vmatprep.subr.bf16.mxu0 %v1691_v4  ;;  %vm404_vm11 = vcmp.gt.f32.partialorder %v377_v16, 0.0  ;;  %v430_v24 = vmul.f32 0.2, %v376_v15  ;;  %v431_v25 = vmul.f32 0.2, %v377_v16  ;;  %v346_v28 = vmul.f32 %v1455_v17, %v1800_v8  ;;  %v1693_v17 = vld [vmem:[%s2085_s1 + $0x18] sm:$0xff]  }
  0x26   : > { %v508_v26 = vor.u32 %v507_v18, %v503_v9  ;;  %v522_v27 = vshll.u32 %v478_v20, 16  ;;  %v379_v29 = vadd.f32 %v1806_v12, %v345_v21  ;;  %v307_v32 = vunpack.c.l.bf16 %v280_v22 }
  0x27   : > { %v457_v30 = vsel %vm403_vm10, %v376_v15, %v430_v24  ;;  %v458_v31 = vsel %vm404_vm11, %v377_v16, %v431_v25  ;;  %v527_v33 = vshrl.u32 %v1839_v49, 16  ;;  %v380_v39 = vadd.f32 %v1806_v12, %v346_v28 }
  0x28   : > { %1593 = vmatpush3.bf16.msra.mxu0 %v1691_v4  ;;  %v513_v36 = vsel %vm501_vm8, %v508_v26, %v512_v19  ;;  %v524_v37 = vrot.slane %v522_v27, 1  ;;  %v1876_v38 = vpack.c.bf16 %v458_v31, %v457_v30  ;;  %vm406_vm12 = vcmp.gt.f32.partialorder %v379_v29, 0.0 }
  0x29   : > { %1594 = vmatprep.subr.bf16.mxu0 %v1692_v23  ;;  %1524 = vmatprep.mubr.msk.bf16.mxu1 %vm631_vm0, %v513_v36  ;;  %v433_v40 = vmul.f32 0.2, %v379_v29  ;;  %v341_v41 = vmul.f32 %v1800_v8, %v307_v32  ;;  %v529_v42 = vshll.u32 %v1839_v49, 16  ;;  %vm407_vm13 = vcmp.gt.f32.partialorder %v380_v39, 0.0  ;;  %v289_v32 = vld [vmem:[%s1791_s12 + $0x44] sm:$0x1] }
  0x2a   : > { %v1887_v46 = vsel %vm501_vm8, %v520_v13, %v524_v37  ;;  %1576 = vmatprep.mubr.msk.bf16.mxu0 %vm631_vm0, %v1876_v38  ;;  %v434_v47 = vmul.f32 0.2, %v380_v39  ;;  %v310_v48 = vunpack.c.l.bf16 %v283_v35  ;;  %v539_v53 = vshrl.u32 %v1876_v38, 16  ;;  %v293_v36 = vld [vmem:[%s1791_s12 + $0x54] sm:$0xff]  }
  0x2b   : > { %1525 = vmatmul.mubr.msk.bf16.vlgmr.msra.gmra.mrb[0].mxu1 %vm631_vm0, %v1887_v46  ;;  %v460_v50 = vsel %vm406_vm12, %v379_v29, %v433_v40  ;;  %v375_v51 = vadd.f32 %v1806_v12, %v341_v41  ;;  %v531_v52 = vrot.slane %v529_v42, 1  ;;  %v541_v56 = vshll.u32 %v1876_v38, 16 }
  0x2c   : > { %1595 = vmatpush3.bf16.msra.mxu0 %v1692_v23  ;;  %1541 = vmatpush3.bf16.msra.mxu1 %v1831_v34  ;;  %v461_v54 = vsel %vm407_vm13, %v380_v39, %v434_v47  ;;  %v344_v55 = vmul.f32 %v1800_v8, %v310_v48  ;;  %v314_v57 = vunpack.c.l.bf16 %v287_v45  ;;  %v315_v2 = vunpack.c.h.bf16 %v287_v45 }
  0x2d   : > { %v1900_v60 = vpack.c.bf16 %v461_v54, %v460_v50  ;;  %vm402_vm14 = vcmp.gt.f32.partialorder %v375_v51, 0.0  ;;  %v429_v61 = vmul.f32 0.2, %v375_v51  ;;  %v532_v62 = vor.u32 %v531_v52, %v527_v33  ;;  %1542 = vmatprep.subr.bf16.mxu1 %v1688_v43  ;;  %v1467_v52 = vld [vmem:[%s1791_s12 + $0x60] sm:$0xff]  }
  0x2e   : > { %v378_v34 = vadd.f32 %v1806_v12, %v344_v55  ;;  %v543_v1 = vrot.slane %v541_v56, 1  ;;  %v348_v3 = vmul.f32 %v1800_v8, %v314_v57  ;;  %v1458_v5 = vunpack.c.l.bf16 %v1466_v58 }
  0x2f   : > { %1577 = vmatmul.mubr.msk.bf16.gmra.mrb[4].mxu0 %vm631_vm0, %v1900_v60  ;;  %v456_v4 = vsel %vm402_vm14, %v375_v51, %v429_v61  ;;  %v1459_v6 = vunpack.c.h.bf16 %v1466_v58  ;;  %v313_v7 = vunpack.c.l.bf16 %v286_v59  ;;  %v349_v13 = vmul.f32 %v1800_v8, %v315_v2  ;;  %v292_v61 = vld [vmem:[%s1791_s12 + $0x50] sm:$0x1] }
  0x30   : > { %v480_v9 = vpack.c.bf16 %v456_v4, %v456_v4  ;;  %vm405_vm15 = vcmp.gt.f32.partialorder %v378_v34, 0.0  ;;  %v432_v10 = vmul.f32 0.2, %v378_v34  ;;  %v544_v11 = vor.u32 %v543_v1, %v539_v53  ;;  %1543 = vmatpush3.bf16.msra.mxu1 %v1688_v43 }
  0x31   : > { %v382_v14 = vadd.f32 %v1806_v12, %v348_v3  ;;  %v351_v15 = vmul.f32 %v1458_v5, %v1800_v8  ;;  %v352_v16 = vmul.f32 %v1459_v6, %v1800_v8  ;;  %1544 = vmatprep.subr.bf16.mxu1 %v1690_v63  ;;  %v347_v20 = vmul.f32 %v1800_v8, %v313_v7 }
  0x32   : > { %v534_v18 = vshll.u32 %v480_v9, 16  ;;  %v459_v19 = vsel %vm405_vm15, %v378_v34, %v432_v10  ;;  %v551_v21 = vshrl.u32 %v1900_v60, 16  ;;  %v383_v23 = vadd.f32 %v1806_v12, %v349_v13 }
  0x33   : > { %v482_v22 = vpack.c.bf16 %v459_v19, %v459_v19  ;;  %vm409_vm1 = vcmp.gt.f32.partialorder %v382_v14, 0.0  ;;  %v436_v24 = vmul.f32 0.2, %v382_v14  ;;  %v385_v26 = vadd.f32 %v1806_v12, %v351_v15 }
  0x34   : > { %v536_v25 = vrot.slane %v534_v18, 1  ;;  %v386_v27 = vadd.f32 %v1806_v12, %v352_v16  ;;  %v381_v28 = vadd.f32 %v1806_v12, %v347_v20  ;;  %1545 = vmatpush3.bf16.msra.mxu1 %v1690_v63  ;;  %vm410_vm2 = vcmp.gt.f32.partialorder %v383_v23, 0.0 }
  0x35   : > { %v546_v29 = vshll.u32 %v482_v22, 16  ;;  %v437_v30 = vmul.f32 0.2, %v383_v23  ;;  %v463_v31 = vsel %vm409_vm1, %v382_v14, %v436_v24  ;;  %1546 = vmatprep.subr.bf16.mxu1 %v1693_v17  ;;  %vm412_vm3 = vcmp.gt.f32.partialorder %v385_v26, 0.0 }
  0x36   : > { %v1924_v33 = vsel %vm501_vm8, %v532_v62, %v536_v25  ;;  %vm413_vm4 = vcmp.gt.f32.partialorder %v386_v27, 0.0  ;;  %v439_v35 = vmul.f32 0.2, %v385_v26  ;;  %v440_v40 = vmul.f32 0.2, %v386_v27 }
  0x37   : > { %1528 = vmatprep.mubr.msk.bf16.mxu1 %vm631_vm0, %v1924_v33  ;;  %v548_v37 = vrot.slane %v546_v29, 1  ;;  %v464_v39 = vsel %vm410_vm2, %v383_v23, %v437_v30  ;;  %vm408_vm5 = vcmp.gt.f32.partialorder %v381_v28, 0.0  ;;  %v435_v43 = vmul.f32 0.2, %v381_v28 }
  0x38   : > { %v1929_v41 = vpack.c.bf16 %v464_v39, %v463_v31  ;;  %v466_v42 = vsel %vm412_vm3, %v385_v26, %v439_v35  ;;  %v553_v45 = vshll.u32 %v1900_v60, 16  ;;  %1547 = vmatpush3.bf16.msra.mxu1 %v1693_v17  ;;  %v467_v48 = vsel %vm413_vm4, %v386_v27, %v440_v40  ;;  %v295_v31 = vld [vmem:[%s1791_s12 + $0x5c] sm:$0x1]  ;;  %v298_v39 = vld [vmem:[%s1791_s12 + $0x68] sm:$0x1]  ;;  %s1366_s12 = sshll.u32 %s2095_s18, 3 }
  0x39   : > { %v1933_v47 = vsel %vm501_vm8, %v544_v11, %v548_v37  ;;  %v316_v50 = vunpack.c.l.bf16 %v289_v32  ;;  %v320_v51 = vunpack.c.l.bf16 %v293_v36  ;;  %v1940_v53 = vpack.c.bf16 %v467_v48, %v466_v42  ;;  %s2018_s23 = scalar_lea.vmem %s2089_s5, %s1366_s12 }
  0x3a   : > { %1529 = vmatmul.mubr.msk.bf16.gmra.mrb[4].mxu1 %vm631_vm0, %v1933_v47  ;;  %1580 = vmatprep.mubr.msk.bf16.mxu0 %vm631_vm0, %v1929_v41  ;;  %v462_v54 = vsel %vm408_vm5, %v381_v28, %v435_v43  ;;  %v555_v55 = vrot.slane %v553_v45, 1  ;;  %v565_v58 = vshll.u32 %v1929_v41, 16  ;;  %v321_v59 = vunpack.c.h.bf16 %v293_v36 }
  0x3b   : > { %v484_v56 = vpack.c.bf16 %v462_v54, %v462_v54  ;;  %v350_v57 = vmul.f32 %v1800_v8, %v316_v50  ;;  %1581 = vmatmul.mubr.msk.bf16.gmra.mrb[8].mxu0 %vm631_vm0, %v1940_v53  ;;  %v563_v62 = vshrl.u32 %v1929_v41, 16  ;;  %v354_v63 = vmul.f32 %v1800_v8, %v320_v51 }
  0x3c   : > { %v1462_v34 = vunpack.c.l.bf16 %v1467_v52  ;;  %v1463_v1 = vunpack.c.h.bf16 %v1467_v52  ;;  %v556_v2 = vor.u32 %v555_v55, %v551_v21  ;;  %v355_v5 = vmul.f32 %v1800_v8, %v321_v59 }
  0x3d   : > { %v558_v3 = vshll.u32 %v484_v56, 16  ;;  %v384_v4 = vadd.f32 %v1806_v12, %v350_v57  ;;  %v388_v6 = vadd.f32 %v1806_v12, %v354_v63  ;;  %v319_v10 = vunpack.c.l.bf16 %v292_v61 }
  0x3e   : > { %v357_v7 = vmul.f32 %v1462_v34, %v1800_v8  ;;  %v358_v9 = vmul.f32 %v1463_v1, %v1800_v8  ;;  %v567_v14 = vrot.slane %v565_v58, 1  ;;  %v389_v15 = vadd.f32 %v1806_v12, %v355_v5 }
  0x3f   : > { %v560_v11 = vrot.slane %v558_v3, 1  ;;  %vm411_vm6 = vcmp.gt.f32.partialorder %v384_v4, 0.0  ;;  %v438_v13 = vmul.f32 0.2, %v384_v4  ;;  %vm415_vm7 = vcmp.gt.f32.partialorder %v388_v6, 0.0 }
  0x40   : > { %v442_v16 = vmul.f32 0.2, %v388_v6  ;;  %v391_v17 = vadd.f32 %v1806_v12, %v357_v7  ;;  %v392_v20 = vadd.f32 %v1806_v12, %v358_v9  ;;  %v353_v21 = vmul.f32 %v1800_v8, %v319_v10 }
  0x41   : > { %v1957_v18 = vsel %vm501_vm8, %v556_v2, %v560_v11  ;;  %v465_v19 = vsel %vm411_vm6, %v384_v4, %v438_v13  ;;  %vm416_vm9 = vcmp.gt.f32.partialorder %v389_v15, 0.0  ;;  %v443_v23 = vmul.f32 0.2, %v389_v15 }
  0x42   : > { %1532 = vmatprep.mubr.msk.bf16.mxu1 %vm631_vm0, %v1957_v18  ;;  %v486_v22 = vpack.c.bf16 %v465_v19, %v465_v19  ;;  %v469_v24 = vsel %vm415_vm7, %v388_v6, %v442_v16  ;;  %vm418_vm10 = vcmp.gt.f32.partialorder %v391_v17, 0.0  ;;  %vm419_vm11 = vcmp.gt.f32.partialorder %v392_v20, 0.0 }
  0x43   : > { %v445_v25 = vmul.f32 0.2, %v391_v17  ;;  %v446_v26 = vmul.f32 0.2, %v392_v20  ;;  %v568_v27 = vor.u32 %v567_v14, %v563_v62  ;;  %v470_v29 = vsel %vm416_vm9, %v389_v15, %v443_v23 }
  0x44   : > { %v570_v28 = vshll.u32 %v486_v22, 16  ;;  %v387_v30 = vadd.f32 %v1806_v12, %v353_v21  ;;  %v1965_v32 = vpack.c.bf16 %v470_v29, %v469_v24  ;;  %v577_v37 = vshll.u32 %v1940_v53, 16 }
  0x45   : > { %v472_v35 = vsel %vm418_vm10, %v391_v17, %v445_v25  ;;  %v473_v36 = vsel %vm419_vm11, %v392_v20, %v446_v26  ;;  %v575_v45 = vshrl.u32 %v1940_v53, 16  ;;  %v322_v50 = vunpack.c.l.bf16 %v295_v31 }
  0x46   : > { %v572_v40 = vrot.slane %v570_v28, 1  ;;  %v491_v42 = vpack.c.bf16 %v473_v36, %v472_v35  ;;  %vm414_vm12 = vcmp.gt.f32.partialorder %v387_v30, 0.0  ;;  %v441_v43 = vmul.f32 0.2, %v387_v30  ;;  %1584 = vmatprep.mubr.msk.bf16.mxu0 %vm631_vm0, %v1965_v32 }
  0x47   : > { %v579_v48 = vrot.slane %v577_v37, 1  ;;  %v325_v54 = vunpack.c.l.bf16 %v298_v39  ;;  %v356_v56 = vmul.f32 %v1800_v8, %v322_v50  ;;  %v589_v57 = vshll.u32 %v1965_v32, 16 }
  0x48   : > { %v573_v51 = vsel %vm501_vm8, %v568_v27, %v572_v40  ;;  %1585 = vmatmul.mubr.msk.bf16.gmra.mrb[12].mxu0 %vm631_vm0, %v491_v42  ;;  %v468_v52 = vsel %vm414_vm12, %v387_v30, %v441_v43  ;;  %v587_v2 = vshrl.u32 %v1965_v32, 16  ;;  %v1007_v11 = vshrl.u32 %v491_v42, 16 }
  0x49   : > { %1533 = vmatmul.mubr.msk.bf16.gmra.mrb[8].mxu1 %vm631_vm0, %v573_v51  ;;  %v488_v55 = vpack.c.bf16 %v468_v52, %v468_v52  ;;  %1596 = vmatprep.mubr.msk.bf16.mxu0 %vm631_vm0, %v1887_v46  ;;  %v359_v58 = vmul.f32 %v1800_v8, %v325_v54  ;;  %v580_v59 = vor.u32 %v579_v48, %v575_v45  ;;  %v591_v3 = vrot.slane %v589_v57, 1 }
  0x4a   : > { %v390_v62 = vadd.f32 %v1806_v12, %v356_v56  ;;  %vm1225_vm15 = vcmask 254976   ;;  %vm1212_vm1 = vcmask 253952  }
  0x4b   : > { %v582_v61 = vshll.u32 %v488_v55, 16  ;;  %v393_v63 = vadd.f32 %v1806_v12, %v359_v58  ;;  %v592_v8 = vor.u32 %v591_v3, %v587_v2 }
  0x4c   : > { %vm417_vm13 = vcmp.gt.f32.partialorder %v390_v62, 0.0  ;;  %v444_v1 = vmul.f32 0.2, %v390_v62 }
  0x4d   : > { %v584_v34 = vrot.slane %v582_v61, 1  ;;  %v447_v6 = vmul.f32 0.2, %v393_v63  ;;  %vm420_vm14 = vcmp.gt.f32.partialorder %v393_v63, 0.0 }
  0x4e   : > { %v471_v5 = vsel %vm417_vm13, %v390_v62, %v444_v1 }
  0x4f   : > { %v585_v4 = vsel %vm501_vm8, %v580_v59, %v584_v34  ;;  %v490_v46 = vpack.c.bf16 %v471_v5, %v471_v5  ;;  %v474_v10 = vsel %vm420_vm14, %v393_v63, %v447_v6 }
  0x50   : > { %1536 = vmatprep.mubr.msk.bf16.mxu1 %vm631_vm0, %v585_v4  ;;  %1597 = vmatmul.mubr.msk.bf16.vlgmr.msra.gmra.mrb[0].mxu0 %vm631_vm0, %v1924_v33  ;;  %v492_v33 = vpack.c.bf16 %v474_v10, %v474_v10 }
  0x51   : > { %1600 = vmatprep.mubr.msk.bf16.mxu0 %vm631_vm0, %v1933_v47  ;;  %v594_v12 = vshll.u32 %v490_v46, 16  ;;  %v1009_v47 = vshll.u32 %v491_v42, 16 }
  0x52   : > { %v1014_v14 = vshll.u32 %v492_v33, 16 }
  0x53   : > { %v596_v7 = vrot.slane %v594_v12, 1  ;;  %v1011_v13 = vrot.slane %v1009_v47, 1 }
  0x54   : > { %v1016_v15 = vrot.slane %v1014_v14, 1 }
  0x55   : > { %v597_v9 = vsel %vm501_vm8, %v592_v8, %v596_v7 }
  0x56   : > { %1537 = vmatmul.mubr.msk.bf16.gmra.mrb[12].mxu1 %vm631_vm0, %v597_v9 }
  0x57   : > { %1548 = vmatprep.mubr.msk.bf16.mxu1 %vm631_vm0, %v1855_v0  ;;  %v1012_v0 = vor.u32 %v1011_v13, %v1007_v11 }
  0x58   : > { %1601 = vmatmul.mubr.msk.bf16.gmra.mrb[4].mxu0 %vm631_vm0, %v1957_v18 }
  0x59   : > { %1604 = vmatprep.mubr.msk.bf16.mxu0 %vm631_vm0, %v573_v51  ;;  %v1017_v16 = vsel %vm501_vm8, %v1012_v0, %v1016_v15  ;;  %vm1215_vm8 = vcmask 259072  }
  0x5e   : > { %1549 = vmatmul.mubr.msk.bf16.vlgmr.msra.gmra.mrb[0].mxu1 %vm631_vm0, %v1835_v44  ;;  %v1718_v44 = vmov 0.0  }
  0x5f   : > { %1552 = vmatprep.mubr.msk.bf16.mxu1 %vm631_vm0, %v1839_v49  ;;  %1216 = vst.msk [vmem:[%s2018_s23 + $0x2] sm:$0x3f] %vm1215_vm8, %v1718_v44 }
  0x60   : > { %1605 = vmatmul.mubr.msk.bf16.gmra.mrb[8].mxu0 %vm631_vm0, %v585_v4 }
  0x61   : > { %1608 = vmatprep.mubr.msk.bf16.mxu0 %vm631_vm0, %v597_v9 }
  0x66   : > { %1553 = vmatmul.mubr.msk.bf16.gmra.mrb[4].mxu1 %vm631_vm0, %v1876_v38 }
  0x67   : > { %1556 = vmatprep.mubr.msk.bf16.mxu1 %vm631_vm0, %v1900_v60 }
  0x68   : > { %1609 = vmatmul.mubr.msk.bf16.gmra.mrb[12].mxu0 %vm631_vm0, %v1017_v16 }
  0x6e   : > { %1557 = vmatmul.mubr.msk.bf16.gmra.mrb[8].mxu1 %vm631_vm0, %v1929_v41 }
  0x6f   : > { %1560 = vmatprep.mubr.msk.bf16.mxu1 %vm631_vm0, %v1940_v53 }
  0x76   : > { %1561 = vmatmul.mubr.msk.bf16.gmra.mrb[12].mxu1 %vm631_vm0, %v1965_v32  ;;  %vm1151_vm0 = vcmask 257024  }
 0x123   : > { %v1598_v49 = vpop.f32.mrb[0].mxu0 }
 0x124   : > { %v1088_v38 = vpop.f32.mrb[1].mxu0 }
 0x125   : > { %v1599_v60 = vpop.f32.mrb[2].mxu0 }
 0x126   : > { %v1091_v41 = vpop.f32.mrb[3].mxu0 }
 0x12b   : > { %v1602_v17 = vpop.f32.mrb[4].mxu0 }
 0x12c   : > { %v1102_v18 = vpop.f32.mrb[5].mxu0 }
 0x12d   : > { %v1603_v53 = vpop.f32.mrb[6].mxu0 }
 0x12e   : > { %v1105_v19 = vpop.f32.mrb[7].mxu0 }
 0x131   : > { %v1550_v20 = vpop.f32.mrb[0].mxu1 }
 0x132   : > { %v2022_v21 = vadd.f32 %v1598_v49, %v1550_v20  ;;  %v819_v22 = vpop.f32.mrb[1].mxu1 }
 0x133   : > { %v1606_v23 = vpop.f32.mrb[8].mxu0  ;;  %v2029_v24 = vadd.f32 %v1088_v38, %v819_v22  ;;  %v1551_v25 = vpop.f32.mrb[2].mxu1 }
 0x134   : > { %v1116_v26 = vpop.f32.mrb[9].mxu0  ;;  %v1153_v27 = vsel %vm1151_vm0, %v2022_v21, 0.0  ;;  %v1218_v28 = vpack.c.bf16 %v2022_v21, %v2022_v21  ;;  %v822_v29 = vpop.f32.mrb[3].mxu1 }
 0x135   : > { %v1607_v30 = vpop.f32.mrb[10].mxu0  ;;  %v1152_v31 = vsel %vm1151_vm0, %v2029_v24, 0.0  ;;  %v1217_v32 = vpack.c.bf16 %v2029_v24, %v2029_v24 }
 0x136   : > { %v1119_v35 = vpop.f32.mrb[11].mxu0  ;;  %1227 = vst.msk [vmem:[%s2027_s27 + $0x2] sm:$0x3] %vm1225_vm15, %v1218_v28  ;;  %v1154_v36 = vadd.f32 %v1153_v27, %v1152_v31 }
 0x137   : > { %1226 = vst.msk [vmem:[%s2027_s27] sm:$0x3] %vm1225_vm15, %v1217_v32 }
 0x139   : > { %v1554_v37 = vpop.f32.mrb[4].mxu1 }
 0x13a   : > { %v1614_v39 = vadd.f32 %v1602_v17, %v1554_v37  ;;  %v833_v40 = vpop.f32.mrb[5].mxu1 }
 0x13b   : > { %v1610_v42 = vpop.f32.mrb[12].mxu0  ;;  %v1615_v43 = vadd.f32 %v1102_v18, %v833_v40  ;;  %v1555_v45 = vpop.f32.mrb[6].mxu1 }
 0x13c   : > { %v1130_v48 = vpop.f32.mrb[13].mxu0  ;;  %v1220_v50 = vpack.c.bf16 %v1614_v39, %v1614_v39  ;;  %v836_v51 = vpop.f32.mrb[7].mxu1  ;;  %v1157_v58 = vsel %vm1151_vm0, %v1614_v39, 0.0 }
 0x13d   : > { %v1611_v52 = vpop.f32.mrb[14].mxu0  ;;  %v1155_v54 = vsel %vm1151_vm0, %v1615_v43, 0.0  ;;  %v1219_v55 = vpack.c.bf16 %v1615_v43, %v1615_v43 }
 0x13e   : > { %v1133_v56 = vpop.f32.mrb[15].mxu0  ;;  %1229 = vst.msk [vmem:[%s2027_s27 + $0x6] sm:$0x3] %vm1225_vm15, %v1220_v50  ;;  %v1156_v57 = vadd.f32 %v1155_v54, %v1154_v36 }
 0x13f   : > { %1228 = vst.msk [vmem:[%s2027_s27 + $0x4] sm:$0x3] %vm1225_vm15, %v1219_v55 }
 0x140   : > { %v1158_v59 = vadd.f32 %v1157_v58, %v1156_v57 }
 0x141   : > { %v1558_v61 = vpop.f32.mrb[8].mxu1 }
 0x142   : > { %v1616_v62 = vadd.f32 %v1606_v23, %v1558_v61  ;;  %v847_v63 = vpop.f32.mrb[9].mxu1 }
 0x143   : > { %v1617_v34 = vadd.f32 %v1116_v26, %v847_v63  ;;  %v1559_v1 = vpop.f32.mrb[10].mxu1 }
 0x144   : > { %v1222_v2 = vpack.c.bf16 %v1616_v62, %v1616_v62  ;;  %v850_v3 = vpop.f32.mrb[11].mxu1  ;;  %v1161_v8 = vsel %vm1151_vm0, %v1616_v62, 0.0 }
 0x145   : > { %v1159_v4 = vsel %vm1151_vm0, %v1617_v34, 0.0  ;;  %v1221_v5 = vpack.c.bf16 %v1617_v34, %v1617_v34 }
 0x146   : > { %1231 = vst.msk [vmem:[%s2027_s27 + $0xa] sm:$0x3] %vm1225_vm15, %v1222_v2  ;;  %v1160_v46 = vadd.f32 %v1159_v4, %v1158_v59 }
 0x147   : > { %1230 = vst.msk [vmem:[%s2027_s27 + $0x8] sm:$0x3] %vm1225_vm15, %v1221_v5 }
 0x148   : > { %v1162_v12 = vadd.f32 %v1161_v8, %v1160_v46 }
 0x149   : > { %v1562_v6 = vpop.f32.mrb[12].mxu1 }
 0x14a   : > { %v1618_v7 = vadd.f32 %v1610_v42, %v1562_v6  ;;  %v861_v9 = vpop.f32.mrb[13].mxu1 }
 0x14b   : > { %v1619_v10 = vadd.f32 %v1130_v48, %v861_v9  ;;  %v1563_v33 = vpop.f32.mrb[14].mxu1 }
 0x14c   : > { %v1224_v47 = vpack.c.bf16 %v1618_v7, %v1618_v7  ;;  %v864_v11 = vpop.f32.mrb[15].mxu1  ;;  %v1165_v15 = vsel %vm1151_vm0, %v1618_v7, 0.0 }
 0x14d   : > { %v1163_v13 = vsel %vm1151_vm0, %v1619_v10, 0.0  ;;  %v1223_v14 = vpack.c.bf16 %v1619_v10, %v1619_v10 }
 0x14e   : > { %1233 = vst.msk [vmem:[%s2027_s27 + $0xe] sm:$0x3] %vm1225_vm15, %v1224_v47  ;;  %v1164_v0 = vadd.f32 %v1163_v13, %v1162_v12 }
 0x14f   : > { %1232 = vst.msk [vmem:[%s2027_s27 + $0xc] sm:$0x3] %vm1225_vm15, %v1223_v14 }
 0x150   : > { %v1166_v16 = vadd.f32 %v1165_v15, %v1164_v0 }
 0x152   : > { %v1167_v44 = vrot.slane %v1166_v16, 4 }
 0x154   : > { %v1168_v49 = vadd.f32 %v1167_v44, %v1166_v16 }
 0x156   : > { %v1169_v38 = vrot.slane %v1168_v49, 2 }
 0x158   : > { %v1170_v60 = vadd.f32 %v1169_v38, %v1168_v49 }
 0x15a   : > { %v1171_v41 = vrot.slane %v1170_v60, 1 }
 0x15c   : > { %v1172_v17 = vadd.f32 %v1171_v41, %v1170_v60 }
 0x15e   : > { %v1174_v18 = vmul.f32 0.03125, %v1172_v17  ;;  %1213 = vst.msk [vmem:[%s2018_s23] sm:$0x1] %vm1212_vm1, %v1172_v17 }
 0x160   : > { %v1175_v53 = vsub.f32 %v2029_v24, %v1174_v18  ;;  %v1176_v19 = vsub.f32 %v2022_v21, %v1174_v18  ;;  %v1177_v20 = vsub.f32 %v1615_v43, %v1174_v18  ;;  %v1178_v22 = vsub.f32 %v1614_v39, %v1174_v18 }
 0x161   : > { %v1179_v23 = vsub.f32 %v1617_v34, %v1174_v18  ;;  %v1180_v25 = vsub.f32 %v1616_v62, %v1174_v18  ;;  %v1181_v26 = vsub.f32 %v1619_v10, %v1174_v18  ;;  %v1182_v27 = vsub.f32 %v1618_v7, %v1174_v18 }
 0x162   : > { %v1183_v28 = vmul.f32 %v1175_v53, %v1175_v53  ;;  %v1184_v29 = vmul.f32 %v1176_v19, %v1176_v19  ;;  %v1185_v30 = vmul.f32 %v1177_v20, %v1177_v20  ;;  %v1186_v31 = vmul.f32 %v1178_v22, %v1178_v22 }
 0x163   : > { %v1187_v37 = vmul.f32 %v1179_v23, %v1179_v23  ;;  %v1188_v21 = vmul.f32 %v1180_v25, %v1180_v25  ;;  %v1189_v43 = vmul.f32 %v1181_v26, %v1181_v26  ;;  %v1190_v50 = vmul.f32 %v1182_v27, %v1182_v27 }
 0x164   : > { %v1191_v32 = vsel %vm1151_vm0, %v1183_v28, 0.0  ;;  %v1192_v35 = vsel %vm1151_vm0, %v1184_v29, 0.0  ;;  %v1194_v24 = vsel %vm1151_vm0, %v1185_v30, 0.0  ;;  %v1196_v39 = vsel %vm1151_vm0, %v1186_v31, 0.0 }
 0x165   : > { %v1193_v36 = vadd.f32 %v1192_v35, %v1191_v32  ;;  %v1198_v45 = vsel %vm1151_vm0, %v1187_v37, 0.0  ;;  %v1200_v51 = vsel %vm1151_vm0, %v1188_v21, 0.0  ;;  %v1202_v54 = vsel %vm1151_vm0, %v1189_v43, 0.0 }
 0x166   : > { %v1204_v56 = vsel %vm1151_vm0, %v1190_v50, 0.0 }
 0x167   : > { %v1195_v40 = vadd.f32 %v1194_v24, %v1193_v36 }
 0x169   : > { %v1197_v42 = vadd.f32 %v1196_v39, %v1195_v40 }
 0x16b   : > { %v1199_v48 = vadd.f32 %v1198_v45, %v1197_v42 }
 0x16d   : > { %v1201_v52 = vadd.f32 %v1200_v51, %v1199_v48 }
 0x16f   : > { %v1203_v55 = vadd.f32 %v1202_v54, %v1201_v52 }
 0x171   : > { %v1205_v57 = vadd.f32 %v1204_v56, %v1203_v55 }
 0x173   : > { %v1206_v58 = vrot.slane %v1205_v57, 4 }
 0x175   : > { %v1207_v59 = vadd.f32 %v1206_v58, %v1205_v57 }
 0x177   : > { %v1208_v61 = vrot.slane %v1207_v59, 2 }
 0x179   : > { %v1209_v62 = vadd.f32 %v1208_v61, %v1207_v59 }
 0x17b   : > { %v1210_v63 = vrot.slane %v1209_v62, 1 }
 0x17d   : > { %v1211_v34 = vadd.f32 %v1210_v63, %v1209_v62 }
 0x17f   : > { %1214 = vst.msk [vmem:[%s2018_s23 + $0x1] sm:$0x1] %vm1212_vm1, %v1211_v34 }
 0x180 PF: > { %s16_s20 = sadd.s32 1, %s1716_s20   ;;  %s2090_s18 = smov %s1712_s19 }
 0x181   : > { %p13_p5 = scmp.ge.s32.totalorder %s16_s20, 6   ;;  %s2091_s19 = smov %s2093_s21 }
 0x183   :  { %15 = sbr.rel (!%p13_p5) target bundleno = 2 (0x2), region = 82 }

// kernel: tile.33
= control target key start
LH: loop header
LB: loop body
LE: loop exit
PB: predicated region body
PF: predicated region fallthrough
CT: control target
= control target key end

     0   :  { %s22_s0 = inlined_call_operand.vmem [shape: f32[32], index: 0, kind: input, shape index: {}]   ;;  %s23_s1 = inlined_call_operand.vmem [shape: f32[4,32], index: 1, kind: output, shape index: {}]  }
   0x1   :  { %v4_v0 = vld [vmem:[%s22_s0] ss:$0 sm:$0xff] }
   0x2   :  { %5 = vst [vmem:[%s23_s1] sm:$0xf] %v4_v0 }

// kernel: tile.34
= control target key start
LH: loop header
LB: loop body
LE: loop exit
PB: predicated region body
PF: predicated region fallthrough
CT: control target
= control target key end

     0   :  { %vm7_vm0 = vcmask 261120   ;;  %s37_s8 = smov 32   ;;  %s38_s9 = smov 64   ;;  %vm13_vm1 = vcmask 1048320   ;;  %vm19_vm2 = vcmask 785920   ;;  %vm25_vm3 = vcmask 523520   ;;  %s55_s0 = inlined_call_operand.vmem [shape: f32[4,32], index: 0, kind: input, shape index: {}]   ;;  %s56_s1 = inlined_call_operand.vmem [shape: f32[1,128], index: 1, kind: output, shape index: {}]  }
   0x1   :  { %v4_v0 = vld [vmem:[%s55_s0] sm:$0xf]  ;;  %s36_s0 = smov 96  }
   0x2   :  { %5 = vst [vmem:[#allocation1] sm:$0xf] %v4_v0 }
   0x9   :  { %v10_v1 = vld [vmem:[#allocation1 + $0x3] sm:$0x1]   ;;  %v22_v2 = vld [vmem:[#allocation1 + $0x1] sm:$0x1]   ;;  %v6_v3 = vld [vmem:[#allocation1] sm:$0x1]  }
   0xa   :  { %11 = vrot.lane.b32.xlu0 %v10_v1, %s36_s0  ;;  %23 = vrot.lane.b32.xlu1 %v22_v2, %s37_s8  ;;  %v16_v4 = vld [vmem:[#allocation1 + $0x2] sm:$0x1]   ;;  %8 = vst.msk [vmem:[#allocation0] sm:$0x1] %vm7_vm0, %v6_v3  }
   0xe   :  { %17 = vrot.lane.b32.xlu0 %v16_v4, %s38_s9 }
  0x7c   :  { %v12_v5 = vpop.permute.xlu0 %11   ;;  %v24_v6 = vpop.permute.xlu1 %23  }
  0x7d   :  { %14 = vst.msk [vmem:[#allocation0] sm:$0x1] %vm13_vm1, %v12_v5  }
  0x80   :  { %v18_v7 = vpop.permute.xlu0 %17  }
  0x81   :  { %20 = vst.msk [vmem:[#allocation0] sm:$0x1] %vm19_vm2, %v18_v7  }
  0x82   :  { %26 = vst.msk [vmem:[#allocation0] sm:$0x1] %vm25_vm3, %v24_v6  }
  0x89   :  { %v30_v8 = vld [vmem:[#allocation0] sm:$0x1] }
  0x8a   :  { %32 = vst [vmem:[%s56_s1] sm:$0x1] %v30_v8 }

// kernel: d_sty_forward.9
= control target key start
LH: loop header
LB: loop body
LE: loop exit
PB: predicated region body
PF: predicated region fallthrough
CT: control target
= control target key end

     0   :  { %vm56_vm0 = vcmask 523264   ;;  %s124_s0 = inlined_call_operand.vmem [shape: bf16[32,64], index: 0, kind: input, shape index: {}]   ;;  %s125_s1 = inlined_call_operand.vmem [shape: f32[1,64], index: 1, kind: input, shape index: {}]   ;;  %s126_s2 = inlined_call_operand.vmem [shape: f32[1,64], index: 2, kind: input, shape index: {}]   ;;  %s127_s3 = inlined_call_operand.vmem [shape: f32[32,64], index: 3, kind: output, shape index: {}]  }
   0x1   :  { %v68_v0 = vld [vmem:[%s124_s0] sm:$0xff]   ;;  %v75_v4 = vld [vmem:[%s124_s0 + $0x8] sm:$0xff]  }
   0x2   :  { %v65_v1 = vld [vmem:[%s125_s1] ss:$0 sm:$0xff]  ;;  %v69_v2 = vunpack.c.l.bf16 %v68_v0  ;;  %v70_v3 = vunpack.c.h.bf16 %v68_v0  ;;  %v73_v6 = vunpack.c.l.bf16 %v75_v4  ;;  %v74_v7 = vunpack.c.h.bf16 %v75_v4 }
   0x3   :  { %v66_v5 = vld [vmem:[%s126_s2] ss:$0 sm:$0xff] }
   0x4   :  { %v29_v8 = vmul.f32 %v69_v2, %v65_v1  ;;  %v30_v9 = vmul.f32 %v70_v3, %v65_v1  ;;  %v31_v10 = vmul.f32 %v73_v6, %v65_v1  ;;  %v32_v11 = vmul.f32 %v74_v7, %v65_v1 }
   0x6   :  { %v40_v12 = vadd.f32 %v66_v5, %v29_v8  ;;  %v41_v13 = vadd.f32 %v66_v5, %v30_v9  ;;  %v42_v14 = vadd.f32 %v66_v5, %v31_v10  ;;  %v43_v15 = vadd.f32 %v66_v5, %v32_v11 }
   0x8   :  { %vm44_vm1 = vcmp.gt.f32.partialorder %v40_v12, 0.0  ;;  %v48_v16 = vmul.f32 0.2, %v40_v12  ;;  %vm45_vm2 = vcmp.gt.f32.partialorder %v41_v13, 0.0  ;;  %v49_v17 = vmul.f32 0.2, %v41_v13 }
   0x9   :  { %vm46_vm3 = vcmp.gt.f32.partialorder %v42_v14, 0.0  ;;  %v50_v18 = vmul.f32 0.2, %v42_v14  ;;  %vm47_vm4 = vcmp.gt.f32.partialorder %v43_v15, 0.0  ;;  %v51_v19 = vmul.f32 0.2, %v43_v15 }
   0xa   :  { %v52_v20 = vsel %vm44_vm1, %v40_v12, %v48_v16  ;;  %v53_v21 = vsel %vm45_vm2, %v41_v13, %v49_v17 }
   0xb   :  { %57 = vst.msk [vmem:[%s127_s3] sm:$0xff] %vm56_vm0, %v52_v20  ;;  %58 = vst.msk [vmem:[%s127_s3 + $0x8] sm:$0xff] %vm56_vm0, %v53_v21  ;;  %v54_v22 = vsel %vm46_vm3, %v42_v14, %v50_v18  ;;  %v55_v23 = vsel %vm47_vm4, %v43_v15, %v51_v19 }
   0xc   :  { %59 = vst.msk [vmem:[%s127_s3 + $0x10] sm:$0xff] %vm56_vm0, %v54_v22  ;;  %60 = vst.msk [vmem:[%s127_s3 + $0x18] sm:$0xff] %vm56_vm0, %v55_v23 }

// kernel: d_sty_forward.8
= control target key start
LH: loop header
LB: loop body
LE: loop exit
PB: predicated region body
PF: predicated region fallthrough
CT: control target
= control target key end

     0   :  { %s1527_s18 = smov 0   ;;  %s1529_s19 = smov 0   ;;  %s1777_s0 = inlined_call_operand.vmem [shape: bf16[4,5,17,128], index: 0, kind: input, shape index: {}]   ;;  %s1778_s1 = inlined_call_operand.vmem [shape: bf16[4,128,64], index: 1, kind: input, shape index: {}]   ;;  %s1779_s2 = inlined_call_operand.vmem [shape: f32[1,128], index: 2, kind: input, shape index: {}]   ;;  %s1780_s3 = inlined_call_operand.vmem [shape: f32[1,128], index: 3, kind: input, shape index: {}]   ;;  %s1781_s4 = inlined_call_operand.vmem [shape: bf16[4,4,2,64], index: 4, kind: output, shape index: {0}]   ;;  %s1782_s5 = inlined_call_operand.vmem [shape: f32[4,8,64], index: 5, kind: output, shape index: {1}]  }
   0x1   :  { %s1531_s20 = smov 0  }
   0x2 LB: > { %s28_s21 = sadd.s32 1, %s1490_s19  ;;  %p1148_p0 = scmp.ge.s32.totalorder %s1494_s20, 1  ;;  %s1494_s20 = sphi %s1531_s20, %s16_s20   ;;  %s1490_s19 = sphi %s1529_s19, %s1784_s19   ;;  %s1486_s18 = sphi %s1527_s18, %s1783_s18  }
   0x3   : > { %p30_p1 = scmp.ge.s32.totalorder %s28_s21, 4  ;;  %p206_p2 = scmp.lt.s32.totalorder %s1494_s20, 5 }
   0x5   : > { %s1786_s21 = smov (%p30_p1, %s28_s21), 0  ;;  %p207_p3 = pnand %p1148_p0, %p206_p2 }
   0x6   : > { %v1440_v0 = vld [vmem:[%s1778_s1 + $0x40] sm:$0xff] (!%p207_p3)   ;;  %p244_p4 = scmp.lt.s32.totalorder (!%p207_p3), %s1486_s18, 3  ;;  %v1442_v2 = vld [vmem:[%s1778_s1 + $0x48] sm:$0xff] (!%p207_p3)   ;;  %v1444_v4 = vld [vmem:[%s1778_s1 + $0x50] sm:$0xff] (!%p207_p3)   ;;  %vm415_vm3 = vsmask.f32 (!%p207_p3), 7424 }
   0x7   : > { %210 = sbr.rel (%p207_p3) target bundleno = 338 (0x152), region = 36  ;;  %v1441_v1 = vld [vmem:[%s1778_s1 + $0x80] sm:$0xff] (!%p207_p3)   ;;  %1298 = vmatprep.subr.bf16.mxu1 (!%p207_p3), %v1440_v0  ;;  %v1443_v3 = vld [vmem:[%s1778_s1 + $0x88] sm:$0xff] (!%p207_p3)   ;;  %v1445_v5 = vld [vmem:[%s1778_s1 + $0x90] sm:$0xff] (!%p207_p3)  }
   0x8   : > { %1346 = vmatprep.subr.bf16.mxu0 (!%p207_p3), %v1441_v1  ;;  %1299 = vmatpush3.bf16.msra.mxu1 (!%p207_p3), %v1440_v0  ;;  %v1446_v6 = vld [vmem:[%s1778_s1 + $0x58] sm:$0xff] (!%p207_p3)   ;;  %v1448_v8 = vld [vmem:[%s1778_s1 + $0x60] sm:$0xff] (!%p207_p3)   ;;  %v1450_v10 = vld [vmem:[%s1778_s1 + $0x68] sm:$0xff] (!%p207_p3)  }
   0x9   : > { %1347 = vmatpush3.bf16.msra.mxu0 (!%p207_p3), %v1441_v1  ;;  %1300 = vmatprep.subr.bf16.mxu1 (!%p207_p3), %v1442_v2  ;;  %v1447_v7 = vld [vmem:[%s1778_s1 + $0x98] sm:$0xff] (!%p207_p3)   ;;  %v1449_v9 = vld [vmem:[%s1778_s1 + $0xa0] sm:$0xff] (!%p207_p3)   ;;  %v1451_v14 = vld [vmem:[%s1778_s1 + $0xa8] sm:$0xff] (!%p207_p3)  }
   0xa   : > { %1348 = vmatprep.subr.bf16.mxu0 (!%p207_p3), %v1443_v3  ;;  %v1591_v13 = vld [vmem:[%s1779_s2] ss:$0 sm:$0xff] (!%p207_p3)  ;;  %v1452_v20 = vld [vmem:[%s1778_s1 + $0x70] sm:$0xff] (!%p207_p3)   ;;  %v1454_v37 = vld [vmem:[%s1778_s1 + $0x78] sm:$0xff] (!%p207_p3)  }
   0xb   : > { %v1599_v18 = vld [vmem:[%s1780_s3] ss:$0 sm:$0xff] (!%p207_p3)  ;;  %v1453_v28 = vld [vmem:[%s1778_s1 + $0xb0] sm:$0xff] (!%p207_p3)   ;;  %v1455_v43 = vld [vmem:[%s1778_s1 + $0xb8] sm:$0xff] (!%p207_p3)  }
   0xc   : > { %1301 = vmatpush3.bf16.msra.mxu1 (!%p207_p3), %v1442_v2  ;;  %v1636_v52 = vld [vmem:[%s1778_s1] sm:$0xff] (!%p207_p3)  }
   0xd   : > { %1349 = vmatpush3.bf16.msra.mxu0 (!%p207_p3), %v1443_v3  ;;  %1302 = vmatprep.subr.bf16.mxu1 (!%p207_p3), %v1444_v4  ;;  %v1457_v62 = vld [vmem:[%s1778_s1 + $0xc0] sm:$0xff] (!%p207_p3)  }
   0xe   : > { %s1788_s18 = smov (!%p244_p4, %s1486_s18), 3  ;;  %1350 = vmatprep.subr.bf16.mxu0 %v1445_v5 }
   0xf   : > { %s1414_s13 = smul.u32 60, %s1788_s18  ;;  %s1151_s7 = sshll.u32 %s1788_s18, 3 }
  0x10   : > { %1303 = vmatpush3.bf16.msra.mxu1 %v1444_v4  ;;  %s1745_s9 = scalar_lea.vmem %s1782_s5, %s1151_s7  ;;  %s1150_s10 = sshll.u32 %s1788_s18, 2 }
  0x11   : > { %1351 = vmatpush3.bf16.msra.mxu0 %v1445_v5  ;;  %1304 = vmatprep.subr.bf16.mxu1 %v1446_v6  ;;  %s1581_s24 = scalar_lea.vmem %s1777_s0, %s1414_s13  ;;  %s256_s13 = scalar_lea.vmem %s1781_s4, %s1150_s10 }
  0x12   : > { %1352 = vmatprep.subr.bf16.mxu0 %v1447_v7  ;;  %v1237_v11 = vld [vmem:[%s1581_s24] sm:$0xff]   ;;  %v272_v12 = vld [vmem:[%s1581_s24 + $0x8] sm:$0x1]  ;;  %v273_v19 = vld [vmem:[%s1581_s24 + $0xc] sm:$0xff]  }
  0x13   : > { %v1238_v15 = vunpack.c.l.bf16 %v1237_v11  ;;  %v1239_v16 = vunpack.c.h.bf16 %v1237_v11  ;;  %v287_v17 = vunpack.c.l.bf16 %v272_v12  ;;  %v288_v24 = vunpack.c.l.bf16 %v273_v19  ;;  %v275_v26 = vld [vmem:[%s1581_s24 + $0x14] sm:$0x1]  ;;  %v1248_v27 = vld [vmem:[%s1581_s24 + $0x18] sm:$0xff]  }
  0x14   : > { %1305 = vmatpush3.bf16.msra.mxu1 %v1446_v6  ;;  %v289_v25 = vunpack.c.h.bf16 %v273_v19  ;;  %v290_v34 = vunpack.c.l.bf16 %v275_v26  ;;  %v1242_v35 = vunpack.c.l.bf16 %v1248_v27  ;;  %v1243_v36 = vunpack.c.h.bf16 %v1248_v27  ;;  %v1249_v27 = vld [vmem:[%s1581_s24 + $0x30] sm:$0xff]  }
  0x15   : > { %1353 = vmatpush3.bf16.msra.mxu0 %v1447_v7  ;;  %1306 = vmatprep.subr.bf16.mxu1 %v1448_v8  ;;  %v307_v21 = vmul.f32 %v1238_v15, %v1591_v13  ;;  %v308_v22 = vmul.f32 %v1239_v16, %v1591_v13  ;;  %v309_v23 = vmul.f32 %v1591_v13, %v287_v17 }
  0x16   : > { %1354 = vmatprep.subr.bf16.mxu0 %v1449_v9  ;;  %v310_v32 = vmul.f32 %v1591_v13, %v288_v24  ;;  %v311_v33 = vmul.f32 %v1591_v13, %v289_v25  ;;  %v312_v45 = vmul.f32 %v1591_v13, %v290_v34  ;;  %v313_v46 = vmul.f32 %v1242_v35, %v1591_v13 }
  0x17   : > { %v329_v29 = vadd.f32 %v1599_v18, %v307_v21  ;;  %v330_v30 = vadd.f32 %v1599_v18, %v308_v22  ;;  %v331_v31 = vadd.f32 %v1599_v18, %v309_v23  ;;  %v314_v47 = vmul.f32 %v1243_v36, %v1591_v13  ;;  %v279_v21 = vld [vmem:[%s1581_s24 + $0x24] sm:$0xff]   ;;  %v281_v22 = vld [vmem:[%s1581_s24 + $0x2c] sm:$0x1] }
  0x18   : > { %1307 = vmatpush3.bf16.msra.mxu1 %v1448_v8  ;;  %v332_v41 = vadd.f32 %v1599_v18, %v310_v32  ;;  %v333_v42 = vadd.f32 %v1599_v18, %v311_v33  ;;  %v334_v55 = vadd.f32 %v1599_v18, %v312_v45  ;;  %v335_v56 = vadd.f32 %v1599_v18, %v313_v46  ;;  %v284_v46 = vld [vmem:[%s1581_s24 + $0x38] sm:$0x1] }
  0x19   : > { %1355 = vmatpush3.bf16.msra.mxu0 %v1449_v9  ;;  %1308 = vmatprep.subr.bf16.mxu1 %v1450_v10  ;;  %vm344_vm0 = vcmp.gt.f32.partialorder %v329_v29, 0.0  ;;  %vm345_vm1 = vcmp.gt.f32.partialorder %v330_v30, 0.0  ;;  %vm346_vm2 = vcmp.gt.f32.partialorder %v331_v31, 0.0  ;;  %v359_v38 = vmul.f32 0.2, %v329_v29 }
  0x1a   : > { %1356 = vmatprep.subr.bf16.mxu0 %v1451_v14  ;;  %v360_v39 = vmul.f32 0.2, %v330_v30  ;;  %v361_v40 = vmul.f32 0.2, %v331_v31  ;;  %vm347_vm4 = vcmp.gt.f32.partialorder %v332_v41, 0.0  ;;  %vm348_vm5 = vcmp.gt.f32.partialorder %v333_v42, 0.0 }
  0x1b   : > { %v374_v44 = vsel %vm344_vm0, %v329_v29, %v359_v38  ;;  %v362_v53 = vmul.f32 0.2, %v332_v41  ;;  %v363_v54 = vmul.f32 0.2, %v333_v42  ;;  %v336_v57 = vadd.f32 %v1599_v18, %v314_v47  ;;  %v1461_v38 = vld [vmem:[%s1778_s1 + $0xd0] sm:$0xff]  }
  0x1c   : > { %1309 = vmatpush3.bf16.msra.mxu1 %v1450_v10  ;;  %v375_v48 = vsel %vm345_vm1, %v330_v30, %v360_v39  ;;  %v376_v49 = vsel %vm346_vm2, %v331_v31, %v361_v40  ;;  %vm349_vm6 = vcmp.gt.f32.partialorder %v334_v55, 0.0  ;;  %v364_v0 = vmul.f32 0.2, %v334_v55  ;;  %v1458_v30 = vld [vmem:[%s1778_s1 + $0x8] sm:$0xff]  }
  0x1d   : > { %1357 = vmatpush3.bf16.msra.mxu0 %v1451_v14  ;;  %1310 = vmatprep.subr.bf16.mxu1 %v1452_v20  ;;  %v1631_v50 = vpack.c.bf16 %v375_v48, %v374_v44  ;;  %v390_v51 = vpack.c.bf16 %v376_v49, %v376_v49  ;;  %v377_v61 = vsel %vm347_vm4, %v332_v41, %v362_v53  ;;  %vm350_vm7 = vcmp.gt.f32.partialorder %v335_v56, 0.0  ;;  %v278_v14 = vld [vmem:[%s1581_s24 + $0x20] sm:$0x1] }
  0x1e   : > { %1358 = vmatprep.subr.bf16.mxu0 %v1453_v28  ;;  %v378_v63 = vsel %vm348_vm5, %v333_v42, %v363_v54  ;;  %vm351_vm8 = vcmp.gt.f32.partialorder %v336_v57, 0.0  ;;  %v379_v4 = vsel %vm349_vm6, %v334_v55, %v364_v0  ;;  %v365_v5 = vmul.f32 0.2, %v335_v56  ;;  %v1462_v0 = vld [vmem:[%s1778_s1 + $0x18] sm:$0xff]  }
  0x1f   : > { %v417_v58 = vshrl.u32 %v1631_v50, 16  ;;  %v419_v59 = vshll.u32 %v1631_v50, 16  ;;  %v424_v60 = vshll.u32 %v390_v51, 16  ;;  %v1648_v3 = vpack.c.bf16 %v378_v63, %v377_v61  ;;  %v1460_v51 = vld [vmem:[%s1778_s1 + $0x10] sm:$0xff]  }
  0x20   : > { %1311 = vmatpush3.bf16.msra.mxu1 %v1452_v20  ;;  %v366_v6 = vmul.f32 0.2, %v336_v57  ;;  %v392_v8 = vpack.c.bf16 %v379_v4, %v379_v4  ;;  %v380_v11 = vsel %vm350_vm7, %v335_v56, %v365_v5  ;;  %v1459_v20 = vld [vmem:[%s1778_s1 + $0xc8] sm:$0xff]   ;;  %v293_v23 = vunpack.c.l.bf16 %v278_v14  ;;  %v1465_v5 = vld [vmem:[%s1778_s1 + $0xe0] sm:$0xff]  }
  0x21   : > { %1359 = vmatpush3.bf16.msra.mxu0 %v1453_v28  ;;  %1312 = vmatprep.subr.bf16.mxu1 %v1454_v37  ;;  %v421_v1 = vrot.slane %v419_v59, 1  ;;  %v426_v2 = vrot.slane %v424_v60, 1  ;;  %v429_v9 = vshrl.u32 %v1648_v3, 16  ;;  %v431_v10 = vshll.u32 %v1648_v3, 16 }
  0x22   : > { %1360 = vmatprep.subr.bf16.mxu0 %v1455_v43  ;;  %1362 = vmatprep.mubr.bf16.mxu0 %v1648_v3  ;;  %v381_v12 = vsel %vm351_vm8, %v336_v57, %v366_v6  ;;  %v436_v17 = vshll.u32 %v392_v8, 16  ;;  %v294_v24 = vunpack.c.l.bf16 %v279_v21  ;;  %v295_v25 = vunpack.c.h.bf16 %v279_v21  ;;  %v1467_v21 = vld [vmem:[%s1778_s1 + $0xe8] sm:$0xff]  }
  0x23   : > { %v422_v7 = vor.u32 %v421_v1, %v417_v58  ;;  %v433_v16 = vrot.slane %v431_v10, 1  ;;  %v1657_v19 = vpack.c.bf16 %v381_v12, %v380_v11  ;;  %v296_v26 = vunpack.c.l.bf16 %v281_v22 }
  0x24   : > { %1313 = vmatpush3.bf16.msra.mxu1 %v1454_v37  ;;  %v438_v29 = vrot.slane %v436_v17, 1  ;;  %v315_v33 = vmul.f32 %v1591_v13, %v293_v23  ;;  %v316_v34 = vmul.f32 %v1591_v13, %v294_v24  ;;  %v317_v35 = vmul.f32 %v1591_v13, %v295_v25  ;;  %v1464_v17 = vld [vmem:[%s1778_s1 + $0x20] sm:$0xff]  }
  0x25   : > { %1361 = vmatpush3.bf16.msra.mxu0 %v1455_v43  ;;  %1322 = vmatprep.subr.bf16.mxu1 %v1636_v52  ;;  %v427_v15 = vsel %vm415_vm3, %v422_v7, %v426_v2  ;;  %v434_v28 = vor.u32 %v433_v16, %v429_v9  ;;  %v441_v31 = vshrl.u32 %v1657_v19, 16  ;;  %v443_v32 = vshll.u32 %v1657_v19, 16 }
  0x26   : > { %1370 = vmatprep.subr.bf16.mxu0 %v1457_v62  ;;  %1314 = vmatprep.mubr.bf16.mxu1 %v427_v15  ;;  %v318_v36 = vmul.f32 %v1591_v13, %v296_v26  ;;  %v1246_v40 = vunpack.c.l.bf16 %v1249_v27  ;;  %v1247_v41 = vunpack.c.h.bf16 %v1249_v27  ;;  %v337_v42 = vadd.f32 %v1599_v18, %v315_v33  ;;  %v1466_v26 = vld [vmem:[%s1778_s1 + $0x28] sm:$0xff]  }
  0x27   : > { %v1676_v37 = vsel %vm415_vm3, %v434_v28, %v438_v29  ;;  %v445_v39 = vrot.slane %v443_v32, 1  ;;  %v338_v43 = vadd.f32 %v1599_v18, %v316_v34  ;;  %v339_v44 = vadd.f32 %v1599_v18, %v317_v35  ;;  %v1468_v29 = vld [vmem:[%s1778_s1 + $0x30] sm:$0xff]  }
  0x28   : > { %1363 = vmatmul.mubr.bf16.vlgmr.msra.gmra.mrb[0].mxu0 %v1657_v19  ;;  %1315 = vmatmul.mubr.bf16.vlgmr.msra.gmra.mrb[0].mxu1 %v1676_v37  ;;  %v340_v45 = vadd.f32 %v1599_v18, %v318_v36  ;;  %v319_v47 = vmul.f32 %v1246_v40, %v1591_v13  ;;  %v320_v48 = vmul.f32 %v1247_v41, %v1591_v13  ;;  %v299_v49 = vunpack.c.l.bf16 %v284_v46 }
  0x29   : > { %1371 = vmatpush3.bf16.msra.mxu0 %v1457_v62  ;;  %1323 = vmatpush3.bf16.msra.mxu1 %v1636_v52  ;;  %vm352_vm9 = vcmp.gt.f32.partialorder %v337_v42, 0.0  ;;  %v367_v53 = vmul.f32 0.2, %v337_v42  ;;  %vm353_vm10 = vcmp.gt.f32.partialorder %v338_v43, 0.0  ;;  %vm354_vm11 = vcmp.gt.f32.partialorder %v339_v44, 0.0  ;;  %v1463_v52 = vld [vmem:[%s1778_s1 + $0xd8] sm:$0xff]  }
  0x2a   : > { %1372 = vmatprep.subr.bf16.mxu0 %v1459_v20  ;;  %1324 = vmatprep.subr.bf16.mxu1 %v1458_v30  ;;  %v368_v54 = vmul.f32 0.2, %v338_v43  ;;  %v369_v55 = vmul.f32 0.2, %v339_v44  ;;  %vm355_vm12 = vcmp.gt.f32.partialorder %v340_v45, 0.0  ;;  %v341_v56 = vadd.f32 %v1599_v18, %v319_v47 }
  0x2b   : > { %v382_v57 = vsel %vm352_vm9, %v337_v42, %v367_v53  ;;  %v446_v58 = vor.u32 %v445_v39, %v441_v31  ;;  %v370_v59 = vmul.f32 0.2, %v340_v45  ;;  %v342_v60 = vadd.f32 %v1599_v18, %v320_v48 }
  0x2c   : > { %v394_v61 = vpack.c.bf16 %v382_v57, %v382_v57  ;;  %v383_v62 = vsel %vm353_vm10, %v338_v43, %v368_v54  ;;  %v384_v63 = vsel %vm354_vm11, %v339_v44, %v369_v55  ;;  %vm356_vm13 = vcmp.gt.f32.partialorder %v341_v56, 0.0 }
  0x2d   : > { %1373 = vmatpush3.bf16.msra.mxu0 %v1459_v20  ;;  %1325 = vmatpush3.bf16.msra.mxu1 %v1458_v30  ;;  %v1701_v1 = vpack.c.bf16 %v384_v63, %v383_v62  ;;  %v385_v2 = vsel %vm355_vm12, %v340_v45, %v370_v59  ;;  %vm357_vm14 = vcmp.gt.f32.partialorder %v342_v60, 0.0  ;;  %v371_v4 = vmul.f32 0.2, %v341_v56  ;;  %v1471_v30 = vld [vmem:[%s1778_s1 + $0xf8] sm:$0xff]  }
  0x2e   : > { %1374 = vmatprep.subr.bf16.mxu0 %v1461_v38  ;;  %1326 = vmatprep.subr.bf16.mxu1 %v1460_v51  ;;  %v448_v6 = vshll.u32 %v394_v61, 16  ;;  %v396_v7 = vpack.c.bf16 %v385_v2, %v385_v2  ;;  %v372_v8 = vmul.f32 0.2, %v342_v60  ;;  %v321_v9 = vmul.f32 %v1591_v13, %v299_v49 }
  0x2f   : > { %1366 = vmatprep.mubr.bf16.mxu0 %v1701_v1  ;;  %v453_v10 = vshrl.u32 %v1701_v1, 16  ;;  %v455_v11 = vshll.u32 %v1701_v1, 16  ;;  %v386_v12 = vsel %vm356_vm13, %v341_v56, %v371_v4  ;;  %vm1016_vm0 = vcmask 521216  }
  0x30   : > { %v450_v14 = vrot.slane %v448_v6, 1  ;;  %v460_v15 = vshll.u32 %v396_v7, 16  ;;  %v387_v16 = vsel %vm357_vm14, %v342_v60, %v372_v8  ;;  %v343_v24 = vadd.f32 %v1599_v18, %v321_v9  ;;  %v1469_v18 = vld [vmem:[%s1778_s1 + $0xf0] sm:$0xff]  }
  0x31   : > { %1375 = vmatpush3.bf16.msra.mxu0 %v1461_v38  ;;  %1327 = vmatpush3.bf16.msra.mxu1 %v1460_v51  ;;  %v457_v20 = vrot.slane %v455_v11, 1  ;;  %v397_v13 = vpack.c.bf16 %v387_v16, %v386_v12  ;;  %v1496_v40 = vmov 0.0   ;;  %vm976_vm1 = vcmask 517120  }
  0x32   : > { %1376 = vmatprep.subr.bf16.mxu0 %v1463_v52  ;;  %1328 = vmatprep.subr.bf16.mxu1 %v1462_v0  ;;  %v451_v22 = vsel %vm415_vm3, %v446_v58, %v450_v14  ;;  %v462_v23 = vrot.slane %v460_v15, 1  ;;  %v373_v28 = vmul.f32 0.2, %v343_v24  ;;  %vm358_vm15 = vcmp.gt.f32.partialorder %v343_v24, 0.0  ;;  %1017 = vst.msk [vmem:[%s1745_s9 + $0x2] sm:$0x3f] %vm1016_vm0, %v1496_v40 }
  0x33   : > { %1318 = vmatprep.mubr.bf16.mxu1 %v451_v22  ;;  %v458_v25 = vor.u32 %v457_v20, %v453_v10  ;;  %1367 = vmatmul.mubr.bf16.gmra.mrb[4].mxu0 %v397_v13  ;;  %v836_v32 = vshll.u32 %v397_v13, 16  ;;  %v834_v34 = vshrl.u32 %v397_v13, 16  ;;  %vm1013_vm2 = vcmask 516096  }
  0x34   : > { %1386 = vmatprep.mubr.bf16.mxu0 %v1676_v37  ;;  %v388_v31 = vsel %vm358_vm15, %v343_v24, %v373_v28 }
  0x35   : > { %1377 = vmatpush3.bf16.msra.mxu0 %v1463_v52  ;;  %1329 = vmatpush3.bf16.msra.mxu1 %v1462_v0  ;;  %v463_v27 = vsel %vm415_vm3, %v458_v25, %v462_v23  ;;  %v398_v33 = vpack.c.bf16 %v388_v31, %v388_v31  ;;  %v838_v35 = vrot.slane %v836_v32, 1 }
  0x36   : > { %1378 = vmatprep.subr.bf16.mxu0 %v1465_v5  ;;  %1330 = vmatprep.subr.bf16.mxu1 %v1464_v17 }
  0x37   : > { %1319 = vmatmul.mubr.bf16.gmra.mrb[4].mxu1 %v463_v27  ;;  %v841_v36 = vshll.u32 %v398_v33, 16  ;;  %v839_v37 = vor.u32 %v838_v35, %v834_v34 }
  0x38   : > { %1338 = vmatprep.mubr.bf16.mxu1 %v1631_v50  ;;  %v1470_v50 = vld [vmem:[%s1778_s1 + $0x38] sm:$0xff]  }
  0x39   : > { %1379 = vmatpush3.bf16.msra.mxu0 %v1465_v5  ;;  %1331 = vmatpush3.bf16.msra.mxu1 %v1464_v17  ;;  %v843_v38 = vrot.slane %v841_v36, 1 }
  0x3a   : > { %1380 = vmatprep.subr.bf16.mxu0 %v1467_v21  ;;  %1332 = vmatprep.subr.bf16.mxu1 %v1466_v26 }
  0x3b   : > { %v844_v39 = vsel %vm415_vm3, %v839_v37, %v843_v38 }
  0x3d   : > { %1381 = vmatpush3.bf16.msra.mxu0 %v1467_v21  ;;  %1333 = vmatpush3.bf16.msra.mxu1 %v1466_v26 }
  0x3e   : > { %1382 = vmatprep.subr.bf16.mxu0 %v1469_v18  ;;  %1334 = vmatprep.subr.bf16.mxu1 %v1468_v29 }
  0x41   : > { %1383 = vmatpush3.bf16.msra.mxu0 %v1469_v18  ;;  %1335 = vmatpush3.bf16.msra.mxu1 %v1468_v29 }
  0x42   : > { %1384 = vmatprep.subr.bf16.mxu0 %v1471_v30  ;;  %1336 = vmatprep.subr.bf16.mxu1 %v1470_v50 }
  0x45   : > { %1385 = vmatpush3.bf16.msra.mxu0 %v1471_v30  ;;  %1337 = vmatpush3.bf16.msra.mxu1 %v1470_v50 }
  0x48   : > { %1387 = vmatmul.mubr.bf16.vlgmr.msra.gmra.mrb[0].mxu0 %v451_v22  ;;  %1339 = vmatmul.mubr.bf16.vlgmr.msra.gmra.mrb[0].mxu1 %v1648_v3 }
  0x49   : > { %1390 = vmatprep.mubr.bf16.mxu0 %v463_v27  ;;  %1342 = vmatprep.mubr.bf16.mxu1 %v1657_v19 }
  0x50   : > { %1391 = vmatmul.mubr.bf16.gmra.mrb[4].mxu0 %v844_v39  ;;  %1343 = vmatmul.mubr.bf16.gmra.mrb[4].mxu1 %v1701_v1 }
 0x11b   : > { %v1388_v41 = vpop.f32.mrb[0].mxu0  ;;  %v1340_v19 = vpop.f32.mrb[0].mxu1 }
 0x11c   : > { %v945_v42 = vpop.f32.mrb[1].mxu0  ;;  %v1394_v44 = vadd.f32 %v1388_v41, %v1340_v19  ;;  %v676_v45 = vpop.f32.mrb[1].mxu1 }
 0x11d   : > { %v1389_v3 = vpop.f32.mrb[2].mxu0  ;;  %v1395_v46 = vadd.f32 %v945_v42, %v676_v45  ;;  %v1341_v47 = vpop.f32.mrb[2].mxu1 }
 0x11e   : > { %v948_v43 = vpop.f32.mrb[3].mxu0  ;;  %v978_v48 = vsel %vm976_vm1, %v1394_v44, 0.0  ;;  %v1019_v49 = vpack.c.bf16 %v1394_v44, %v1394_v44  ;;  %v679_v51 = vpop.f32.mrb[3].mxu1 }
 0x11f   : > { %v977_v53 = vsel %vm976_vm1, %v1395_v46, 0.0  ;;  %v1018_v52 = vpack.c.bf16 %v1395_v46, %v1395_v46 }
 0x120   : > { %1023 = vst.msk [vmem:[%s256_s13 + $0x1] sm:$0x1] %vm1013_vm2, %v1019_v49  ;;  %v979_v54 = vadd.f32 %v978_v48, %v977_v53 }
 0x121   : > { %1022 = vst.msk [vmem:[%s256_s13] sm:$0x1] %vm1013_vm2, %v1018_v52 }
 0x123   : > { %v1392_v55 = vpop.f32.mrb[4].mxu0  ;;  %v1344_v58 = vpop.f32.mrb[4].mxu1 }
 0x124   : > { %v959_v56 = vpop.f32.mrb[5].mxu0  ;;  %v1396_v60 = vadd.f32 %v1392_v55, %v1344_v58  ;;  %v690_v61 = vpop.f32.mrb[5].mxu1 }
 0x125   : > { %v1393_v57 = vpop.f32.mrb[6].mxu0  ;;  %v1397_v62 = vadd.f32 %v959_v56, %v690_v61  ;;  %v1345_v63 = vpop.f32.mrb[6].mxu1 }
 0x126   : > { %v962_v59 = vpop.f32.mrb[7].mxu0  ;;  %v1021_v0 = vpack.c.bf16 %v1396_v60, %v1396_v60  ;;  %v693_v1 = vpop.f32.mrb[7].mxu1  ;;  %v982_v6 = vsel %vm976_vm1, %v1396_v60, 0.0 }
 0x127   : > { %v980_v2 = vsel %vm976_vm1, %v1397_v62, 0.0  ;;  %v1020_v4 = vpack.c.bf16 %v1397_v62, %v1397_v62 }
 0x128   : > { %1025 = vst.msk [vmem:[%s256_s13 + $0x3] sm:$0x1] %vm1013_vm2, %v1021_v0  ;;  %v981_v5 = vadd.f32 %v980_v2, %v979_v54 }
 0x129   : > { %1024 = vst.msk [vmem:[%s256_s13 + $0x2] sm:$0x1] %vm1013_vm2, %v1020_v4 }
 0x12a   : > { %v983_v7 = vadd.f32 %v982_v6, %v981_v5 }
 0x12c   : > { %v984_v8 = vrot.slane %v983_v7, 4 }
 0x12e   : > { %v985_v9 = vadd.f32 %v984_v8, %v983_v7 }
 0x130   : > { %v986_v10 = vrot.slane %v985_v9, 2 }
 0x132   : > { %v987_v11 = vadd.f32 %v986_v10, %v985_v9 }
 0x134   : > { %v988_v12 = vrot.slane %v987_v11, 1 }
 0x136   : > { %v989_v14 = vadd.f32 %v988_v12, %v987_v11 }
 0x138   : > { %v991_v15 = vmul.f32 0.125, %v989_v14  ;;  %1014 = vst.msk [vmem:[%s1745_s9] sm:$0x1] %vm1013_vm2, %v989_v14 }
 0x13a   : > { %v992_v16 = vsub.f32 %v1395_v46, %v991_v15  ;;  %v993_v17 = vsub.f32 %v1394_v44, %v991_v15  ;;  %v994_v20 = vsub.f32 %v1397_v62, %v991_v15  ;;  %v995_v13 = vsub.f32 %v1396_v60, %v991_v15 }
 0x13c   : > { %v996_v21 = vmul.f32 %v992_v16, %v992_v16  ;;  %v997_v22 = vmul.f32 %v993_v17, %v993_v17  ;;  %v998_v23 = vmul.f32 %v994_v20, %v994_v20  ;;  %v999_v24 = vmul.f32 %v995_v13, %v995_v13 }
 0x13e   : > { %v1000_v25 = vsel %vm976_vm1, %v996_v21, 0.0  ;;  %v1001_v26 = vsel %vm976_vm1, %v997_v22, 0.0  ;;  %v1003_v18 = vsel %vm976_vm1, %v998_v23, 0.0  ;;  %v1005_v29 = vsel %vm976_vm1, %v999_v24, 0.0 }
 0x13f   : > { %v1002_v27 = vadd.f32 %v1001_v26, %v1000_v25 }
 0x141   : > { %v1004_v28 = vadd.f32 %v1003_v18, %v1002_v27 }
 0x143   : > { %v1006_v30 = vadd.f32 %v1005_v29, %v1004_v28 }
 0x145   : > { %v1007_v31 = vrot.slane %v1006_v30, 4 }
 0x147   : > { %v1008_v32 = vadd.f32 %v1007_v31, %v1006_v30 }
 0x149   : > { %v1009_v50 = vrot.slane %v1008_v32, 2 }
 0x14b   : > { %v1010_v33 = vadd.f32 %v1009_v50, %v1008_v32 }
 0x14d   : > { %v1011_v34 = vrot.slane %v1010_v33, 1 }
 0x14f   : > { %v1012_v35 = vadd.f32 %v1011_v34, %v1010_v33 }
 0x151   : > { %1015 = vst.msk [vmem:[%s1745_s9 + $0x1] sm:$0x1] %vm1013_vm2, %v1012_v35 }
 0x152 PF: > { %s16_s20 = sadd.s32 1, %s1494_s20   ;;  %s1783_s18 = smov %s1490_s19 }
 0x153   : > { %p13_p5 = scmp.ge.s32.totalorder %s16_s20, 6   ;;  %s1784_s19 = smov %s1786_s21 }
 0x155   :  { %15 = sbr.rel (!%p13_p5) target bundleno = 2 (0x2), region = 82 }

</bundles_post_ra>
